<compile_context>
chip_gen: v6e
topology: v6e:2x2x1
jax: 0.10.0
libtpu: 0.0.40
codegen_flags: <defaults>
</compile_context>

<pallas_src>
import jax
import jax.numpy as jnp
from jax.experimental import pallas as pl
from jax.experimental.pallas import tpu as pltpu

EPS = 1e-5
_VMEM_LIMIT_BYTES = 32 * 1024 * 1024    # safe on v5e/v6e (128 MiB) and v7x (64 MiB)
_VMEM_BLOCK_BUDGET = 16 * 1024 * 1024   # conservative per-block budget (headroom)


def _bn_train_kernel(x_ref, g_ref, b_ref, o_ref):
    # x_ref: (N, Cb, HW). Per-channel BN stats reduce over N and HW (axes 0, 2).
    x = x_ref[...]
    if x.dtype != jnp.float32:
        # Explicit f32 accumulation only needed for sub-f32 inputs.
        x = x.astype(jnp.float32)
    n, _, hw = x.shape
    inv_r = 1.0 / (n * hw)

    # Two-pass mean/variance (avoids E[x^2]-mean^2 cancellation); the centered
    # temporary feeds the reduction only and is NOT reused below.
    mean = jnp.sum(x, axis=(0, 2), keepdims=True) * inv_r            # (1, Cb, 1)
    d = x - mean
    var = jnp.sum(d * d, axis=(0, 2), keepdims=True) * inv_r         # (1, Cb, 1)
    inv_std = jax.lax.rsqrt(var + EPS)                                # (1, Cb, 1)

    g = g_ref[...].astype(jnp.float32)
    b = b_ref[...].astype(jnp.float32)

    scale = g * inv_std                                               # (1, Cb, 1)
    shift = b - mean * scale                                          # (1, Cb, 1)

    # Single fused normalization pass: only x is live at full block size.
    o_ref[...] = (x * scale + shift).astype(o_ref.dtype)


def _num_tensorcores() -> int:
    """Best-effort TensorCore count of device 0 (v5e/v6e: 1, v7x: 2)."""
    try:
        n = getattr(jax.devices()[0], "num_cores", 1) or 1
        return max(1, min(int(n), 4))
    except Exception:
        return 1


def _choose_num_channel_blocks(n, c, hw, itemsize, n_cores) -> int:
    """Pick the number of channel blocks: prefer exactly one block per
    TensorCore (minimum per-step overhead); grow only if a block would not fit
    a conservative VMEM budget."""

    def fits(k):
        if c % k:
            return False
        c_blk = c // k
        if c_blk != c and c_blk % 8:       # (8, 128) sublane rule on dim -2
            return False
        blk = n * c_blk * hw
        # in + out double-buffered at source dtype + ~2 f32-sized working temps.
        need = 2 * 2 * blk * itemsize + 2 * blk * 4
        return need <= _VMEM_BLOCK_BUDGET

    for stride in (n_cores, 1):
        k = stride
        while k <= c:
            if fits(k):
                return k
            k += stride
    # TODO(synk): very large N*H*W needs an N*HW reduction grid axis with
    # scratch accumulators (two-phase stats/apply) instead of whole-spatial
    # channel blocks; out of scope for this module's shape.
    return c


def batchnorm2d(x_nchw, gamma, beta):
    """Training-mode BatchNorm2d over NCHW input (matches nn.BatchNorm2d
    forward in train mode with affine=True)."""
    # TODO(synk): running_mean/running_var (momentum) buffer update is a
    # training side effect and does not affect this forward output.
    n, c, h, w = x_nchw.shape
    hw = h * w

    # Free reshapes of contiguous NCHW memory — no transposes, no extra HBM pass.
    x3d = x_nchw.reshape(n, c, hw)
    g3d = gamma.reshape(1, c, 1)
    b3d = beta.reshape(1, c, 1)

    n_blocks = _choose_num_channel_blocks(
        n, c, hw, x_nchw.dtype.itemsize, _num_tensorcores()
    )
    c_blk = c // n_blocks

    out3d = pl.pallas_call(
        _bn_train_kernel,
        out_shape=jax.ShapeDtypeStruct((n, c, hw), x_nchw.dtype),
        grid_spec=pltpu.PrefetchScalarGridSpec(
            num_scalar_prefetch=0,
            grid=(n_blocks,),
            in_specs=[
                pl.BlockSpec((n, c_blk, hw), lambda i: (0, i, 0)),
                pl.BlockSpec((1, c_blk, 1), lambda i: (0, i, 0)),
                pl.BlockSpec((1, c_blk, 1), lambda i: (0, i, 0)),
            ],
            out_specs=pl.BlockSpec((n, c_blk, hw), lambda i: (0, i, 0)),
        ),
        compiler_params=pltpu.CompilerParams(
            dimension_semantics=("parallel",),
            vmem_limit_bytes=_VMEM_LIMIT_BYTES,
        ),
    )(x3d, g3d, b3d)

    # Free reshape back to NCHW.
    return out3d.reshape(n, c, h, w)


if __name__ == "__main__":
    key = jax.random.PRNGKey(0)
    N, C, H, W = 1, 640, 7, 7  # BatchNorm2d(640); spatial per the original module
    x = jax.random.normal(key, (N, C, H, W), dtype=jnp.float32)

    # Deterministic, non-trivial affine parameters (PyTorch default init is
    # ones/zeros; perturb to exercise the affine path).
    gamma = 1.0 + 0.01 * jnp.arange(C, dtype=jnp.float32)
    beta = -0.005 * jnp.arange(C, dtype=jnp.float32)

    out = jax.block_until_ready(batchnorm2d(x, gamma, beta))

    # Sanity check vs. pure-JAX reference (training-mode batch statistics).
    mean = jnp.mean(x, axis=(0, 2, 3), keepdims=True)
    var = jnp.mean((x - mean) ** 2, axis=(0, 2, 3), keepdims=True)
    ref = (x - mean) / jnp.sqrt(var + EPS) * gamma.reshape(1, C, 1, 1) \
        + beta.reshape(1, C, 1, 1)
    assert out.shape == (N, C, H, W)
    assert jnp.max(jnp.abs(out - ref)) < 1e-4

    print("KERNEL_OK")
</pallas_src>

<mosaic_0001>
module attributes {stable_mosaic.version = 11 : i64} {
  func.func @_bn_train_kernel(%arg0: i32, %arg1: memref<1x640x49xf32, #tpu.memory_space<vmem>>, %arg2: memref<1x640x1xf32, #tpu.memory_space<vmem>>, %arg3: memref<1x640x1xf32, #tpu.memory_space<vmem>>, %arg4: memref<1x640x49xf32, #tpu.memory_space<vmem>>) attributes {dimension_semantics = [#tpu.dimension_semantics<parallel>], iteration_bounds = array<i64: 1>, scalar_prefetch = 0 : i64, scratch_operands = 0 : i64, tpu.core_type = #tpu.core_type<tc>, window_params = [{transform_indices = @transform_0, window_bounds = array<i64: 1, 640, 49>}, {transform_indices = @transform_1, window_bounds = array<i64: 1, 640, 1>}, {transform_indices = @transform_2, window_bounds = array<i64: 1, 640, 1>}, {transform_indices = @transform_3, window_bounds = array<i64: 1, 640, 49>}]} {
    %c0 = arith.constant 0 : index
    %c0_0 = arith.constant 0 : index
    %c0_1 = arith.constant 0 : index
    %0 = vector.load %arg1[%c0, %c0_0, %c0_1] : memref<1x640x49xf32, #tpu.memory_space<vmem>>, vector<1x640x49xf32>
    %cst = arith.constant dense<0.000000e+00> : vector<640xf32>
    %1 = vector.multi_reduction <add>, %0, %cst [0, 2] : vector<1x640x49xf32> to vector<640xf32>
    %2 = vector.shape_cast %1 : vector<640xf32> to vector<1x640x1xf32>
    %cst_2 = arith.constant 0.0204081628 : f32
    %3 = vector.broadcast %cst_2 : f32 to vector<1x640x1xf32>
    %4 = arith.mulf %2, %3 : vector<1x640x1xf32>
    %5 = vector.broadcast %4 : vector<1x640x1xf32> to vector<1x640x49xf32>
    %6 = arith.subf %0, %5 : vector<1x640x49xf32>
    %7 = arith.mulf %6, %6 : vector<1x640x49xf32>
    %cst_3 = arith.constant dense<0.000000e+00> : vector<640xf32>
    %8 = vector.multi_reduction <add>, %7, %cst_3 [0, 2] : vector<1x640x49xf32> to vector<640xf32>
    %9 = vector.shape_cast %8 : vector<640xf32> to vector<1x640x1xf32>
    %cst_4 = arith.constant 0.0204081628 : f32
    %10 = vector.broadcast %cst_4 : f32 to vector<1x640x1xf32>
    %11 = arith.mulf %9, %10 : vector<1x640x1xf32>
    %cst_5 = arith.constant 9.99999974E-6 : f32
    %12 = vector.broadcast %cst_5 : f32 to vector<1x640x1xf32>
    %13 = arith.addf %11, %12 : vector<1x640x1xf32>
    %14 = math.rsqrt %13 : vector<1x640x1xf32>
    %c0_6 = arith.constant 0 : index
    %c0_7 = arith.constant 0 : index
    %c0_8 = arith.constant 0 : index
    %15 = vector.load %arg2[%c0_6, %c0_7, %c0_8] : memref<1x640x1xf32, #tpu.memory_space<vmem>>, vector<1x640x1xf32>
    %c0_9 = arith.constant 0 : index
    %c0_10 = arith.constant 0 : index
    %c0_11 = arith.constant 0 : index
    %16 = vector.load %arg3[%c0_9, %c0_10, %c0_11] : memref<1x640x1xf32, #tpu.memory_space<vmem>>, vector<1x640x1xf32>
    %17 = arith.mulf %15, %14 : vector<1x640x1xf32>
    %18 = arith.mulf %4, %17 : vector<1x640x1xf32>
    %19 = arith.subf %16, %18 : vector<1x640x1xf32>
    %20 = vector.broadcast %17 : vector<1x640x1xf32> to vector<1x640x49xf32>
    %21 = arith.mulf %0, %20 : vector<1x640x49xf32>
    %22 = vector.broadcast %19 : vector<1x640x1xf32> to vector<1x640x49xf32>
    %23 = arith.addf %21, %22 : vector<1x640x49xf32>
    %c0_12 = arith.constant 0 : index
    %c0_13 = arith.constant 0 : index
    %c0_14 = arith.constant 0 : index
    %24 = vector.load %arg4[%c0_12, %c0_13, %c0_14] : memref<1x640x49xf32, #tpu.memory_space<vmem>>, vector<1x640x49xf32>
    tpu.vector_store %arg4[%c0_12, %c0_13, %c0_14], %23 {strides = array<i32>} : memref<1x640x49xf32, #tpu.memory_space<vmem>>, vector<1x640x49xf32>,
    return
  }
  func.func @transform_0(%arg0: i32) -> (i32, i32, i32) {
    %c0_i32 = arith.constant 0 : i32
    %c0_i32_0 = arith.constant 0 : i32
    %c0_i32_1 = arith.constant 0 : i32
    return %c0_i32, %arg0, %c0_i32_0 : i32, i32, i32
  }
  func.func @transform_1(%arg0: i32) -> (i32, i32, i32) {
    %c0_i32 = arith.constant 0 : i32
    %c0_i32_0 = arith.constant 0 : i32
    %c0_i32_1 = arith.constant 0 : i32
    return %c0_i32, %arg0, %c0_i32_0 : i32, i32, i32
  }
  func.func @transform_2(%arg0: i32) -> (i32, i32, i32) {
    %c0_i32 = arith.constant 0 : i32
    %c0_i32_0 = arith.constant 0 : i32
    %c0_i32_1 = arith.constant 0 : i32
    return %c0_i32, %arg0, %c0_i32_0 : i32, i32, i32
  }
  func.func @transform_3(%arg0: i32) -> (i32, i32, i32) {
    %c0_i32 = arith.constant 0 : i32
    %c0_i32_0 = arith.constant 0 : i32
    %c0_i32_1 = arith.constant 0 : i32
    return %c0_i32, %arg0, %c0_i32_0 : i32, i32, i32
  }
}

</mosaic_0001>

<bundles_post_ra>
// kernel: tpu_custom_call.1
= control target key start
LH: loop header
LB: loop body
LE: loop exit
PB: predicated region body
PF: predicated region fallthrough
CT: control target
= control target key end

     0   :  { %vm94_vm0 = vcmask 400384   ;;  %s5502_s0 = inlined_call_operand.vmem [shape: f32[1,640,49], index: 0, kind: input, shape index: {}]   ;;  %s5503_s1 = inlined_call_operand.vmem [shape: f32[1,640,1], index: 1, kind: input, shape index: {}]   ;;  %s5504_s2 = inlined_call_operand.vmem [shape: f32[1,640,1], index: 2, kind: input, shape index: {}]   ;;  %s5505_s3 = inlined_call_operand.vmem [shape: f32[1,640,49], index: 3, kind: output, shape index: {}]  }
   0x1   :  { %v2766_v0 = vld [vmem:[%s5502_s0 + $0x10] sm:$0xff]  ;;  %v2771_v1 = vld [vmem:[%s5502_s0] sm:$0xff]  ;;  %v2776_v2 = vld [vmem:[%s5502_s0 + $0x18] sm:$0xff] }
   0x2   :  { %v101_v3 = vsel %vm94_vm0, %v2766_v0, 0.0  ;;  %v95_v4 = vsel %vm94_vm0, %v2771_v1, 0.0  ;;  %v2785_v5 = vld [vmem:[%s5502_s0 + $0x8] sm:$0xff]  ;;  %v104_v6 = vsel %vm94_vm0, %v2776_v2, 0.0  ;;  %v2799_v9 = vld [vmem:[%s5502_s0 + $0x20] sm:$0xff]  ;;  %v2808_v12 = vld [vmem:[%s5502_s0 + $0x38] sm:$0xff] }
   0x3   :  { %102 = vadd.xlane.f32.xlu1 %v101_v3  ;;  %96 = vadd.xlane.f32.xlu0 %v95_v4  ;;  %v98_v7 = vsel %vm94_vm0, %v2785_v5, 0.0  ;;  %v2794_v8 = vld [vmem:[%s5502_s0 + $0x28] sm:$0xff]  ;;  %v107_v11 = vsel %vm94_vm0, %v2799_v9, 0.0  ;;  %v2813_v13 = vld [vmem:[%s5502_s0 + $0x30] sm:$0xff]  ;;  %v116_v14 = vsel %vm94_vm0, %v2808_v12, 0.0  ;;  %v2827_v17 = vld [vmem:[%s5502_s0 + $0x40] sm:$0xff] }
   0x4   :  { %v110_v10 = vsel %vm94_vm0, %v2794_v8, 0.0  ;;  %v113_v15 = vsel %vm94_vm0, %v2813_v13, 0.0  ;;  %v2822_v16 = vld [vmem:[%s5502_s0 + $0x48] sm:$0xff]  ;;  %v119_v19 = vsel %vm94_vm0, %v2827_v17, 0.0  ;;  %v2836_v20 = vld [vmem:[%s5502_s0 + $0x58] sm:$0xff]  ;;  %v2841_v21 = vld [vmem:[%s5502_s0 + $0x50] sm:$0xff] }
   0x5   :  { %v122_v18 = vsel %vm94_vm0, %v2822_v16, 0.0  ;;  %v128_v22 = vsel %vm94_vm0, %v2836_v20, 0.0  ;;  %v125_v23 = vsel %vm94_vm0, %v2841_v21, 0.0  ;;  %v2850_v24 = vld [vmem:[%s5502_s0 + $0x68] sm:$0xff]  ;;  %v2855_v25 = vld [vmem:[%s5502_s0 + $0x60] sm:$0xff]  ;;  %v2864_v28 = vld [vmem:[%s5502_s0 + $0x78] sm:$0xff] }
   0x6   :  { %v134_v26 = vsel %vm94_vm0, %v2850_v24, 0.0  ;;  %v131_v27 = vsel %vm94_vm0, %v2855_v25, 0.0  ;;  %v2869_v29 = vld [vmem:[%s5502_s0 + $0x70] sm:$0xff]  ;;  %v140_v30 = vsel %vm94_vm0, %v2864_v28, 0.0  ;;  %v2878_v32 = vld [vmem:[%s5502_s0 + $0x88] sm:$0xff]  ;;  %v2883_v33 = vld [vmem:[%s5502_s0 + $0x80] sm:$0xff] }
   0x7   :  { %105 = vadd.xlane.f32.xlu1 %v104_v6  ;;  %99 = vadd.xlane.f32.xlu0 %v98_v7  ;;  %v137_v31 = vsel %vm94_vm0, %v2869_v29, 0.0  ;;  %v146_v34 = vsel %vm94_vm0, %v2878_v32, 0.0  ;;  %v143_v35 = vsel %vm94_vm0, %v2883_v33, 0.0  ;;  %v2892_v36 = vld [vmem:[%s5502_s0 + $0x98] sm:$0xff]  ;;  %v2897_v37 = vld [vmem:[%s5502_s0 + $0x90] sm:$0xff]  ;;  %v2906_v40 = vld [vmem:[%s5502_s0 + $0xa8] sm:$0xff] }
   0x8   :  { %v152_v38 = vsel %vm94_vm0, %v2892_v36, 0.0  ;;  %v149_v39 = vsel %vm94_vm0, %v2897_v37, 0.0  ;;  %v2911_v41 = vld [vmem:[%s5502_s0 + $0xa0] sm:$0xff]  ;;  %v158_v42 = vsel %vm94_vm0, %v2906_v40, 0.0  ;;  %v2920_v44 = vld [vmem:[%s5502_s0 + $0xb8] sm:$0xff]  ;;  %v2925_v45 = vld [vmem:[%s5502_s0 + $0xb0] sm:$0xff] }
   0x9   :  { %v155_v43 = vsel %vm94_vm0, %v2911_v41, 0.0  ;;  %v164_v46 = vsel %vm94_vm0, %v2920_v44, 0.0  ;;  %v161_v47 = vsel %vm94_vm0, %v2925_v45, 0.0  ;;  %v2934_v48 = vld [vmem:[%s5502_s0 + $0xc8] sm:$0xff]  ;;  %v2939_v49 = vld [vmem:[%s5502_s0 + $0xc0] sm:$0xff]  ;;  %v2948_v52 = vld [vmem:[%s5502_s0 + $0xd8] sm:$0xff] }
   0xa   :  { %v170_v50 = vsel %vm94_vm0, %v2934_v48, 0.0  ;;  %v167_v51 = vsel %vm94_vm0, %v2939_v49, 0.0  ;;  %v2953_v53 = vld [vmem:[%s5502_s0 + $0xd0] sm:$0xff]  ;;  %v176_v54 = vsel %vm94_vm0, %v2948_v52, 0.0  ;;  %v2962_v56 = vld [vmem:[%s5502_s0 + $0xe8] sm:$0xff]  ;;  %v2967_v57 = vld [vmem:[%s5502_s0 + $0xe0] sm:$0xff] }
   0xb   :  { %111 = vadd.xlane.f32.xlu1 %v110_v10  ;;  %108 = vadd.xlane.f32.xlu0 %v107_v11  ;;  %v173_v55 = vsel %vm94_vm0, %v2953_v53, 0.0  ;;  %v182_v58 = vsel %vm94_vm0, %v2962_v56, 0.0  ;;  %v179_v59 = vsel %vm94_vm0, %v2967_v57, 0.0  ;;  %v2976_v60 = vld [vmem:[%s5502_s0 + $0xf8] sm:$0xff]  ;;  %v2981_v61 = vld [vmem:[%s5502_s0 + $0xf0] sm:$0xff]  ;;  %v2990_v3 = vld [vmem:[%s5502_s0 + $0x108] sm:$0xff] }
   0xc   :  { %v188_v62 = vsel %vm94_vm0, %v2976_v60, 0.0  ;;  %v185_v63 = vsel %vm94_vm0, %v2981_v61, 0.0  ;;  %v2995_v4 = vld [vmem:[%s5502_s0 + $0x100] sm:$0xff]  ;;  %v194_v6 = vsel %vm94_vm0, %v2990_v3, 0.0  ;;  %v3004_v10 = vld [vmem:[%s5502_s0 + $0x118] sm:$0xff]  ;;  %v3009_v11 = vld [vmem:[%s5502_s0 + $0x110] sm:$0xff] }
   0xd   :  { %v191_v7 = vsel %vm94_vm0, %v2995_v4, 0.0 }
   0xf   :  { %117 = vadd.xlane.f32.xlu1 %v116_v14  ;;  %114 = vadd.xlane.f32.xlu0 %v113_v15  ;;  %v200_v14 = vsel %vm94_vm0, %v3004_v10, 0.0  ;;  %v197_v15 = vsel %vm94_vm0, %v3009_v11, 0.0 }
  0x13   :  { %123 = vadd.xlane.f32.xlu1 %v122_v18  ;;  %120 = vadd.xlane.f32.xlu0 %v119_v19  ;;  %v3018_v18 = vld [vmem:[%s5502_s0 + $0x128] sm:$0xff]  ;;  %v3023_v19 = vld [vmem:[%s5502_s0 + $0x120] sm:$0xff] }
  0x17   :  { %129 = vadd.xlane.f32.xlu1 %v128_v22  ;;  %126 = vadd.xlane.f32.xlu0 %v125_v23  ;;  %v206_v22 = vsel %vm94_vm0, %v3018_v18, 0.0  ;;  %v203_v23 = vsel %vm94_vm0, %v3023_v19, 0.0 }
  0x1b   :  { %135 = vadd.xlane.f32.xlu1 %v134_v26  ;;  %132 = vadd.xlane.f32.xlu0 %v131_v27  ;;  %v3032_v26 = vld [vmem:[%s5502_s0 + $0x138] sm:$0xff]  ;;  %v3037_v27 = vld [vmem:[%s5502_s0 + $0x130] sm:$0xff] }
  0x1f   :  { %141 = vadd.xlane.f32.xlu1 %v140_v30  ;;  %138 = vadd.xlane.f32.xlu0 %v137_v31  ;;  %v212_v30 = vsel %vm94_vm0, %v3032_v26, 0.0  ;;  %v209_v31 = vsel %vm94_vm0, %v3037_v27, 0.0 }
  0x23   :  { %147 = vadd.xlane.f32.xlu1 %v146_v34  ;;  %144 = vadd.xlane.f32.xlu0 %v143_v35  ;;  %v3046_v34 = vld [vmem:[%s5502_s0 + $0x148] sm:$0xff]  ;;  %v3051_v35 = vld [vmem:[%s5502_s0 + $0x140] sm:$0xff] }
  0x27   :  { %153 = vadd.xlane.f32.xlu1 %v152_v38  ;;  %150 = vadd.xlane.f32.xlu0 %v149_v39  ;;  %v218_v38 = vsel %vm94_vm0, %v3046_v34, 0.0  ;;  %v215_v39 = vsel %vm94_vm0, %v3051_v35, 0.0 }
  0x2b   :  { %159 = vadd.xlane.f32.xlu1 %v158_v42  ;;  %156 = vadd.xlane.f32.xlu0 %v155_v43  ;;  %v3060_v42 = vld [vmem:[%s5502_s0 + $0x158] sm:$0xff]  ;;  %v3065_v43 = vld [vmem:[%s5502_s0 + $0x150] sm:$0xff] }
  0x2c   :  { %5650 = vst [vmem:[#allocation2_spill] sm:$0xff] %v3060_v42 }
  0x2f   :  { %165 = vadd.xlane.f32.xlu1 %v164_v46  ;;  %162 = vadd.xlane.f32.xlu0 %v161_v47  ;;  %v224_v46 = vsel %vm94_vm0, %v3060_v42, 0.0  ;;  %v221_v47 = vsel %vm94_vm0, %v3065_v43, 0.0 }
  0x33   :  { %171 = vadd.xlane.f32.xlu1 %v170_v50  ;;  %168 = vadd.xlane.f32.xlu0 %v167_v51  ;;  %v3074_v50 = vld [vmem:[%s5502_s0 + $0x168] sm:$0xff]  ;;  %v3079_v51 = vld [vmem:[%s5502_s0 + $0x160] sm:$0xff] }
  0x34   :  { %5651 = vst [vmem:[#allocation3_spill] sm:$0xff] %v3074_v50  ;;  %5652 = vst [vmem:[#allocation4_spill] sm:$0xff] %v3079_v51 }
  0x37   :  { %177 = vadd.xlane.f32.xlu1 %v176_v54  ;;  %174 = vadd.xlane.f32.xlu0 %v173_v55  ;;  %v230_v54 = vsel %vm94_vm0, %v3074_v50, 0.0  ;;  %v227_v55 = vsel %vm94_vm0, %v3079_v51, 0.0 }
  0x3b   :  { %183 = vadd.xlane.f32.xlu1 %v182_v58  ;;  %180 = vadd.xlane.f32.xlu0 %v179_v59  ;;  %v3088_v58 = vld [vmem:[%s5502_s0 + $0x178] sm:$0xff]  ;;  %v3093_v59 = vld [vmem:[%s5502_s0 + $0x170] sm:$0xff] }
  0x3c   :  { %5653 = vst [vmem:[#allocation5_spill] sm:$0xff] %v3088_v58  ;;  %5654 = vst [vmem:[#allocation6_spill] sm:$0xff] %v3093_v59 }
  0x3f   :  { %189 = vadd.xlane.f32.xlu1 %v188_v62  ;;  %186 = vadd.xlane.f32.xlu0 %v185_v63  ;;  %v236_v62 = vsel %vm94_vm0, %v3088_v58, 0.0  ;;  %v233_v63 = vsel %vm94_vm0, %v3093_v59, 0.0 }
  0x43   :  { %195 = vadd.xlane.f32.xlu1 %v194_v6  ;;  %192 = vadd.xlane.f32.xlu0 %v191_v7  ;;  %v3102_v6 = vld [vmem:[%s5502_s0 + $0x188] sm:$0xff]  ;;  %v3107_v7 = vld [vmem:[%s5502_s0 + $0x180] sm:$0xff] }
  0x44   :  { %5655 = vst [vmem:[#allocation7_spill] sm:$0xff] %v3102_v6  ;;  %5656 = vst [vmem:[#allocation8_spill] sm:$0xff] %v3107_v7 }
  0x47   :  { %201 = vadd.xlane.f32.xlu1 %v200_v14  ;;  %198 = vadd.xlane.f32.xlu0 %v197_v15  ;;  %v242_v14 = vsel %vm94_vm0, %v3102_v6, 0.0  ;;  %v239_v15 = vsel %vm94_vm0, %v3107_v7, 0.0 }
  0x4b   :  { %207 = vadd.xlane.f32.xlu1 %v206_v22  ;;  %204 = vadd.xlane.f32.xlu0 %v203_v23  ;;  %v3116_v22 = vld [vmem:[%s5502_s0 + $0x198] sm:$0xff]  ;;  %v3121_v23 = vld [vmem:[%s5502_s0 + $0x190] sm:$0xff] }
  0x4c   :  { %5657 = vst [vmem:[#allocation9_spill] sm:$0xff] %v3116_v22  ;;  %5658 = vst [vmem:[#allocation10_spill] sm:$0xff] %v3121_v23 }
  0x4f   :  { %213 = vadd.xlane.f32.xlu1 %v212_v30  ;;  %210 = vadd.xlane.f32.xlu0 %v209_v31  ;;  %v248_v30 = vsel %vm94_vm0, %v3116_v22, 0.0  ;;  %v245_v31 = vsel %vm94_vm0, %v3121_v23, 0.0  ;;  %v3300_v23 = vld [vmem:[%s5502_s0 + $0x268] sm:$0xff] }
  0x50   :  { %5684 = vst [vmem:[#allocation36_spill] sm:$0xff] %v3300_v23 }
  0x53   :  { %219 = vadd.xlane.f32.xlu1 %v218_v38  ;;  %216 = vadd.xlane.f32.xlu0 %v215_v39  ;;  %v3130_v38 = vld [vmem:[%s5502_s0 + $0x1a8] sm:$0xff]  ;;  %v3135_v39 = vld [vmem:[%s5502_s0 + $0x1a0] sm:$0xff] }
  0x54   :  { %5659 = vst [vmem:[#allocation11_spill] sm:$0xff] %v3130_v38  ;;  %5660 = vst [vmem:[#allocation12_spill] sm:$0xff] %v3135_v39 }
  0x57   :  { %225 = vadd.xlane.f32.xlu1 %v224_v46  ;;  %222 = vadd.xlane.f32.xlu0 %v221_v47  ;;  %v254_v46 = vsel %vm94_vm0, %v3130_v38, 0.0  ;;  %v251_v47 = vsel %vm94_vm0, %v3135_v39, 0.0  ;;  %v3284_v38 = vld [vmem:[%s5502_s0 + $0x258] sm:$0xff]  ;;  %v3289_v39 = vld [vmem:[%s5502_s0 + $0x250] sm:$0xff] }
  0x58   :  { %5681 = vst [vmem:[#allocation33_spill] sm:$0xff] %v3284_v38  ;;  %5682 = vst [vmem:[#allocation34_spill] sm:$0xff] %v3289_v39 }
  0x5b   :  { %231 = vadd.xlane.f32.xlu1 %v230_v54  ;;  %228 = vadd.xlane.f32.xlu0 %v227_v55  ;;  %v3144_v54 = vld [vmem:[%s5502_s0 + $0x1b8] sm:$0xff]  ;;  %v3149_v55 = vld [vmem:[%s5502_s0 + $0x1b0] sm:$0xff] }
  0x5c   :  { %5661 = vst [vmem:[#allocation13_spill] sm:$0xff] %v3144_v54  ;;  %5662 = vst [vmem:[#allocation14_spill] sm:$0xff] %v3149_v55 }
  0x5f   :  { %237 = vadd.xlane.f32.xlu1 %v236_v62  ;;  %234 = vadd.xlane.f32.xlu0 %v233_v63  ;;  %v260_v62 = vsel %vm94_vm0, %v3144_v54, 0.0  ;;  %v257_v63 = vsel %vm94_vm0, %v3149_v55, 0.0  ;;  %v3270_v54 = vld [vmem:[%s5502_s0 + $0x248] sm:$0xff]  ;;  %v3275_v55 = vld [vmem:[%s5502_s0 + $0x240] sm:$0xff] }
  0x60   :  { %5679 = vst [vmem:[#allocation31_spill] sm:$0xff] %v3270_v54  ;;  %5680 = vst [vmem:[#allocation32_spill] sm:$0xff] %v3275_v55 }
  0x63   :  { %243 = vadd.xlane.f32.xlu1 %v242_v14  ;;  %240 = vadd.xlane.f32.xlu0 %v239_v15  ;;  %v3158_v14 = vld [vmem:[%s5502_s0 + $0x1c8] sm:$0xff]  ;;  %v3163_v15 = vld [vmem:[%s5502_s0 + $0x1c0] sm:$0xff] }
  0x64   :  { %5663 = vst [vmem:[#allocation15_spill] sm:$0xff] %v3158_v14  ;;  %5664 = vst [vmem:[#allocation16_spill] sm:$0xff] %v3163_v15 }
  0x67   :  { %249 = vadd.xlane.f32.xlu1 %v248_v30  ;;  %246 = vadd.xlane.f32.xlu0 %v245_v31  ;;  %v266_v30 = vsel %vm94_vm0, %v3158_v14, 0.0  ;;  %v263_v31 = vsel %vm94_vm0, %v3163_v15, 0.0  ;;  %v3186_v14 = vld [vmem:[%s5502_s0 + $0x1e8] sm:$0xff]  ;;  %v3191_v15 = vld [vmem:[%s5502_s0 + $0x1e0] sm:$0xff] }
  0x68   :  { %5667 = vst [vmem:[#allocation19_spill] sm:$0xff] %v3186_v14  ;;  %5668 = vst [vmem:[#allocation20_spill] sm:$0xff] %v3191_v15 }
  0x6b   :  { %255 = vadd.xlane.f32.xlu1 %v254_v46  ;;  %252 = vadd.xlane.f32.xlu0 %v251_v47  ;;  %v3172_v46 = vld [vmem:[%s5502_s0 + $0x1d8] sm:$0xff]  ;;  %v3177_v47 = vld [vmem:[%s5502_s0 + $0x1d0] sm:$0xff] }
  0x6c   :  { %5665 = vst [vmem:[#allocation17_spill] sm:$0xff] %v3172_v46  ;;  %5666 = vst [vmem:[#allocation18_spill] sm:$0xff] %v3177_v47 }
  0x6f   :  { %261 = vadd.xlane.f32.xlu1 %v260_v62  ;;  %258 = vadd.xlane.f32.xlu0 %v257_v63  ;;  %v272_v62 = vsel %vm94_vm0, %v3172_v46, 0.0  ;;  %v269_v63 = vsel %vm94_vm0, %v3177_v47, 0.0  ;;  %v3200_v46 = vld [vmem:[%s5502_s0 + $0x1f8] sm:$0xff]  ;;  %v3205_v47 = vld [vmem:[%s5502_s0 + $0x1f0] sm:$0xff] }
  0x70   :  { %5669 = vst [vmem:[#allocation21_spill] sm:$0xff] %v3200_v46  ;;  %5670 = vst [vmem:[#allocation22_spill] sm:$0xff] %v3205_v47 }
  0x73   :  { %267 = vadd.xlane.f32.xlu1 %v266_v30  ;;  %264 = vadd.xlane.f32.xlu0 %v263_v31  ;;  %v278_v30 = vsel %vm94_vm0, %v3186_v14, 0.0  ;;  %v275_v31 = vsel %vm94_vm0, %v3191_v15, 0.0  ;;  %v3214_v14 = vld [vmem:[%s5502_s0 + $0x208] sm:$0xff]  ;;  %v3219_v15 = vld [vmem:[%s5502_s0 + $0x200] sm:$0xff] }
  0x74   :  { %5671 = vst [vmem:[#allocation23_spill] sm:$0xff] %v3214_v14  ;;  %5672 = vst [vmem:[#allocation24_spill] sm:$0xff] %v3219_v15 }
  0x77   :  { %273 = vadd.xlane.f32.xlu1 %v272_v62  ;;  %270 = vadd.xlane.f32.xlu0 %v269_v63  ;;  %v284_v62 = vsel %vm94_vm0, %v3200_v46, 0.0  ;;  %v281_v63 = vsel %vm94_vm0, %v3205_v47, 0.0  ;;  %v3228_v46 = vld [vmem:[%s5502_s0 + $0x218] sm:$0xff]  ;;  %v3233_v47 = vld [vmem:[%s5502_s0 + $0x210] sm:$0xff] }
  0x78   :  { %5673 = vst [vmem:[#allocation25_spill] sm:$0xff] %v3228_v46  ;;  %5674 = vst [vmem:[#allocation26_spill] sm:$0xff] %v3233_v47 }
  0x7b   :  { %279 = vadd.xlane.f32.xlu1 %v278_v30  ;;  %276 = vadd.xlane.f32.xlu0 %v275_v31  ;;  %v290_v30 = vsel %vm94_vm0, %v3214_v14, 0.0  ;;  %v287_v31 = vsel %vm94_vm0, %v3219_v15, 0.0  ;;  %v3242_v14 = vld [vmem:[%s5502_s0 + $0x228] sm:$0xff]  ;;  %v3247_v15 = vld [vmem:[%s5502_s0 + $0x220] sm:$0xff] }
  0x7c   :  { %5675 = vst [vmem:[#allocation27_spill] sm:$0xff] %v3242_v14  ;;  %5676 = vst [vmem:[#allocation28_spill] sm:$0xff] %v3247_v15 }
  0x7f   :  { %285 = vadd.xlane.f32.xlu1 %v284_v62  ;;  %282 = vadd.xlane.f32.xlu0 %v281_v63  ;;  %v296_v62 = vsel %vm94_vm0, %v3228_v46, 0.0  ;;  %v293_v63 = vsel %vm94_vm0, %v3233_v47, 0.0  ;;  %v3256_v46 = vld [vmem:[%s5502_s0 + $0x238] sm:$0xff]  ;;  %v3261_v47 = vld [vmem:[%s5502_s0 + $0x230] sm:$0xff] }
  0x80   :  { %5677 = vst [vmem:[#allocation29_spill] sm:$0xff] %v3256_v46  ;;  %5678 = vst [vmem:[#allocation30_spill] sm:$0xff] %v3261_v47 }
  0x83   :  { %291 = vadd.xlane.f32.xlu1 %v290_v30  ;;  %288 = vadd.xlane.f32.xlu0 %v287_v31  ;;  %v302_v30 = vsel %vm94_vm0, %v3242_v14, 0.0  ;;  %v299_v31 = vsel %vm94_vm0, %v3247_v15, 0.0  ;;  %v308_v14 = vsel %vm94_vm0, %v3256_v46, 0.0  ;;  %v305_v15 = vsel %vm94_vm0, %v3261_v47, 0.0 }
  0x84   :  { %v314_v46 = vsel %vm94_vm0, %v3270_v54, 0.0  ;;  %v311_v47 = vsel %vm94_vm0, %v3275_v55, 0.0  ;;  %v320_v54 = vsel %vm94_vm0, %v3284_v38, 0.0  ;;  %v317_v55 = vsel %vm94_vm0, %v3289_v39, 0.0 }
  0x85   :  { %v326_v38 = vsel %vm94_vm0, %v3300_v23, 0.0 }
  0x87   :  { %297 = vadd.xlane.f32.xlu1 %v296_v62  ;;  %294 = vadd.xlane.f32.xlu0 %v293_v63 }
  0x8b   :  { %303 = vadd.xlane.f32.xlu1 %v302_v30  ;;  %300 = vadd.xlane.f32.xlu0 %v299_v31 }
  0x8c   :  { %v103_v62 = vpop.xlane.xlu1 %102  ;;  %v97_v63 = vpop.xlane.xlu0 %96 }
  0x8d   :  { %v3315_v58 = vmul.f32 0.020408163, %v103_v62 }
  0x8f   :  { %309 = vadd.xlane.f32.xlu1 %v308_v14  ;;  %306 = vadd.xlane.f32.xlu0 %v305_v15 }
  0x90   :  { %v106_v30 = vpop.xlane.xlu1 %105  ;;  %v100_v31 = vpop.xlane.xlu0 %99 }
  0x91   :  { %v3291_v14 = vmul.f32 0.020408163, %v100_v31 }
  0x93   :  { %315 = vadd.xlane.f32.xlu1 %v314_v46  ;;  %312 = vadd.xlane.f32.xlu0 %v311_v47  ;;  %5683 = vst [vmem:[#allocation35_spill] sm:$0xff] %v3291_v14  ;;  %v3305_v46 = vld [vmem:[%s5502_s0 + $0x260] sm:$0xff]  ;;  %v3307_v47 = vmul.f32 0.020408163, %v97_v63  ;;  %v416_v7 = vsub.f32 %v2785_v5, %v3291_v14  ;;  %v3320_v63 = vld [vmem:[%s5502_s0 + $0x278] sm:$0xff] }
  0x94   :  { %v112_v15 = vpop.xlane.xlu1 %111  ;;  %v109_v22 = vpop.xlane.xlu0 %108  ;;  %5685 = vst [vmem:[#allocation37_spill] sm:$0xff] %v3305_v46  ;;  %v323_v39 = vsel %vm94_vm0, %v3305_v46, 0.0  ;;  %5687 = vst [vmem:[#allocation39_spill] sm:$0xff] %v3320_v63  ;;  %v332_v46 = vsel %vm94_vm0, %v3320_v63, 0.0 }
  0x95   :  { %5686 = vst [vmem:[#allocation38_spill] sm:$0xff] %v3307_v47  ;;  %v415_v23 = vsub.f32 %v2771_v1, %v3307_v47  ;;  %v3331_v5 = vmul.f32 0.020408163, %v109_v22  ;;  %v496_v50 = vmul.f32 %v416_v7, %v416_v7  ;;  %v3339_v51 = vmul.f32 0.020408163, %v112_v15 }
  0x97   :  { %321 = vadd.xlane.f32.xlu1 %v320_v54  ;;  %318 = vadd.xlane.f32.xlu0 %v317_v55  ;;  %v3325_v54 = vld [vmem:[%s5502_s0 + $0x270] sm:$0xff]  ;;  %v3327_v55 = vmul.f32 0.020408163, %v106_v30  ;;  %v417_v30 = vsub.f32 %v2766_v0, %v3315_v58  ;;  %v495_v42 = vmul.f32 %v415_v23, %v415_v23  ;;  %v578_v47 = vsel %vm94_vm0, %v496_v50, 0.0 }
  0x98   :  { %v118_v31 = vpop.xlane.xlu1 %117  ;;  %v115_v6 = vpop.xlane.xlu0 %114  ;;  %5688 = vst [vmem:[#allocation40_spill] sm:$0xff] %v3325_v54  ;;  %v329_v59 = vsel %vm94_vm0, %v3325_v54, 0.0  ;;  %v419_v7 = vsub.f32 %v2799_v9, %v3331_v5 }
  0x99   :  { %v418_v1 = vsub.f32 %v2776_v2, %v3327_v55  ;;  %v3343_v22 = vmul.f32 0.020408163, %v115_v6  ;;  %v497_v63 = vmul.f32 %v417_v30, %v417_v30  ;;  %v3348_v54 = vmul.f32 0.020408163, %v118_v31 }
  0x9a   :  { %v575_v0 = vsel %vm94_vm0, %v495_v42, 0.0  ;;  %v420_v2 = vsub.f32 %v2794_v8, %v3339_v51 }
  0x9b   :  { %327 = vadd.xlane.f32.xlu1 %v326_v38  ;;  %324 = vadd.xlane.f32.xlu0 %v323_v39  ;;  %v498_v23 = vmul.f32 %v418_v1, %v418_v1  ;;  %v421_v50 = vsub.f32 %v2813_v13, %v3343_v22  ;;  %v581_v9 = vsel %vm94_vm0, %v497_v63, 0.0  ;;  %v422_v8 = vsub.f32 %v2808_v12, %v3348_v54 }
  0x9c   :  { %v124_v62 = vpop.xlane.xlu1 %123  ;;  %v121_v14 = vpop.xlane.xlu0 %120  ;;  %v500_v30 = vmul.f32 %v420_v2, %v420_v2 }
  0x9d   :  { %v3358_v31 = vmul.f32 0.020408163, %v124_v62  ;;  %v584_v42 = vsel %vm94_vm0, %v498_v23, 0.0  ;;  %v502_v23 = vmul.f32 %v422_v8, %v422_v8 }
  0x9e   :  { %v590_v62 = vsel %vm94_vm0, %v500_v30, 0.0 }
  0x9f   :  { %333 = vadd.xlane.f32.xlu1 %v332_v46  ;;  %330 = vadd.xlane.f32.xlu0 %v329_v59  ;;  %v3353_v59 = vmul.f32 0.020408163, %v121_v14  ;;  %v499_v46 = vmul.f32 %v419_v7, %v419_v7  ;;  %v424_v12 = vsub.f32 %v2822_v16, %v3358_v31 }
  0xa0   :  { %v130_v38 = vpop.xlane.xlu1 %129  ;;  %v127_v39 = vpop.xlane.xlu0 %126 }
  0xa1   :  { %v3363_v14 = vmul.f32 0.020408163, %v127_v39  ;;  %v587_v7 = vsel %vm94_vm0, %v499_v46, 0.0  ;;  %v423_v13 = vsub.f32 %v2827_v17, %v3353_v59  ;;  %v3368_v63 = vmul.f32 0.020408163, %v130_v38 }
  0xa2   :  { %v504_v30 = vmul.f32 %v424_v12, %v424_v12 }
  0xa3   :  { %576 = vadd.xlane.f32.xlu0 %v575_v0  ;;  %579 = vadd.xlane.f32.xlu1 %v578_v47  ;;  %v501_v0 = vmul.f32 %v421_v50, %v421_v50  ;;  %v503_v50 = vmul.f32 %v423_v13, %v423_v13  ;;  %v425_v17 = vsub.f32 %v2841_v21, %v3363_v14 }
  0xa4   :  { %v136_v6 = vpop.xlane.xlu1 %135  ;;  %v133_v15 = vpop.xlane.xlu0 %132  ;;  %v426_v16 = vsub.f32 %v2836_v20, %v3368_v63 }
  0xa5   :  { %v3373_v39 = vmul.f32 0.020408163, %v133_v15  ;;  %v593_v46 = vsel %vm94_vm0, %v501_v0, 0.0  ;;  %v3378_v38 = vmul.f32 0.020408163, %v136_v6  ;;  %v599_v0 = vsel %vm94_vm0, %v503_v50, 0.0 }
  0xa6   :  { %v505_v13 = vmul.f32 %v425_v17, %v425_v17 }
  0xa7   :  { %582 = vadd.xlane.f32.xlu0 %v581_v9  ;;  %585 = vadd.xlane.f32.xlu1 %v584_v42  ;;  %v596_v42 = vsel %vm94_vm0, %v502_v23, 0.0  ;;  %v427_v21 = vsub.f32 %v2855_v25, %v3373_v39  ;;  %v506_v23 = vmul.f32 %v426_v16, %v426_v16  ;;  %v428_v20 = vsub.f32 %v2850_v24, %v3378_v38 }
  0xa8   :  { %v142_v47 = vpop.xlane.xlu1 %141  ;;  %v139_v1 = vpop.xlane.xlu0 %138  ;;  %v605_v50 = vsel %vm94_vm0, %v505_v13, 0.0 }
  0xa9   :  { %v3383_v15 = vmul.f32 0.020408163, %v139_v1  ;;  %v3388_v6 = vmul.f32 0.020408163, %v142_v47  ;;  %v507_v17 = vmul.f32 %v427_v21, %v427_v21 }
  0xab   :  { %591 = vadd.xlane.f32.xlu1 %v590_v62  ;;  %588 = vadd.xlane.f32.xlu0 %v587_v7  ;;  %v602_v62 = vsel %vm94_vm0, %v504_v30, 0.0  ;;  %v429_v25 = vsub.f32 %v2869_v29, %v3383_v15  ;;  %v508_v30 = vmul.f32 %v428_v20, %v428_v20  ;;  %v430_v24 = vsub.f32 %v2864_v28, %v3388_v6 }
  0xac   :  { %v148_v2 = vpop.xlane.xlu1 %147  ;;  %v145_v9 = vpop.xlane.xlu0 %144  ;;  %v611_v13 = vsel %vm94_vm0, %v507_v17, 0.0 }
  0xad   :  { %v3393_v1 = vmul.f32 0.020408163, %v145_v9  ;;  %v3398_v47 = vmul.f32 0.020408163, %v148_v2  ;;  %v509_v21 = vmul.f32 %v429_v25, %v429_v25 }
  0xaf   :  { %597 = vadd.xlane.f32.xlu1 %v596_v42  ;;  %594 = vadd.xlane.f32.xlu0 %v593_v46  ;;  %5689 = vst [vmem:[#allocation41_spill] sm:$0xff] %v3393_v1  ;;  %v608_v42 = vsel %vm94_vm0, %v506_v23, 0.0  ;;  %v431_v29 = vsub.f32 %v2883_v33, %v3393_v1  ;;  %v510_v23 = vmul.f32 %v430_v24, %v430_v24  ;;  %v617_v25 = vsel %vm94_vm0, %v509_v21, 0.0 }
  0xb0   :  { %v154_v8 = vpop.xlane.xlu1 %153  ;;  %v151_v7 = vpop.xlane.xlu0 %150  ;;  %v432_v28 = vsub.f32 %v2878_v32, %v3398_v47 }
  0xb1   :  { %v3403_v9 = vmul.f32 0.020408163, %v151_v7  ;;  %v3408_v2 = vmul.f32 0.020408163, %v154_v8  ;;  %v511_v33 = vmul.f32 %v431_v29, %v431_v29 }
  0xb2   :  { %v512_v32 = vmul.f32 %v432_v28, %v432_v28 }
  0xb3   :  { %603 = vadd.xlane.f32.xlu1 %v602_v62  ;;  %600 = vadd.xlane.f32.xlu0 %v599_v0  ;;  %5690 = vst [vmem:[#allocation42_spill] sm:$0xff] %v3403_v9  ;;  %v614_v62 = vsel %vm94_vm0, %v508_v30, 0.0  ;;  %v433_v7 = vsub.f32 %v2897_v37, %v3403_v9  ;;  %v434_v8 = vsub.f32 %v2892_v36, %v3408_v2  ;;  %v620_v30 = vsel %vm94_vm0, %v510_v23, 0.0 }
  0xb4   :  { %v160_v12 = vpop.xlane.xlu1 %159  ;;  %v157_v46 = vpop.xlane.xlu0 %156  ;;  %v623_v21 = vsel %vm94_vm0, %v511_v33, 0.0 }
  0xb5   :  { %v3415_v20 = vmul.f32 0.020408163, %v157_v46  ;;  %v513_v29 = vmul.f32 %v433_v7, %v433_v7  ;;  %v514_v23 = vmul.f32 %v434_v8, %v434_v8 }
  0xb7   :  { %609 = vadd.xlane.f32.xlu1 %v608_v42  ;;  %606 = vadd.xlane.f32.xlu0 %v605_v50  ;;  %5691 = vst [vmem:[#allocation43_spill] sm:$0xff] %v3415_v20  ;;  %v3420_v42 = vmul.f32 0.020408163, %v160_v12  ;;  %v435_v37 = vsub.f32 %v2911_v41, %v3415_v20  ;;  %v629_v33 = vsel %vm94_vm0, %v513_v29, 0.0 }
  0xb8   :  { %v166_v16 = vpop.xlane.xlu1 %165  ;;  %v163_v0 = vpop.xlane.xlu0 %162 }
  0xb9   :  { %v3425_v46 = vmul.f32 0.020408163, %v163_v0  ;;  %v436_v36 = vsub.f32 %v2906_v40, %v3420_v42  ;;  %v3430_v12 = vmul.f32 0.020408163, %v166_v16  ;;  %v515_v7 = vmul.f32 %v435_v37, %v435_v37 }
  0xbb   :  { %615 = vadd.xlane.f32.xlu1 %v614_v62  ;;  %612 = vadd.xlane.f32.xlu0 %v611_v13  ;;  %5692 = vst [vmem:[#allocation44_spill] sm:$0xff] %v3425_v46  ;;  %v626_v62 = vsel %vm94_vm0, %v512_v32, 0.0  ;;  %v437_v41 = vsub.f32 %v2925_v45, %v3425_v46  ;;  %v438_v40 = vsub.f32 %v2920_v44, %v3430_v12  ;;  %v635_v29 = vsel %vm94_vm0, %v515_v7, 0.0 }
  0xbc   :  { %v172_v50 = vpop.xlane.xlu1 %171  ;;  %v169_v17 = vpop.xlane.xlu0 %168  ;;  %v516_v8 = vmul.f32 %v436_v36, %v436_v36 }
  0xbd   :  { %v3433_v28 = vmul.f32 0.020408163, %v169_v17  ;;  %v3440_v16 = vmul.f32 0.020408163, %v172_v50  ;;  %v517_v37 = vmul.f32 %v437_v41, %v437_v41  ;;  %v518_v36 = vmul.f32 %v438_v40, %v438_v40 }
  0xbf   :  { %621 = vadd.xlane.f32.xlu1 %v620_v30  ;;  %618 = vadd.xlane.f32.xlu0 %v617_v25  ;;  %5693 = vst [vmem:[#allocation45_spill] sm:$0xff] %v3433_v28  ;;  %5694 = vst [vmem:[#allocation46_spill] sm:$0xff] %v3440_v16  ;;  %v632_v30 = vsel %vm94_vm0, %v514_v23, 0.0  ;;  %v439_v17 = vsub.f32 %v2939_v49, %v3433_v28  ;;  %v440_v44 = vsub.f32 %v2934_v48, %v3440_v16 }
  0xc0   :  { %v178_v24 = vpop.xlane.xlu1 %177  ;;  %v175_v13 = vpop.xlane.xlu0 %174  ;;  %v641_v41 = vsel %vm94_vm0, %v517_v37, 0.0  ;;  %v644_v7 = vsel %vm94_vm0, %v518_v36, 0.0 }
  0xc1   :  { %v3445_v32 = vmul.f32 0.020408163, %v175_v13  ;;  %v3450_v50 = vmul.f32 0.020408163, %v178_v24  ;;  %v519_v49 = vmul.f32 %v439_v17, %v439_v17  ;;  %v520_v40 = vmul.f32 %v440_v44, %v440_v44 }
  0xc3   :  { %627 = vadd.xlane.f32.xlu1 %v626_v62  ;;  %624 = vadd.xlane.f32.xlu0 %v623_v21  ;;  %5695 = vst [vmem:[#allocation47_spill] sm:$0xff] %v3445_v32  ;;  %5696 = vst [vmem:[#allocation48_spill] sm:$0xff] %v3450_v50  ;;  %v638_v62 = vsel %vm94_vm0, %v516_v8, 0.0  ;;  %v441_v13 = vsub.f32 %v2953_v53, %v3445_v32  ;;  %v442_v48 = vsub.f32 %v2948_v52, %v3450_v50 }
  0xc4   :  { %v184_v0 = vpop.xlane.xlu1 %183  ;;  %v181_v25 = vpop.xlane.xlu0 %180  ;;  %v647_v8 = vsel %vm94_vm0, %v519_v49, 0.0  ;;  %v650_v44 = vsel %vm94_vm0, %v520_v40, 0.0 }
  0xc5   :  { %v3455_v23 = vmul.f32 0.020408163, %v181_v25  ;;  %v3460_v24 = vmul.f32 0.020408163, %v184_v0  ;;  %v521_v37 = vmul.f32 %v441_v13, %v441_v13  ;;  %v522_v36 = vmul.f32 %v442_v48, %v442_v48 }
  0xc7   :  { %633 = vadd.xlane.f32.xlu1 %v632_v30  ;;  %630 = vadd.xlane.f32.xlu0 %v629_v33  ;;  %5697 = vst [vmem:[#allocation49_spill] sm:$0xff] %v3455_v23  ;;  %5698 = vst [vmem:[#allocation50_spill] sm:$0xff] %v3460_v24  ;;  %v443_v53 = vsub.f32 %v2967_v57, %v3455_v23  ;;  %v444_v52 = vsub.f32 %v2962_v56, %v3460_v24  ;;  %v656_v40 = vsel %vm94_vm0, %v522_v36, 0.0 }
  0xc8   :  { %v190_v45 = vpop.xlane.xlu1 %189  ;;  %v187_v21 = vpop.xlane.xlu0 %186 }
  0xc9   :  { %v3466_v25 = vmul.f32 0.020408163, %v187_v21  ;;  %v3470_v0 = vmul.f32 0.020408163, %v190_v45  ;;  %v524_v48 = vmul.f32 %v444_v52, %v444_v52 }
  0xcb   :  { %639 = vadd.xlane.f32.xlu1 %v638_v62  ;;  %636 = vadd.xlane.f32.xlu0 %v635_v29  ;;  %5699 = vst [vmem:[#allocation51_spill] sm:$0xff] %v3466_v25  ;;  %v2742_v62 = vmov 0   ;;  %5700 = vst [vmem:[#allocation52_spill] sm:$0xff] %v3470_v0  ;;  %v445_v57 = vsub.f32 %v2981_v61, %v3466_v25  ;;  %v446_v56 = vsub.f32 %v2976_v60, %v3470_v0 }
  0xcc   :  { %v196_v33 = vpop.xlane.xlu1 %195  ;;  %v193_v30 = vpop.xlane.xlu0 %192  ;;  %2501 = vset.pattern.permute.xlu1 %v2742_v62  ;;  %2500 = vset.pattern.permute.xlu0 %v2742_v62 }
  0xcd   :  { %v3475_v21 = vmul.f32 0.020408163, %v193_v30  ;;  %v3480_v45 = vmul.f32 0.020408163, %v196_v33  ;;  %v526_v52 = vmul.f32 %v446_v56, %v446_v56 }
  0xcf   :  { %645 = vadd.xlane.f32.xlu1 %v644_v7  ;;  %642 = vadd.xlane.f32.xlu0 %v641_v41  ;;  %5701 = vst [vmem:[#allocation53_spill] sm:$0xff] %v3475_v21  ;;  %v653_v41 = vsel %vm94_vm0, %v521_v37, 0.0  ;;  %v523_v7 = vmul.f32 %v443_v53, %v443_v53  ;;  %5702 = vst [vmem:[#allocation54_spill] sm:$0xff] %v3480_v45  ;;  %v447_v61 = vsub.f32 %v2995_v4, %v3475_v21 }
  0xd0   :  { %v202_v17 = vpop.xlane.xlu1 %201  ;;  %v199_v29 = vpop.xlane.xlu0 %198  ;;  %v525_v53 = vmul.f32 %v445_v57, %v445_v57  ;;  %v448_v60 = vsub.f32 %v2990_v3, %v3480_v45 }
  0xd1   :  { %v3485_v30 = vmul.f32 0.020408163, %v199_v29  ;;  %v659_v37 = vsel %vm94_vm0, %v523_v7, 0.0  ;;  %v3490_v33 = vmul.f32 0.020408163, %v202_v17  ;;  %v527_v57 = vmul.f32 %v447_v61, %v447_v61 }
  0xd2   :  { %v665_v7 = vsel %vm94_vm0, %v525_v53, 0.0  ;;  %v528_v56 = vmul.f32 %v448_v60, %v448_v60 }
  0xd3   :  { %651 = vadd.xlane.f32.xlu1 %v650_v44  ;;  %648 = vadd.xlane.f32.xlu0 %v647_v8  ;;  %5703 = vst [vmem:[#allocation55_spill] sm:$0xff] %v3485_v30  ;;  %5704 = vst [vmem:[#allocation56_spill] sm:$0xff] %v3490_v33  ;;  %v662_v44 = vsel %vm94_vm0, %v524_v48, 0.0  ;;  %v449_v4 = vsub.f32 %v3009_v11, %v3485_v30  ;;  %v450_v3 = vsub.f32 %v3004_v10, %v3490_v33 }
  0xd4   :  { %v208_v49 = vpop.xlane.xlu1 %207  ;;  %v205_v13 = vpop.xlane.xlu0 %204  ;;  %v671_v53 = vsel %vm94_vm0, %v527_v57, 0.0 }
  0xd5   :  { %v3495_v29 = vmul.f32 0.020408163, %v205_v13  ;;  %v3500_v17 = vmul.f32 0.020408163, %v208_v49  ;;  %v529_v61 = vmul.f32 %v449_v4, %v449_v4  ;;  %v530_v60 = vmul.f32 %v450_v3, %v450_v3 }
  0xd7   :  { %657 = vadd.xlane.f32.xlu1 %v656_v40  ;;  %654 = vadd.xlane.f32.xlu0 %v653_v41  ;;  %5705 = vst [vmem:[#allocation57_spill] sm:$0xff] %v3495_v29  ;;  %5706 = vst [vmem:[#allocation58_spill] sm:$0xff] %v3500_v17  ;;  %v668_v40 = vsel %vm94_vm0, %v526_v52, 0.0  ;;  %v451_v11 = vsub.f32 %v3023_v19, %v3495_v29  ;;  %v452_v10 = vsub.f32 %v3018_v18, %v3500_v17  ;;  %v5726_v29 = vld [vmem:[#allocation7_spill] sm:$0xff] }
  0xd8   :  { %v214_v8 = vpop.xlane.xlu1 %213  ;;  %v211_v62 = vpop.xlane.xlu0 %210  ;;  %v677_v57 = vsel %vm94_vm0, %v529_v61, 0.0 }
  0xd9   :  { %v3505_v13 = vmul.f32 0.020408163, %v211_v62  ;;  %v3510_v49 = vmul.f32 0.020408163, %v214_v8  ;;  %v531_v4 = vmul.f32 %v451_v11, %v451_v11  ;;  %v532_v3 = vmul.f32 %v452_v10, %v452_v10 }
  0xdb   :  { %663 = vadd.xlane.f32.xlu1 %v662_v44  ;;  %660 = vadd.xlane.f32.xlu0 %v659_v37  ;;  %5707 = vst [vmem:[#allocation59_spill] sm:$0xff] %v3505_v13  ;;  %5708 = vst [vmem:[#allocation60_spill] sm:$0xff] %v3510_v49  ;;  %v674_v44 = vsel %vm94_vm0, %v528_v56, 0.0  ;;  %v453_v19 = vsub.f32 %v3037_v27, %v3505_v13  ;;  %v454_v18 = vsub.f32 %v3032_v26, %v3510_v49  ;;  %v5722_v13 = vld [vmem:[#allocation5_spill] sm:$0xff] }
  0xdc   :  { %v220_v36 = vpop.xlane.xlu1 %219  ;;  %v217_v41 = vpop.xlane.xlu0 %216  ;;  %v683_v61 = vsel %vm94_vm0, %v531_v4, 0.0 }
  0xdd   :  { %v3515_v62 = vmul.f32 0.020408163, %v217_v41  ;;  %v3520_v8 = vmul.f32 0.020408163, %v220_v36  ;;  %v533_v11 = vmul.f32 %v453_v19, %v453_v19  ;;  %v534_v10 = vmul.f32 %v454_v18, %v454_v18 }
  0xdf   :  { %669 = vadd.xlane.f32.xlu1 %v668_v40  ;;  %666 = vadd.xlane.f32.xlu0 %v665_v7  ;;  %5709 = vst [vmem:[#allocation61_spill] sm:$0xff] %v3515_v62  ;;  %5710 = vst [vmem:[#allocation62_spill] sm:$0xff] %v3520_v8  ;;  %v680_v40 = vsel %vm94_vm0, %v530_v60, 0.0  ;;  %v455_v27 = vsub.f32 %v3051_v35, %v3515_v62  ;;  %v456_v26 = vsub.f32 %v3046_v34, %v3520_v8  ;;  %v5718_v62 = vld [vmem:[#allocation3_spill] sm:$0xff] }
  0xe0   :  { %v226_v48 = vpop.xlane.xlu1 %225  ;;  %v223_v37 = vpop.xlane.xlu0 %222  ;;  %v689_v4 = vsel %vm94_vm0, %v533_v11, 0.0 }
  0xe1   :  { %v3525_v41 = vmul.f32 0.020408163, %v223_v37  ;;  %v3530_v36 = vmul.f32 0.020408163, %v226_v48  ;;  %v535_v19 = vmul.f32 %v455_v27, %v455_v27  ;;  %v536_v18 = vmul.f32 %v456_v26, %v456_v26 }
  0xe3   :  { %675 = vadd.xlane.f32.xlu1 %v674_v44  ;;  %672 = vadd.xlane.f32.xlu0 %v671_v53  ;;  %5711 = vst [vmem:[#allocation63_spill] sm:$0xff] %v3525_v41  ;;  %5712 = vst [vmem:[#allocation64_spill] sm:$0xff] %v3530_v36  ;;  %v686_v44 = vsel %vm94_vm0, %v532_v3, 0.0  ;;  %v457_v35 = vsub.f32 %v3065_v43, %v3525_v41  ;;  %v692_v3 = vsel %vm94_vm0, %v534_v10, 0.0  ;;  %v695_v11 = vsel %vm94_vm0, %v535_v19, 0.0 }
  0xe4   :  { %v232_v52 = vpop.xlane.xlu1 %231  ;;  %v229_v7 = vpop.xlane.xlu0 %228  ;;  %v698_v10 = vsel %vm94_vm0, %v536_v18, 0.0 }
  0xe5   :  { %v3535_v37 = vmul.f32 0.020408163, %v229_v7  ;;  %v3540_v48 = vmul.f32 0.020408163, %v232_v52  ;;  %v537_v27 = vmul.f32 %v457_v35, %v457_v35 }
  0xe7   :  { %681 = vadd.xlane.f32.xlu1 %v680_v40  ;;  %678 = vadd.xlane.f32.xlu0 %v677_v57  ;;  %5713 = vst [vmem:[#allocation65_spill] sm:$0xff] %v3535_v37  ;;  %v5714_v40 = vld [vmem:[#allocation2_spill] sm:$0xff]  ;;  %v701_v19 = vsel %vm94_vm0, %v537_v27, 0.0 }
  0xe8   :  { %v238_v56 = vpop.xlane.xlu1 %237  ;;  %v235_v53 = vpop.xlane.xlu0 %234  ;;  %v458_v34 = vsub.f32 %v5714_v40, %v3530_v36  ;;  %5715 = vst [vmem:[#allocation2_spill] sm:$0xff] %v3540_v48  ;;  %v460_v40 = vsub.f32 %v5718_v62, %v3540_v48 }
  0xe9   :  { %v3545_v7 = vmul.f32 0.020408163, %v235_v53  ;;  %v3550_v52 = vmul.f32 0.020408163, %v238_v56 }
  0xea   :  { %v538_v26 = vmul.f32 %v458_v34, %v458_v34  ;;  %v540_v34 = vmul.f32 %v460_v40, %v460_v40 }
  0xeb   :  { %687 = vadd.xlane.f32.xlu1 %v686_v44  ;;  %684 = vadd.xlane.f32.xlu0 %v683_v61  ;;  %v5716_v61 = vld [vmem:[#allocation4_spill] sm:$0xff]  ;;  %5719 = vst [vmem:[#allocation3_spill] sm:$0xff] %v3550_v52  ;;  %v462_v62 = vsub.f32 %v5722_v13, %v3550_v52  ;;  %v5730_v52 = vld [vmem:[#allocation9_spill] sm:$0xff] }
  0xec   :  { %v244_v60 = vpop.xlane.xlu1 %243  ;;  %v241_v57 = vpop.xlane.xlu0 %240  ;;  %v459_v43 = vsub.f32 %v5716_v61, %v3535_v37  ;;  %5717 = vst [vmem:[#allocation4_spill] sm:$0xff] %v3545_v7  ;;  %v704_v18 = vsel %vm94_vm0, %v538_v26, 0.0  ;;  %v710_v26 = vsel %vm94_vm0, %v540_v34, 0.0 }
  0xed   :  { %v3555_v53 = vmul.f32 0.020408163, %v241_v57  ;;  %v3560_v56 = vmul.f32 0.020408163, %v244_v60  ;;  %v542_v40 = vmul.f32 %v462_v62, %v462_v62 }
  0xee   :  { %v539_v35 = vmul.f32 %v459_v43, %v459_v43 }
  0xef   :  { %693 = vadd.xlane.f32.xlu1 %v692_v3  ;;  %690 = vadd.xlane.f32.xlu0 %v689_v4  ;;  %v5720_v4 = vld [vmem:[#allocation6_spill] sm:$0xff]  ;;  %5723 = vst [vmem:[#allocation5_spill] sm:$0xff] %v3560_v56  ;;  %v464_v13 = vsub.f32 %v5726_v29, %v3560_v56  ;;  %v716_v34 = vsel %vm94_vm0, %v542_v40, 0.0  ;;  %v5734_v56 = vld [vmem:[#allocation11_spill] sm:$0xff] }
  0xf0   :  { %v250_v44 = vpop.xlane.xlu1 %249  ;;  %v247_v41 = vpop.xlane.xlu0 %246  ;;  %v461_v3 = vsub.f32 %v5720_v4, %v3545_v7  ;;  %5721 = vst [vmem:[#allocation6_spill] sm:$0xff] %v3555_v53  ;;  %v707_v27 = vsel %vm94_vm0, %v539_v35, 0.0 }
  0xf1   :  { %v3565_v57 = vmul.f32 0.020408163, %v247_v41  ;;  %v3570_v60 = vmul.f32 0.020408163, %v250_v44  ;;  %v544_v62 = vmul.f32 %v464_v13, %v464_v13 }
  0xf2   :  { %v541_v43 = vmul.f32 %v461_v3, %v461_v3 }
  0xf3   :  { %699 = vadd.xlane.f32.xlu1 %v698_v10  ;;  %696 = vadd.xlane.f32.xlu0 %v695_v11  ;;  %v5724_v11 = vld [vmem:[#allocation8_spill] sm:$0xff]  ;;  %5727 = vst [vmem:[#allocation7_spill] sm:$0xff] %v3570_v60  ;;  %v466_v29 = vsub.f32 %v5730_v52, %v3570_v60  ;;  %v722_v40 = vsel %vm94_vm0, %v544_v62, 0.0  ;;  %v5738_v60 = vld [vmem:[#allocation13_spill] sm:$0xff] }
  0xf4   :  { %v256_v61 = vpop.xlane.xlu1 %255  ;;  %v253_v37 = vpop.xlane.xlu0 %252  ;;  %v463_v10 = vsub.f32 %v5724_v11, %v3555_v53  ;;  %5725 = vst [vmem:[#allocation8_spill] sm:$0xff] %v3565_v57  ;;  %v713_v35 = vsel %vm94_vm0, %v541_v43, 0.0 }
  0xf5   :  { %v3575_v41 = vmul.f32 0.020408163, %v253_v37  ;;  %v3580_v44 = vmul.f32 0.020408163, %v256_v61  ;;  %v546_v13 = vmul.f32 %v466_v29, %v466_v29 }
  0xf6   :  { %v543_v3 = vmul.f32 %v463_v10, %v463_v10 }
  0xf7   :  { %705 = vadd.xlane.f32.xlu1 %v704_v18  ;;  %702 = vadd.xlane.f32.xlu0 %v701_v19  ;;  %v5728_v19 = vld [vmem:[#allocation10_spill] sm:$0xff]  ;;  %5731 = vst [vmem:[#allocation9_spill] sm:$0xff] %v3580_v44  ;;  %v468_v52 = vsub.f32 %v5734_v56, %v3580_v44  ;;  %v728_v62 = vsel %vm94_vm0, %v546_v13, 0.0  ;;  %v5742_v44 = vld [vmem:[#allocation15_spill] sm:$0xff] }
  0xf8   :  { %v262_v4 = vpop.xlane.xlu1 %261  ;;  %v259_v7 = vpop.xlane.xlu0 %258  ;;  %v465_v18 = vsub.f32 %v5728_v19, %v3565_v57  ;;  %5729 = vst [vmem:[#allocation10_spill] sm:$0xff] %v3575_v41  ;;  %v719_v43 = vsel %vm94_vm0, %v543_v3, 0.0 }
  0xf9   :  { %v3585_v37 = vmul.f32 0.020408163, %v259_v7  ;;  %v3590_v61 = vmul.f32 0.020408163, %v262_v4  ;;  %v548_v29 = vmul.f32 %v468_v52, %v468_v52 }
  0xfa   :  { %v545_v10 = vmul.f32 %v465_v18, %v465_v18 }
  0xfb   :  { %711 = vadd.xlane.f32.xlu1 %v710_v26  ;;  %708 = vadd.xlane.f32.xlu0 %v707_v27  ;;  %v5732_v27 = vld [vmem:[#allocation12_spill] sm:$0xff]  ;;  %5735 = vst [vmem:[#allocation11_spill] sm:$0xff] %v3590_v61  ;;  %v470_v56 = vsub.f32 %v5738_v60, %v3590_v61  ;;  %v734_v13 = vsel %vm94_vm0, %v548_v29, 0.0  ;;  %v5746_v61 = vld [vmem:[#allocation17_spill] sm:$0xff] }
  0xfc   :  { %v268_v11 = vpop.xlane.xlu1 %267  ;;  %v265_v53 = vpop.xlane.xlu0 %264  ;;  %v467_v26 = vsub.f32 %v5732_v27, %v3575_v41  ;;  %5733 = vst [vmem:[#allocation12_spill] sm:$0xff] %v3585_v37  ;;  %v725_v3 = vsel %vm94_vm0, %v545_v10, 0.0 }
  0xfd   :  { %v3595_v7 = vmul.f32 0.020408163, %v265_v53  ;;  %v3600_v4 = vmul.f32 0.020408163, %v268_v11  ;;  %v550_v52 = vmul.f32 %v470_v56, %v470_v56 }
  0xfe   :  { %v547_v18 = vmul.f32 %v467_v26, %v467_v26 }
  0xff   :  { %717 = vadd.xlane.f32.xlu1 %v716_v34  ;;  %714 = vadd.xlane.f32.xlu0 %v713_v35  ;;  %v5736_v35 = vld [vmem:[#allocation14_spill] sm:$0xff]  ;;  %5739 = vst [vmem:[#allocation13_spill] sm:$0xff] %v3600_v4  ;;  %v472_v60 = vsub.f32 %v5742_v44, %v3600_v4  ;;  %v740_v29 = vsel %vm94_vm0, %v550_v52, 0.0  ;;  %v5750_v4 = vld [vmem:[#allocation19_spill] sm:$0xff] }
 0x100   :  { %v274_v19 = vpop.xlane.xlu1 %273  ;;  %v271_v57 = vpop.xlane.xlu0 %270  ;;  %v469_v34 = vsub.f32 %v5736_v35, %v3585_v37  ;;  %5737 = vst [vmem:[#allocation14_spill] sm:$0xff] %v3595_v7  ;;  %v731_v10 = vsel %vm94_vm0, %v547_v18, 0.0 }
 0x101   :  { %v3605_v53 = vmul.f32 0.020408163, %v271_v57  ;;  %v3610_v11 = vmul.f32 0.020408163, %v274_v19  ;;  %v552_v56 = vmul.f32 %v472_v60, %v472_v60 }
 0x102   :  { %v549_v26 = vmul.f32 %v469_v34, %v469_v34 }
 0x103   :  { %723 = vadd.xlane.f32.xlu1 %v722_v40  ;;  %720 = vadd.xlane.f32.xlu0 %v719_v43  ;;  %v5740_v43 = vld [vmem:[#allocation16_spill] sm:$0xff]  ;;  %5743 = vst [vmem:[#allocation15_spill] sm:$0xff] %v3610_v11  ;;  %v474_v44 = vsub.f32 %v5746_v61, %v3610_v11  ;;  %v746_v52 = vsel %vm94_vm0, %v552_v56, 0.0  ;;  %v5754_v11 = vld [vmem:[#allocation21_spill] sm:$0xff] }
 0x104   :  { %v280_v27 = vpop.xlane.xlu1 %279  ;;  %v277_v41 = vpop.xlane.xlu0 %276  ;;  %v471_v40 = vsub.f32 %v5740_v43, %v3595_v7  ;;  %5741 = vst [vmem:[#allocation16_spill] sm:$0xff] %v3605_v53  ;;  %v737_v18 = vsel %vm94_vm0, %v549_v26, 0.0 }
 0x105   :  { %v3615_v57 = vmul.f32 0.020408163, %v277_v41  ;;  %v3620_v19 = vmul.f32 0.020408163, %v280_v27  ;;  %v554_v60 = vmul.f32 %v474_v44, %v474_v44 }
 0x106   :  { %v551_v34 = vmul.f32 %v471_v40, %v471_v40 }
 0x107   :  { %729 = vadd.xlane.f32.xlu1 %v728_v62  ;;  %726 = vadd.xlane.f32.xlu0 %v725_v3  ;;  %v5744_v3 = vld [vmem:[#allocation18_spill] sm:$0xff]  ;;  %5747 = vst [vmem:[#allocation17_spill] sm:$0xff] %v3620_v19  ;;  %v476_v61 = vsub.f32 %v5750_v4, %v3620_v19  ;;  %v752_v56 = vsel %vm94_vm0, %v554_v60, 0.0  ;;  %v5758_v19 = vld [vmem:[#allocation23_spill] sm:$0xff] }
 0x108   :  { %v286_v35 = vpop.xlane.xlu1 %285  ;;  %v283_v37 = vpop.xlane.xlu0 %282  ;;  %v473_v62 = vsub.f32 %v5744_v3, %v3605_v53  ;;  %5745 = vst [vmem:[#allocation18_spill] sm:$0xff] %v3615_v57  ;;  %v743_v26 = vsel %vm94_vm0, %v551_v34, 0.0 }
 0x109   :  { %v3625_v41 = vmul.f32 0.020408163, %v283_v37  ;;  %v3630_v27 = vmul.f32 0.020408163, %v286_v35  ;;  %v556_v44 = vmul.f32 %v476_v61, %v476_v61 }
 0x10a   :  { %v553_v40 = vmul.f32 %v473_v62, %v473_v62 }
 0x10b   :  { %735 = vadd.xlane.f32.xlu1 %v734_v13  ;;  %732 = vadd.xlane.f32.xlu0 %v731_v10  ;;  %v5748_v10 = vld [vmem:[#allocation20_spill] sm:$0xff]  ;;  %5751 = vst [vmem:[#allocation19_spill] sm:$0xff] %v3630_v27  ;;  %v478_v4 = vsub.f32 %v5754_v11, %v3630_v27  ;;  %v758_v60 = vsel %vm94_vm0, %v556_v44, 0.0  ;;  %v5762_v27 = vld [vmem:[#allocation25_spill] sm:$0xff] }
 0x10c   :  { %v292_v43 = vpop.xlane.xlu1 %291  ;;  %v289_v7 = vpop.xlane.xlu0 %288  ;;  %v475_v13 = vsub.f32 %v5748_v10, %v3615_v57  ;;  %5749 = vst [vmem:[#allocation20_spill] sm:$0xff] %v3625_v41  ;;  %v749_v34 = vsel %vm94_vm0, %v553_v40, 0.0 }
 0x10d   :  { %v3635_v37 = vmul.f32 0.020408163, %v289_v7  ;;  %v3640_v35 = vmul.f32 0.020408163, %v292_v43  ;;  %v558_v61 = vmul.f32 %v478_v4, %v478_v4 }
 0x10e   :  { %v555_v62 = vmul.f32 %v475_v13, %v475_v13 }
 0x10f   :  { %741 = vadd.xlane.f32.xlu1 %v740_v29  ;;  %738 = vadd.xlane.f32.xlu0 %v737_v18  ;;  %v5752_v18 = vld [vmem:[#allocation22_spill] sm:$0xff]  ;;  %5755 = vst [vmem:[#allocation21_spill] sm:$0xff] %v3640_v35  ;;  %v480_v11 = vsub.f32 %v5758_v19, %v3640_v35  ;;  %v764_v44 = vsel %vm94_vm0, %v558_v61, 0.0  ;;  %v5766_v35 = vld [vmem:[#allocation27_spill] sm:$0xff] }
 0x110   :  { %v298_v3 = vpop.xlane.xlu1 %297  ;;  %v295_v53 = vpop.xlane.xlu0 %294  ;;  %v477_v29 = vsub.f32 %v5752_v18, %v3625_v41  ;;  %5753 = vst [vmem:[#allocation22_spill] sm:$0xff] %v3635_v37  ;;  %v755_v40 = vsel %vm94_vm0, %v555_v62, 0.0 }
 0x111   :  { %v3645_v7 = vmul.f32 0.020408163, %v295_v53  ;;  %v3650_v43 = vmul.f32 0.020408163, %v298_v3  ;;  %v560_v4 = vmul.f32 %v480_v11, %v480_v11 }
 0x112   :  { %v557_v13 = vmul.f32 %v477_v29, %v477_v29 }
 0x113   :  { %747 = vadd.xlane.f32.xlu1 %v746_v52  ;;  %744 = vadd.xlane.f32.xlu0 %v743_v26  ;;  %v5756_v26 = vld [vmem:[#allocation24_spill] sm:$0xff]  ;;  %5759 = vst [vmem:[#allocation23_spill] sm:$0xff] %v3650_v43  ;;  %v482_v19 = vsub.f32 %v5762_v27, %v3650_v43  ;;  %v770_v61 = vsel %vm94_vm0, %v560_v4, 0.0  ;;  %v5770_v43 = vld [vmem:[#allocation29_spill] sm:$0xff] }
 0x114   :  { %v304_v10 = vpop.xlane.xlu1 %303  ;;  %v301_v57 = vpop.xlane.xlu0 %300  ;;  %v479_v52 = vsub.f32 %v5756_v26, %v3635_v37  ;;  %5757 = vst [vmem:[#allocation24_spill] sm:$0xff] %v3645_v7  ;;  %v761_v62 = vsel %vm94_vm0, %v557_v13, 0.0 }
 0x115   :  { %v3655_v53 = vmul.f32 0.020408163, %v301_v57  ;;  %v3660_v3 = vmul.f32 0.020408163, %v304_v10  ;;  %v562_v11 = vmul.f32 %v482_v19, %v482_v19 }
 0x116   :  { %v559_v29 = vmul.f32 %v479_v52, %v479_v52 }
 0x117   :  { %753 = vadd.xlane.f32.xlu1 %v752_v56  ;;  %750 = vadd.xlane.f32.xlu0 %v749_v34  ;;  %v5760_v34 = vld [vmem:[#allocation26_spill] sm:$0xff]  ;;  %5763 = vst [vmem:[#allocation25_spill] sm:$0xff] %v3660_v3  ;;  %v484_v27 = vsub.f32 %v5766_v35, %v3660_v3  ;;  %v776_v4 = vsel %vm94_vm0, %v562_v11, 0.0  ;;  %v5774_v3 = vld [vmem:[#allocation31_spill] sm:$0xff] }
 0x118   :  { %v310_v18 = vpop.xlane.xlu1 %309  ;;  %v307_v41 = vpop.xlane.xlu0 %306  ;;  %v481_v56 = vsub.f32 %v5760_v34, %v3645_v7  ;;  %5761 = vst [vmem:[#allocation26_spill] sm:$0xff] %v3655_v53  ;;  %v767_v13 = vsel %vm94_vm0, %v559_v29, 0.0 }
 0x119   :  { %v3665_v57 = vmul.f32 0.020408163, %v307_v41  ;;  %v3670_v10 = vmul.f32 0.020408163, %v310_v18  ;;  %v564_v19 = vmul.f32 %v484_v27, %v484_v27 }
 0x11a   :  { %v561_v52 = vmul.f32 %v481_v56, %v481_v56 }
 0x11b   :  { %759 = vadd.xlane.f32.xlu1 %v758_v60  ;;  %756 = vadd.xlane.f32.xlu0 %v755_v40  ;;  %v5764_v40 = vld [vmem:[#allocation28_spill] sm:$0xff]  ;;  %5767 = vst [vmem:[#allocation27_spill] sm:$0xff] %v3670_v10  ;;  %v486_v35 = vsub.f32 %v5770_v43, %v3670_v10  ;;  %v782_v11 = vsel %vm94_vm0, %v564_v19, 0.0  ;;  %v5778_v10 = vld [vmem:[#allocation33_spill] sm:$0xff] }
 0x11c   :  { %v316_v26 = vpop.xlane.xlu1 %315  ;;  %v313_v37 = vpop.xlane.xlu0 %312  ;;  %v483_v60 = vsub.f32 %v5764_v40, %v3655_v53  ;;  %5765 = vst [vmem:[#allocation28_spill] sm:$0xff] %v3665_v57  ;;  %v773_v29 = vsel %vm94_vm0, %v561_v52, 0.0 }
 0x11d   :  { %v3675_v41 = vmul.f32 0.020408163, %v313_v37  ;;  %v3680_v18 = vmul.f32 0.020408163, %v316_v26  ;;  %v566_v27 = vmul.f32 %v486_v35, %v486_v35 }
 0x11e   :  { %v563_v56 = vmul.f32 %v483_v60, %v483_v60 }
 0x11f   :  { %765 = vadd.xlane.f32.xlu1 %v764_v44  ;;  %762 = vadd.xlane.f32.xlu0 %v761_v62  ;;  %v5768_v62 = vld [vmem:[#allocation30_spill] sm:$0xff]  ;;  %5771 = vst [vmem:[#allocation29_spill] sm:$0xff] %v3680_v18  ;;  %v488_v43 = vsub.f32 %v5774_v3, %v3680_v18  ;;  %v788_v19 = vsel %vm94_vm0, %v566_v27, 0.0  ;;  %v5782_v18 = vld [vmem:[#allocation36_spill] sm:$0xff] }
 0x120   :  { %v322_v34 = vpop.xlane.xlu1 %321  ;;  %v319_v7 = vpop.xlane.xlu0 %318  ;;  %v485_v44 = vsub.f32 %v5768_v62, %v3665_v57  ;;  %5769 = vst [vmem:[#allocation30_spill] sm:$0xff] %v3675_v41  ;;  %v779_v52 = vsel %vm94_vm0, %v563_v56, 0.0 }
 0x121   :  { %v3685_v37 = vmul.f32 0.020408163, %v319_v7  ;;  %v3690_v26 = vmul.f32 0.020408163, %v322_v34  ;;  %v568_v35 = vmul.f32 %v488_v43, %v488_v43 }
 0x122   :  { %v565_v60 = vmul.f32 %v485_v44, %v485_v44 }
 0x123   :  { %771 = vadd.xlane.f32.xlu1 %v770_v61  ;;  %768 = vadd.xlane.f32.xlu0 %v767_v13  ;;  %v5772_v13 = vld [vmem:[#allocation32_spill] sm:$0xff]  ;;  %5775 = vst [vmem:[#allocation31_spill] sm:$0xff] %v3690_v26  ;;  %v490_v3 = vsub.f32 %v5778_v10, %v3690_v26  ;;  %v794_v27 = vsel %vm94_vm0, %v568_v35, 0.0 }
 0x124   :  { %v328_v40 = vpop.xlane.xlu1 %327  ;;  %v325_v53 = vpop.xlane.xlu0 %324  ;;  %v487_v61 = vsub.f32 %v5772_v13, %v3675_v41  ;;  %5773 = vst [vmem:[#allocation32_spill] sm:$0xff] %v3685_v37  ;;  %v785_v56 = vsel %vm94_vm0, %v565_v60, 0.0 }
 0x125   :  { %v3695_v7 = vmul.f32 0.020408163, %v325_v53  ;;  %v3700_v34 = vmul.f32 0.020408163, %v328_v40  ;;  %v570_v43 = vmul.f32 %v490_v3, %v490_v3 }
 0x126   :  { %v567_v44 = vmul.f32 %v487_v61, %v487_v61 }
 0x127   :  { %777 = vadd.xlane.f32.xlu1 %v776_v4  ;;  %774 = vadd.xlane.f32.xlu0 %v773_v29  ;;  %v5776_v29 = vld [vmem:[#allocation34_spill] sm:$0xff]  ;;  %5779 = vst [vmem:[#allocation33_spill] sm:$0xff] %v3700_v34  ;;  %v492_v10 = vsub.f32 %v5782_v18, %v3700_v34  ;;  %v800_v18 = vsel %vm94_vm0, %v570_v43, 0.0 }
 0x128   :  { %v334_v62 = vpop.xlane.xlu1 %333  ;;  %v331_v57 = vpop.xlane.xlu0 %330  ;;  %v489_v4 = vsub.f32 %v5776_v29, %v3685_v37  ;;  %5777 = vst [vmem:[#allocation34_spill] sm:$0xff] %v3695_v7  ;;  %v791_v60 = vsel %vm94_vm0, %v567_v44, 0.0 }
 0x129   :  { %v3705_v53 = vmul.f32 0.020408163, %v331_v57  ;;  %v3710_v40 = vmul.f32 0.020408163, %v334_v62  ;;  %v572_v62 = vmul.f32 %v492_v10, %v492_v10 }
 0x12a   :  { %v569_v61 = vmul.f32 %v489_v4, %v489_v4  ;;  %v5785_v4 = vld [vmem:[#allocation39_spill] sm:$0xff] }
 0x12b   :  { %783 = vadd.xlane.f32.xlu1 %v782_v11  ;;  %780 = vadd.xlane.f32.xlu0 %v779_v52  ;;  %v5780_v52 = vld [vmem:[#allocation37_spill] sm:$0xff]  ;;  %5783 = vst [vmem:[#allocation36_spill] sm:$0xff] %v3710_v40  ;;  %v494_v44 = vsub.f32 %v5785_v4, %v3710_v40  ;;  %v806_v34 = vsel %vm94_vm0, %v572_v62, 0.0 }
 0x12c   :  { %v580_v13 = vpop.xlane.xlu1 %579  ;;  %v577_v41 = vpop.xlane.xlu0 %576  ;;  %v491_v11 = vsub.f32 %v5780_v52, %v3695_v7  ;;  %5781 = vst [vmem:[#allocation37_spill] sm:$0xff] %v3705_v53  ;;  %v797_v7 = vsel %vm94_vm0, %v569_v61, 0.0 }
 0x12d   :  { %v816_v48 = vmul.f32 0.020408163, %v580_v13  ;;  %v574_v61 = vmul.f32 %v494_v44, %v494_v44 }
 0x12e   :  { %v571_v26 = vmul.f32 %v491_v11, %v491_v11  ;;  %v815_v11 = vmul.f32 0.020408163, %v577_v41 }
 0x12f   :  { %789 = vadd.xlane.f32.xlu1 %v788_v19  ;;  %786 = vadd.xlane.f32.xlu0 %v785_v56  ;;  %v5784_v56 = vld [vmem:[#allocation40_spill] sm:$0xff] }
 0x130   :  { %v586_v29 = vpop.xlane.xlu1 %585  ;;  %v583_v37 = vpop.xlane.xlu0 %582  ;;  %v493_v19 = vsub.f32 %v5784_v56, %v3705_v53  ;;  %v896_v56 = vadd.f32 1e-05, %v816_v48  ;;  %v895_v40 = vadd.f32 1e-05, %v815_v11 }
 0x131   :  { %v817_v53 = vmul.f32 0.020408163, %v583_v37  ;;  %v818_v10 = vmul.f32 0.020408163, %v586_v29 }
 0x132   :  { %2502 = vrsqrt.f32 %v896_v56 }
 0x133   :  { %795 = vadd.xlane.f32.xlu1 %v794_v27  ;;  %792 = vadd.xlane.f32.xlu0 %v791_v60  ;;  %v803_v60 = vsel %vm94_vm0, %v571_v26, 0.0  ;;  %v573_v27 = vmul.f32 %v493_v19, %v493_v19  ;;  %v898_v19 = vadd.f32 1e-05, %v818_v10 }
 0x134   :  { %v592_v57 = vpop.xlane.xlu1 %591  ;;  %v589_v52 = vpop.xlane.xlu0 %588 }
 0x135   :  { %v809_v43 = vsel %vm94_vm0, %v573_v27, 0.0  ;;  %v819_v41 = vmul.f32 0.020408163, %v589_v52  ;;  %v820_v29 = vmul.f32 0.020408163, %v592_v57 }
 0x137   :  { %801 = vadd.xlane.f32.xlu1 %v800_v18  ;;  %798 = vadd.xlane.f32.xlu0 %v797_v7  ;;  %v897_v7 = vadd.f32 1e-05, %v817_v53  ;;  %v812_v18 = vsel %vm94_vm0, %v574_v61, 0.0  ;;  %v899_v53 = vadd.f32 1e-05, %v819_v41 }
 0x138   :  { %v598_v3 = vpop.xlane.xlu1 %597  ;;  %v595_v35 = vpop.xlane.xlu0 %594 }
 0x139   :  { %2504 = vrsqrt.f32 %v897_v7  ;;  %v1056_v7 = vld [vmem:[%s5503_s1 + $0x8] sm:$0xff] }
 0x13a   :  { %2506 = vrsqrt.f32 %v895_v40 }
 0x13b   :  { %807 = vadd.xlane.f32.xlu1 %v806_v34  ;;  %804 = vadd.xlane.f32.xlu0 %v803_v60  ;;  %2508 = vrsqrt.f32 %v898_v19 }
 0x13c   :  { %v604_v4 = vpop.xlane.xlu1 %603  ;;  %v601_v13 = vpop.xlane.xlu0 %600 }
 0x13d   :  { %v824_v26 = vmul.f32 0.020408163, %v604_v4  ;;  %v900_v4 = vadd.f32 1e-05, %v820_v29 }
 0x13f   :  { %813 = vadd.xlane.f32.xlu1 %v812_v18  ;;  %810 = vadd.xlane.f32.xlu0 %v809_v43  ;;  %v904_v34 = vadd.f32 1e-05, %v824_v26  ;;  %v821_v43 = vmul.f32 0.020408163, %v595_v35  ;;  %v2503_v10 = vpop.eup %2502  ;;  %v822_v26 = vmul.f32 0.020408163, %v598_v3 }
 0x140   :  { %v610_v48 = vpop.xlane.xlu1 %609  ;;  %v607_v37 = vpop.xlane.xlu0 %606  ;;  %v3732_v19 = vmul.f32 %v2503_v10, %v1056_v7  ;;  %v1055_v3 = vld [vmem:[%s5503_s1] sm:$0xff] }
 0x141   :  { %v826_v44 = vmul.f32 0.020408163, %v610_v48  ;;  %2510 = vrsqrt.f32 %v904_v34  ;;  %v901_v48 = vadd.f32 1e-05, %v821_v43 }
 0x142   :  { %2512 = vrsqrt.f32 %v899_v53 }
 0x143   :  { %v906_v27 = vadd.f32 1e-05, %v826_v44  ;;  %v1057_v44 = vld [vmem:[%s5503_s1 + $0x10] sm:$0xff] }
 0x144   :  { %v616_v62 = vpop.xlane.xlu1 %615  ;;  %v3723_v60 = vpop.xlane.xlu0 %612 }
 0x145   :  { %v828_v56 = vmul.f32 0.020408163, %v616_v62  ;;  %2514 = vrsqrt.f32 %v906_v27  ;;  %v902_v27 = vadd.f32 1e-05, %v822_v26 }
 0x146   :  { %2516 = vrsqrt.f32 %v900_v4  ;;  %v2505_v41 = vpop.eup %2504 }
 0x147   :  { %v908_v40 = vadd.f32 1e-05, %v828_v56  ;;  %v2507_v62 = vpop.eup %2506  ;;  %v823_v56 = vmul.f32 0.020408163, %v601_v13  ;;  %v1064_v13 = vld [vmem:[%s5503_s1 + $0x48] sm:$0xff] }
 0x148   :  { %v622_v61 = vpop.xlane.xlu1 %621  ;;  %v3725_v11 = vpop.xlane.xlu0 %618 }
 0x149   :  { %v830_v52 = vmul.f32 0.020408163, %v622_v61  ;;  %2518 = vrsqrt.f32 %v908_v40  ;;  %v3743_v61 = vmul.f32 %v2505_v41, %v1057_v44  ;;  %v2509_v4 = vpop.eup %2508  ;;  %v3745_v40 = vmul.f32 %v2507_v62, %v1055_v3 }
 0x14a   :  { %2520 = vrsqrt.f32 %v901_v48  ;;  %v903_v26 = vadd.f32 1e-05, %v823_v56  ;;  %v825_v48 = vmul.f32 0.020408163, %v607_v37  ;;  %v1066_v37 = vld [vmem:[%s5503_s1 + $0x58] sm:$0xff] }
 0x14b   :  { %v910_v34 = vadd.f32 1e-05, %v830_v52  ;;  %v1058_v52 = vld [vmem:[%s5503_s1 + $0x18] sm:$0xff]  ;;  %v827_v56 = vmul.f32 0.020408163, %v3723_v60  ;;  %v1068_v60 = vld [vmem:[%s5503_s1 + $0x68] sm:$0xff] }
 0x14c   :  { %v628_v18 = vpop.xlane.xlu1 %627  ;;  %v3730_v57 = vpop.xlane.xlu0 %624  ;;  %v3757_v41 = vmul.f32 %v2509_v4, %v1058_v52 }
 0x14d   :  { %v832_v35 = vmul.f32 0.020408163, %v628_v18  ;;  %2522 = vrsqrt.f32 %v910_v34 }
 0x14e   :  { %v2511_v7 = vpop.eup %2510  ;;  %2524 = vrsqrt.f32 %v902_v27  ;;  %v905_v27 = vadd.f32 1e-05, %v825_v48  ;;  %v829_v48 = vmul.f32 0.020408163, %v3725_v11  ;;  %v1070_v11 = vld [vmem:[%s5503_s1 + $0x78] sm:$0xff] }
 0x14f   :  { %v912_v43 = vadd.f32 1e-05, %v832_v35  ;;  %v2513_v34 = vpop.eup %2512  ;;  %v3759_v62 = vmul.f32 %v2511_v7, %v1064_v13 }
 0x150   :  { %1462 = vperm.xlu1 %2501, %v3732_v19   ;;  %v634_v29 = vpop.xlane.xlu1 %633  ;;  %v3738_v53 = vpop.xlane.xlu0 %630 }
 0x151   :  { %v834_v10 = vmul.f32 0.020408163, %v634_v29  ;;  %2526 = vrsqrt.f32 %v912_v43  ;;  %v1059_v29 = vld [vmem:[%s5503_s1 + $0x20] sm:$0xff] }
 0x152   :  { %v2515_v3 = vpop.eup %2514  ;;  %2528 = vrsqrt.f32 %v903_v26  ;;  %v3772_v4 = vmul.f32 %v2513_v34, %v1059_v29 }
 0x153   :  { %v914_v35 = vadd.f32 1e-05, %v834_v10  ;;  %v2517_v43 = vpop.eup %2516  ;;  %v3774_v7 = vmul.f32 %v2515_v3, %v1066_v37  ;;  %v1061_v37 = vld [vmem:[%s5503_s1 + $0x30] sm:$0xff] }
 0x154   :  { %v640_v18 = vpop.xlane.xlu1 %639  ;;  %1467 = vperm.xlu1 %2501, %v3743_v61   ;;  %v3751_v30 = vpop.xlane.xlu0 %636 }
 0x155   :  { %1457 = vperm.xlu0 %2500, %v3745_v40   ;;  %v836_v44 = vmul.f32 0.020408163, %v640_v18  ;;  %2530 = vrsqrt.f32 %v914_v35  ;;  %v1060_v18 = vld [vmem:[%s5503_s1 + $0x28] sm:$0xff] }
 0x156   :  { %v2519_v13 = vpop.eup %2518  ;;  %2532 = vrsqrt.f32 %v905_v27  ;;  %v3787_v34 = vmul.f32 %v2517_v43, %v1060_v18 }
 0x157   :  { %v916_v10 = vadd.f32 1e-05, %v836_v44  ;;  %v2521_v35 = vpop.eup %2520  ;;  %v3789_v3 = vmul.f32 %v2519_v13, %v1068_v60  ;;  %v1062_v60 = vld [vmem:[%s5503_s1 + $0x38] sm:$0xff] }
 0x158   :  { %v646_v36 = vpop.xlane.xlu1 %645  ;;  %1472 = vperm.xlu1 %2501, %v3757_v41   ;;  %v3765_v21 = vpop.xlane.xlu0 %642  ;;  %v3802_v43 = vmul.f32 %v2521_v35, %v1061_v37 }
 0x159   :  { %1502 = vperm.xlu0 %2500, %v3759_v62   ;;  %v838_v52 = vmul.f32 0.020408163, %v646_v36  ;;  %v907_v36 = vadd.f32 1e-05, %v827_v56  ;;  %2534 = vrsqrt.f32 %v916_v10  ;;  %v831_v56 = vmul.f32 0.020408163, %v3730_v57 }
 0x15a   :  { %v2523_v25 = vpop.eup %2522  ;;  %v1072_v57 = vld [vmem:[%s5503_s1 + $0x88] sm:$0xff] }
 0x15b   :  { %v918_v44 = vadd.f32 1e-05, %v838_v52  ;;  %2536 = vrsqrt.f32 %v907_v36  ;;  %v2525_v10 = vpop.eup %2524  ;;  %v3804_v13 = vmul.f32 %v2523_v25, %v1070_v11  ;;  %v833_v25 = vmul.f32 0.020408163, %v3738_v53  ;;  %v1063_v11 = vld [vmem:[%s5503_s1 + $0x40] sm:$0xff]  ;;  %v1074_v53 = vld [vmem:[%s5503_s1 + $0x98] sm:$0xff] }
 0x15c   :  { %v652_v8 = vpop.xlane.xlu1 %651  ;;  %1477 = vperm.xlu1 %2501, %v3772_v4   ;;  %v3780_v26 = vpop.xlane.xlu0 %648 }
 0x15d   :  { %1512 = vperm.xlu0 %2500, %v3774_v7   ;;  %v840_v29 = vmul.f32 0.020408163, %v652_v8  ;;  %v909_v8 = vadd.f32 1e-05, %v829_v48  ;;  %2538 = vrsqrt.f32 %v918_v44  ;;  %v3817_v48 = vmul.f32 %v2525_v10, %v1062_v60 }
 0x15e   :  { %v2527_v23 = vpop.eup %2526 }
 0x15f   :  { %v920_v52 = vadd.f32 1e-05, %v840_v29  ;;  %2540 = vrsqrt.f32 %v909_v8  ;;  %v2529_v35 = vpop.eup %2528  ;;  %v3819_v37 = vmul.f32 %v2527_v23, %v1072_v57  ;;  %v835_v23 = vmul.f32 0.020408163, %v3751_v30  ;;  %v1065_v57 = vld [vmem:[%s5503_s1 + $0x50] sm:$0xff]  ;;  %v1076_v30 = vld [vmem:[%s5503_s1 + $0xa8] sm:$0xff] }
 0x160   :  { %v658_v49 = vpop.xlane.xlu1 %657  ;;  %1482 = vperm.xlu1 %2501, %v3787_v34   ;;  %v3795_v27 = vpop.xlane.xlu0 %654 }
 0x161   :  { %1522 = vperm.xlu0 %2500, %v3789_v3   ;;  %v842_v18 = vmul.f32 0.020408163, %v658_v49  ;;  %v911_v49 = vadd.f32 1e-05, %v831_v56  ;;  %2542 = vrsqrt.f32 %v920_v52  ;;  %v3832_v56 = vmul.f32 %v2529_v35, %v1063_v11 }
 0x162   :  { %v2531_v32 = vpop.eup %2530 }
 0x163   :  { %v922_v44 = vadd.f32 1e-05, %v842_v18  ;;  %2544 = vrsqrt.f32 %v911_v49  ;;  %v2533_v10 = vpop.eup %2532  ;;  %v3834_v60 = vmul.f32 %v2531_v32, %v1074_v53  ;;  %v837_v32 = vmul.f32 0.020408163, %v3765_v21  ;;  %v1067_v53 = vld [vmem:[%s5503_s1 + $0x60] sm:$0xff]  ;;  %v1078_v21 = vld [vmem:[%s5503_s1 + $0xb8] sm:$0xff] }
 0x164   :  { %v664_v17 = vpop.xlane.xlu1 %663  ;;  %1487 = vperm.xlu1 %2501, %v3802_v43   ;;  %v3810_v36 = vpop.xlane.xlu0 %660 }
 0x165   :  { %1532 = vperm.xlu0 %2500, %v3804_v13   ;;  %v844_v29 = vmul.f32 0.020408163, %v664_v17  ;;  %v913_v17 = vadd.f32 1e-05, %v833_v25  ;;  %2546 = vrsqrt.f32 %v922_v44  ;;  %v3847_v25 = vmul.f32 %v2533_v10, %v1065_v57 }
 0x166   :  { %v2535_v28 = vpop.eup %2534 }
 0x167   :  { %v924_v52 = vadd.f32 1e-05, %v844_v29  ;;  %2548 = vrsqrt.f32 %v913_v17  ;;  %v3849_v11 = vmul.f32 %v2535_v28, %v1076_v30  ;;  %v839_v28 = vmul.f32 0.020408163, %v3780_v26  ;;  %v1069_v30 = vld [vmem:[%s5503_s1 + $0x70] sm:$0xff]  ;;  %v1080_v26 = vld [vmem:[%s5503_s1 + $0xc8] sm:$0xff] }
 0x168   :  { %v670_v33 = vpop.xlane.xlu1 %669  ;;  %1492 = vperm.xlu1 %2501, %v3817_v48   ;;  %v3825_v8 = vpop.xlane.xlu0 %666 }
 0x169   :  { %1542 = vperm.xlu0 %2500, %v3819_v37   ;;  %v846_v18 = vmul.f32 0.020408163, %v670_v33  ;;  %v915_v33 = vadd.f32 1e-05, %v835_v23  ;;  %v2537_v35 = vpop.eup %2536  ;;  %2550 = vrsqrt.f32 %v924_v52 }
 0x16a   :  { %v2539_v46 = vpop.eup %2538  ;;  %v3862_v23 = vmul.f32 %v2537_v35, %v1067_v53 }
 0x16b   :  { %v926_v44 = vadd.f32 1e-05, %v846_v18  ;;  %2552 = vrsqrt.f32 %v915_v33  ;;  %v3864_v57 = vmul.f32 %v2539_v46, %v1078_v21  ;;  %v841_v46 = vmul.f32 0.020408163, %v3795_v27  ;;  %v1071_v21 = vld [vmem:[%s5503_s1 + $0x80] sm:$0xff]  ;;  %v1082_v27 = vld [vmem:[%s5503_s1 + $0xd8] sm:$0xff] }
 0x16c   :  { %v676_v45 = vpop.xlane.xlu1 %675  ;;  %1497 = vperm.xlu1 %2501, %v3832_v56   ;;  %v3840_v49 = vpop.xlane.xlu0 %672 }
 0x16d   :  { %1552 = vperm.xlu0 %2500, %v3834_v60   ;;  %v848_v29 = vmul.f32 0.020408163, %v676_v45  ;;  %v917_v45 = vadd.f32 1e-05, %v837_v32  ;;  %v2541_v10 = vpop.eup %2540  ;;  %2554 = vrsqrt.f32 %v926_v44 }
 0x16e   :  { %v2543_v20 = vpop.eup %2542  ;;  %v3877_v32 = vmul.f32 %v2541_v10, %v1069_v30 }
 0x16f   :  { %v928_v52 = vadd.f32 1e-05, %v848_v29  ;;  %2556 = vrsqrt.f32 %v917_v45  ;;  %v3879_v53 = vmul.f32 %v2543_v20, %v1080_v26  ;;  %v843_v20 = vmul.f32 0.020408163, %v3810_v36  ;;  %v1073_v26 = vld [vmem:[%s5503_s1 + $0x90] sm:$0xff]  ;;  %v1084_v36 = vld [vmem:[%s5503_s1 + $0xe8] sm:$0xff] }
 0x170   :  { %v682_v0 = vpop.xlane.xlu1 %681  ;;  %1507 = vperm.xlu1 %2501, %v3847_v25   ;;  %v3855_v17 = vpop.xlane.xlu0 %678 }
 0x171   :  { %1562 = vperm.xlu0 %2500, %v3849_v11   ;;  %v850_v18 = vmul.f32 0.020408163, %v682_v0  ;;  %v919_v0 = vadd.f32 1e-05, %v839_v28  ;;  %v2545_v35 = vpop.eup %2544  ;;  %2558 = vrsqrt.f32 %v928_v52  ;;  %5786 = vst [vmem:[#allocation40_spill] sm:$0xff] %v3879_v53 }
 0x172   :  { %v2547_v9 = vpop.eup %2546  ;;  %v3892_v28 = vmul.f32 %v2545_v35, %v1071_v21 }
 0x173   :  { %v930_v44 = vadd.f32 1e-05, %v850_v18  ;;  %2560 = vrsqrt.f32 %v919_v0  ;;  %v3894_v30 = vmul.f32 %v2547_v9, %v1082_v27  ;;  %v845_v9 = vmul.f32 0.020408163, %v3825_v8  ;;  %v1075_v27 = vld [vmem:[%s5503_s1 + $0xa0] sm:$0xff]  ;;  %v1086_v8 = vld [vmem:[%s5503_s1 + $0xf8] sm:$0xff] }
 0x174   :  { %v688_v24 = vpop.xlane.xlu1 %687  ;;  %1517 = vperm.xlu1 %2501, %v3862_v23   ;;  %v3870_v33 = vpop.xlane.xlu0 %684  ;;  %5787 = vst [vmem:[#allocation39_spill] sm:$0xff] %v3892_v28 }
 0x175   :  { %1572 = vperm.xlu0 %2500, %v3864_v57   ;;  %v852_v29 = vmul.f32 0.020408163, %v688_v24  ;;  %v921_v24 = vadd.f32 1e-05, %v841_v46  ;;  %v2549_v10 = vpop.eup %2548  ;;  %2562 = vrsqrt.f32 %v930_v44  ;;  %5788 = vst [vmem:[#allocation66_spill] sm:$0xff] %v3894_v30 }
 0x176   :  { %v2551_v1 = vpop.eup %2550  ;;  %v3907_v46 = vmul.f32 %v2549_v10, %v1073_v26 }
 0x177   :  { %v932_v52 = vadd.f32 1e-05, %v852_v29  ;;  %2564 = vrsqrt.f32 %v921_v24  ;;  %v3909_v21 = vmul.f32 %v2551_v1, %v1084_v36  ;;  %v847_v1 = vmul.f32 0.020408163, %v3840_v49  ;;  %v1077_v36 = vld [vmem:[%s5503_s1 + $0xb0] sm:$0xff]  ;;  %v1088_v49 = vld [vmem:[%s5503_s1 + $0x108] sm:$0xff] }
 0x178   :  { %v694_v50 = vpop.xlane.xlu1 %693  ;;  %1527 = vperm.xlu1 %2501, %v3877_v32   ;;  %v3885_v45 = vpop.xlane.xlu0 %690  ;;  %5789 = vst [vmem:[#allocation67_spill] sm:$0xff] %v3907_v46 }
 0x179   :  { %1582 = vperm.xlu0 %2500, %v3879_v53   ;;  %v854_v18 = vmul.f32 0.020408163, %v694_v50  ;;  %v923_v50 = vadd.f32 1e-05, %v843_v20  ;;  %v2553_v35 = vpop.eup %2552  ;;  %2566 = vrsqrt.f32 %v932_v52  ;;  %5790 = vst [vmem:[#allocation68_spill] sm:$0xff] %v3909_v21 }
 0x17a   :  { %v3922_v20 = vmul.f32 %v2553_v35, %v1075_v27 }
 0x17b   :  { %v934_v44 = vadd.f32 1e-05, %v854_v18  ;;  %2568 = vrsqrt.f32 %v923_v50 }
 0x17c   :  { %v700_v16 = vpop.xlane.xlu1 %699  ;;  %1537 = vperm.xlu1 %2501, %v3892_v28   ;;  %v3900_v0 = vpop.xlane.xlu0 %696  ;;  %5791 = vst [vmem:[#allocation69_spill] sm:$0xff] %v3922_v20 }
 0x17d   :  { %1592 = vperm.xlu0 %2500, %v3894_v30   ;;  %v856_v29 = vmul.f32 0.020408163, %v700_v16  ;;  %v2555_v28 = vpop.eup %2554  ;;  %v925_v16 = vadd.f32 1e-05, %v845_v9  ;;  %2570 = vrsqrt.f32 %v934_v44 }
 0x17e   :  { %v2557_v10 = vpop.eup %2556  ;;  %v3924_v26 = vmul.f32 %v2555_v28, %v1086_v8  ;;  %v849_v28 = vmul.f32 0.020408163, %v3855_v17  ;;  %v1079_v8 = vld [vmem:[%s5503_s1 + $0xc0] sm:$0xff]  ;;  %v1090_v17 = vld [vmem:[%s5503_s1 + $0x118] sm:$0xff] }
 0x17f   :  { %v936_v52 = vadd.f32 1e-05, %v856_v29  ;;  %2572 = vrsqrt.f32 %v925_v16  ;;  %v3937_v9 = vmul.f32 %v2557_v10, %v1077_v36 }
 0x180   :  { %v706_v53 = vpop.xlane.xlu1 %705  ;;  %1547 = vperm.xlu1 %2501, %v3907_v46   ;;  %v3915_v24 = vpop.xlane.xlu0 %702  ;;  %5792 = vst [vmem:[#allocation70_spill] sm:$0xff] %v3924_v26 }
 0x181   :  { %1602 = vperm.xlu0 %2500, %v3909_v21   ;;  %v858_v18 = vmul.f32 0.020408163, %v706_v53  ;;  %v2559_v46 = vpop.eup %2558  ;;  %v927_v53 = vadd.f32 1e-05, %v847_v1  ;;  %5793 = vst [vmem:[#allocation71_spill] sm:$0xff] %v3937_v9  ;;  %2574 = vrsqrt.f32 %v936_v52 }
 0x182   :  { %v2561_v35 = vpop.eup %2560  ;;  %v3939_v27 = vmul.f32 %v2559_v46, %v1088_v49  ;;  %v851_v46 = vmul.f32 0.020408163, %v3870_v33  ;;  %v1081_v49 = vld [vmem:[%s5503_s1 + $0xd0] sm:$0xff]  ;;  %v1092_v33 = vld [vmem:[%s5503_s1 + $0x128] sm:$0xff] }
 0x183   :  { %v938_v44 = vadd.f32 1e-05, %v858_v18  ;;  %2576 = vrsqrt.f32 %v927_v53  ;;  %v3952_v1 = vmul.f32 %v2561_v35, %v1079_v8 }
 0x184   :  { %v712_v30 = vpop.xlane.xlu1 %711  ;;  %1557 = vperm.xlu1 %2501, %v3922_v20   ;;  %v3930_v50 = vpop.xlane.xlu0 %708  ;;  %5794 = vst [vmem:[#allocation72_spill] sm:$0xff] %v3939_v27 }
 0x185   :  { %1612 = vperm.xlu0 %2500, %v3924_v26   ;;  %v860_v29 = vmul.f32 0.020408163, %v712_v30  ;;  %v2563_v20 = vpop.eup %2562  ;;  %v929_v30 = vadd.f32 1e-05, %v849_v28  ;;  %5795 = vst [vmem:[#allocation73_spill] sm:$0xff] %v3952_v1  ;;  %2578 = vrsqrt.f32 %v938_v44 }
 0x186   :  { %v2565_v10 = vpop.eup %2564  ;;  %v3954_v36 = vmul.f32 %v2563_v20, %v1090_v17  ;;  %v853_v20 = vmul.f32 0.020408163, %v3885_v45  ;;  %v1083_v17 = vld [vmem:[%s5503_s1 + $0xe0] sm:$0xff]  ;;  %v1094_v45 = vld [vmem:[%s5503_s1 + $0x138] sm:$0xff] }
 0x187   :  { %v940_v52 = vadd.f32 1e-05, %v860_v29  ;;  %2580 = vrsqrt.f32 %v929_v30  ;;  %v3967_v28 = vmul.f32 %v2565_v10, %v1081_v49 }
 0x188   :  { %v718_v21 = vpop.xlane.xlu1 %717  ;;  %1567 = vperm.xlu1 %2501, %v3937_v9   ;;  %v3945_v16 = vpop.xlane.xlu0 %714  ;;  %5796 = vst [vmem:[#allocation74_spill] sm:$0xff] %v3954_v36 }
 0x189   :  { %1622 = vperm.xlu0 %2500, %v3939_v27   ;;  %v862_v18 = vmul.f32 0.020408163, %v718_v21  ;;  %v2567_v9 = vpop.eup %2566  ;;  %v931_v21 = vadd.f32 1e-05, %v851_v46  ;;  %5797 = vst [vmem:[#allocation75_spill] sm:$0xff] %v3967_v28  ;;  %2582 = vrsqrt.f32 %v940_v52 }
 0x18a   :  { %v2569_v35 = vpop.eup %2568  ;;  %v3969_v8 = vmul.f32 %v2567_v9, %v1092_v33  ;;  %v855_v9 = vmul.f32 0.020408163, %v3900_v0  ;;  %v1085_v33 = vld [vmem:[%s5503_s1 + $0xf0] sm:$0xff]  ;;  %v1096_v0 = vld [vmem:[%s5503_s1 + $0x148] sm:$0xff] }
 0x18b   :  { %v942_v44 = vadd.f32 1e-05, %v862_v18  ;;  %2584 = vrsqrt.f32 %v931_v21  ;;  %v3982_v46 = vmul.f32 %v2569_v35, %v1083_v17 }
 0x18c   :  { %v724_v26 = vpop.xlane.xlu1 %723  ;;  %1577 = vperm.xlu1 %2501, %v3952_v1   ;;  %v3960_v53 = vpop.xlane.xlu0 %720  ;;  %5798 = vst [vmem:[#allocation76_spill] sm:$0xff] %v3969_v8 }
 0x18d   :  { %1632 = vperm.xlu0 %2500, %v3954_v36   ;;  %v864_v29 = vmul.f32 0.020408163, %v724_v26  ;;  %v2571_v1 = vpop.eup %2570  ;;  %v933_v26 = vadd.f32 1e-05, %v853_v20  ;;  %5799 = vst [vmem:[#allocation77_spill] sm:$0xff] %v3982_v46  ;;  %2586 = vrsqrt.f32 %v942_v44 }
 0x18e   :  { %v2573_v10 = vpop.eup %2572  ;;  %v3984_v49 = vmul.f32 %v2571_v1, %v1094_v45  ;;  %v857_v1 = vmul.f32 0.020408163, %v3915_v24  ;;  %v1087_v45 = vld [vmem:[%s5503_s1 + $0x100] sm:$0xff]  ;;  %v1098_v24 = vld [vmem:[%s5503_s1 + $0x158] sm:$0xff] }
 0x18f   :  { %v944_v52 = vadd.f32 1e-05, %v864_v29  ;;  %2588 = vrsqrt.f32 %v933_v26  ;;  %v3997_v20 = vmul.f32 %v2573_v10, %v1085_v33 }
 0x190   :  { %v730_v27 = vpop.xlane.xlu1 %729  ;;  %1587 = vperm.xlu1 %2501, %v3967_v28   ;;  %v3975_v30 = vpop.xlane.xlu0 %726  ;;  %5800 = vst [vmem:[#allocation78_spill] sm:$0xff] %v3984_v49 }
 0x191   :  { %1642 = vperm.xlu0 %2500, %v3969_v8   ;;  %v866_v18 = vmul.f32 0.020408163, %v730_v27  ;;  %v2575_v28 = vpop.eup %2574  ;;  %v935_v27 = vadd.f32 1e-05, %v855_v9  ;;  %5801 = vst [vmem:[#allocation79_spill] sm:$0xff] %v3997_v20  ;;  %2590 = vrsqrt.f32 %v944_v52 }
 0x192   :  { %v2577_v35 = vpop.eup %2576  ;;  %v3999_v17 = vmul.f32 %v2575_v28, %v1096_v0  ;;  %v859_v28 = vmul.f32 0.020408163, %v3930_v50  ;;  %v1089_v0 = vld [vmem:[%s5503_s1 + $0x110] sm:$0xff]  ;;  %v1100_v50 = vld [vmem:[%s5503_s1 + $0x168] sm:$0xff] }
 0x193   :  { %v946_v44 = vadd.f32 1e-05, %v866_v18  ;;  %2592 = vrsqrt.f32 %v935_v27  ;;  %v4012_v9 = vmul.f32 %v2577_v35, %v1087_v45 }
 0x194   :  { %v736_v36 = vpop.xlane.xlu1 %735  ;;  %1597 = vperm.xlu1 %2501, %v3982_v46   ;;  %v3990_v21 = vpop.xlane.xlu0 %732  ;;  %5802 = vst [vmem:[#allocation80_spill] sm:$0xff] %v3999_v17 }
 0x195   :  { %1652 = vperm.xlu0 %2500, %v3984_v49   ;;  %v868_v29 = vmul.f32 0.020408163, %v736_v36  ;;  %v2579_v46 = vpop.eup %2578  ;;  %v937_v36 = vadd.f32 1e-05, %v857_v1  ;;  %5803 = vst [vmem:[#allocation81_spill] sm:$0xff] %v4012_v9  ;;  %2594 = vrsqrt.f32 %v946_v44 }
 0x196   :  { %v2581_v10 = vpop.eup %2580  ;;  %v4014_v33 = vmul.f32 %v2579_v46, %v1098_v24  ;;  %v861_v46 = vmul.f32 0.020408163, %v3945_v16  ;;  %v1091_v24 = vld [vmem:[%s5503_s1 + $0x120] sm:$0xff]  ;;  %v1102_v16 = vld [vmem:[%s5503_s1 + $0x178] sm:$0xff] }
 0x197   :  { %v948_v52 = vadd.f32 1e-05, %v868_v29  ;;  %2596 = vrsqrt.f32 %v937_v36  ;;  %v4027_v1 = vmul.f32 %v2581_v10, %v1089_v0 }
 0x198   :  { %v742_v8 = vpop.xlane.xlu1 %741  ;;  %1607 = vperm.xlu1 %2501, %v3997_v20   ;;  %v4005_v26 = vpop.xlane.xlu0 %738  ;;  %5804 = vst [vmem:[#allocation82_spill] sm:$0xff] %v4014_v33 }
 0x199   :  { %1662 = vperm.xlu0 %2500, %v3999_v17   ;;  %v870_v18 = vmul.f32 0.020408163, %v742_v8  ;;  %v2583_v20 = vpop.eup %2582  ;;  %v939_v8 = vadd.f32 1e-05, %v859_v28  ;;  %5805 = vst [vmem:[#allocation83_spill] sm:$0xff] %v4027_v1  ;;  %2598 = vrsqrt.f32 %v948_v52 }
 0x19a   :  { %v2585_v35 = vpop.eup %2584  ;;  %v4029_v45 = vmul.f32 %v2583_v20, %v1100_v50  ;;  %v863_v20 = vmul.f32 0.020408163, %v3960_v53  ;;  %v1093_v50 = vld [vmem:[%s5503_s1 + $0x130] sm:$0xff]  ;;  %v1104_v53 = vld [vmem:[%s5503_s1 + $0x188] sm:$0xff] }
 0x19b   :  { %v950_v44 = vadd.f32 1e-05, %v870_v18  ;;  %2600 = vrsqrt.f32 %v939_v8  ;;  %v4042_v28 = vmul.f32 %v2585_v35, %v1091_v24 }
 0x19c   :  { %v748_v49 = vpop.xlane.xlu1 %747  ;;  %1617 = vperm.xlu1 %2501, %v4012_v9   ;;  %v4020_v27 = vpop.xlane.xlu0 %744  ;;  %5806 = vst [vmem:[#allocation84_spill] sm:$0xff] %v4029_v45 }
 0x19d   :  { %1672 = vperm.xlu0 %2500, %v4014_v33   ;;  %v872_v29 = vmul.f32 0.020408163, %v748_v49  ;;  %v2587_v9 = vpop.eup %2586  ;;  %v941_v49 = vadd.f32 1e-05, %v861_v46  ;;  %5807 = vst [vmem:[#allocation85_spill] sm:$0xff] %v4042_v28  ;;  %2602 = vrsqrt.f32 %v950_v44 }
 0x19e   :  { %v2589_v10 = vpop.eup %2588  ;;  %v4044_v0 = vmul.f32 %v2587_v9, %v1102_v16  ;;  %v865_v9 = vmul.f32 0.020408163, %v3975_v30  ;;  %v1095_v16 = vld [vmem:[%s5503_s1 + $0x140] sm:$0xff]  ;;  %v1106_v30 = vld [vmem:[%s5503_s1 + $0x198] sm:$0xff] }
 0x19f   :  { %v952_v52 = vadd.f32 1e-05, %v872_v29  ;;  %2604 = vrsqrt.f32 %v941_v49  ;;  %v4057_v46 = vmul.f32 %v2589_v10, %v1093_v50 }
 0x1a0   :  { %v754_v17 = vpop.xlane.xlu1 %753  ;;  %1627 = vperm.xlu1 %2501, %v4027_v1   ;;  %v4035_v36 = vpop.xlane.xlu0 %750  ;;  %5808 = vst [vmem:[#allocation86_spill] sm:$0xff] %v4044_v0 }
 0x1a1   :  { %1682 = vperm.xlu0 %2500, %v4029_v45   ;;  %v874_v18 = vmul.f32 0.020408163, %v754_v17  ;;  %v2591_v1 = vpop.eup %2590  ;;  %v943_v17 = vadd.f32 1e-05, %v863_v20  ;;  %5809 = vst [vmem:[#allocation87_spill] sm:$0xff] %v4057_v46  ;;  %2606 = vrsqrt.f32 %v952_v52 }
 0x1a2   :  { %v2593_v35 = vpop.eup %2592  ;;  %v4059_v24 = vmul.f32 %v2591_v1, %v1104_v53  ;;  %v867_v1 = vmul.f32 0.020408163, %v3990_v21  ;;  %v1097_v53 = vld [vmem:[%s5503_s1 + $0x150] sm:$0xff]  ;;  %v1108_v21 = vld [vmem:[%s5503_s1 + $0x1a8] sm:$0xff] }
 0x1a3   :  { %v954_v44 = vadd.f32 1e-05, %v874_v18  ;;  %2608 = vrsqrt.f32 %v943_v17  ;;  %v4072_v20 = vmul.f32 %v2593_v35, %v1095_v16 }
 0x1a4   :  { %v760_v33 = vpop.xlane.xlu1 %759  ;;  %1637 = vperm.xlu1 %2501, %v4042_v28   ;;  %v4050_v8 = vpop.xlane.xlu0 %756  ;;  %5810 = vst [vmem:[#allocation88_spill] sm:$0xff] %v4059_v24 }
 0x1a5   :  { %1692 = vperm.xlu0 %2500, %v4044_v0   ;;  %v876_v29 = vmul.f32 0.020408163, %v760_v33  ;;  %v2595_v28 = vpop.eup %2594  ;;  %v945_v33 = vadd.f32 1e-05, %v865_v9  ;;  %5811 = vst [vmem:[#allocation89_spill] sm:$0xff] %v4072_v20  ;;  %2610 = vrsqrt.f32 %v954_v44 }
 0x1a6   :  { %v2597_v10 = vpop.eup %2596  ;;  %v4074_v50 = vmul.f32 %v2595_v28, %v1106_v30  ;;  %v869_v28 = vmul.f32 0.020408163, %v4005_v26  ;;  %v1099_v30 = vld [vmem:[%s5503_s1 + $0x160] sm:$0xff]  ;;  %v1110_v26 = vld [vmem:[%s5503_s1 + $0x1b8] sm:$0xff] }
 0x1a7   :  { %v956_v52 = vadd.f32 1e-05, %v876_v29  ;;  %2612 = vrsqrt.f32 %v945_v33  ;;  %v4087_v9 = vmul.f32 %v2597_v10, %v1097_v53 }
 0x1a8   :  { %v766_v45 = vpop.xlane.xlu1 %765  ;;  %1647 = vperm.xlu1 %2501, %v4057_v46   ;;  %v4065_v49 = vpop.xlane.xlu0 %762  ;;  %5812 = vst [vmem:[#allocation90_spill] sm:$0xff] %v4074_v50 }
 0x1a9   :  { %1702 = vperm.xlu0 %2500, %v4059_v24   ;;  %v878_v18 = vmul.f32 0.020408163, %v766_v45  ;;  %v2599_v46 = vpop.eup %2598  ;;  %v947_v45 = vadd.f32 1e-05, %v867_v1  ;;  %5813 = vst [vmem:[#allocation91_spill] sm:$0xff] %v4087_v9  ;;  %2614 = vrsqrt.f32 %v956_v52 }
 0x1aa   :  { %v2601_v35 = vpop.eup %2600  ;;  %v4089_v16 = vmul.f32 %v2599_v46, %v1108_v21  ;;  %v871_v46 = vmul.f32 0.020408163, %v4020_v27  ;;  %v1101_v21 = vld [vmem:[%s5503_s1 + $0x170] sm:$0xff]  ;;  %v1112_v27 = vld [vmem:[%s5503_s1 + $0x1c8] sm:$0xff] }
 0x1ab   :  { %v958_v44 = vadd.f32 1e-05, %v878_v18  ;;  %2616 = vrsqrt.f32 %v947_v45  ;;  %v4102_v1 = vmul.f32 %v2601_v35, %v1099_v30 }
 0x1ac   :  { %v772_v0 = vpop.xlane.xlu1 %771  ;;  %1657 = vperm.xlu1 %2501, %v4072_v20   ;;  %v4080_v17 = vpop.xlane.xlu0 %768  ;;  %5814 = vst [vmem:[#allocation92_spill] sm:$0xff] %v4089_v16 }
 0x1ad   :  { %1712 = vperm.xlu0 %2500, %v4074_v50   ;;  %v880_v29 = vmul.f32 0.020408163, %v772_v0  ;;  %v2603_v20 = vpop.eup %2602  ;;  %v949_v0 = vadd.f32 1e-05, %v869_v28  ;;  %5815 = vst [vmem:[#allocation93_spill] sm:$0xff] %v4102_v1  ;;  %2618 = vrsqrt.f32 %v958_v44 }
 0x1ae   :  { %v2605_v10 = vpop.eup %2604  ;;  %v4104_v53 = vmul.f32 %v2603_v20, %v1110_v26  ;;  %v873_v20 = vmul.f32 0.020408163, %v4035_v36  ;;  %v1103_v26 = vld [vmem:[%s5503_s1 + $0x180] sm:$0xff]  ;;  %v1114_v36 = vld [vmem:[%s5503_s1 + $0x1d8] sm:$0xff] }
 0x1af   :  { %v960_v52 = vadd.f32 1e-05, %v880_v29  ;;  %2620 = vrsqrt.f32 %v949_v0  ;;  %v4117_v28 = vmul.f32 %v2605_v10, %v1101_v21 }
 0x1b0   :  { %v778_v24 = vpop.xlane.xlu1 %777  ;;  %1667 = vperm.xlu1 %2501, %v4087_v9   ;;  %v4095_v33 = vpop.xlane.xlu0 %774  ;;  %5816 = vst [vmem:[#allocation94_spill] sm:$0xff] %v4104_v53 }
 0x1b1   :  { %1722 = vperm.xlu0 %2500, %v4089_v16   ;;  %v882_v18 = vmul.f32 0.020408163, %v778_v24  ;;  %v2607_v9 = vpop.eup %2606  ;;  %v951_v24 = vadd.f32 1e-05, %v871_v46  ;;  %5817 = vst [vmem:[#allocation95_spill] sm:$0xff] %v4117_v28  ;;  %2622 = vrsqrt.f32 %v960_v52 }
 0x1b2   :  { %v2609_v35 = vpop.eup %2608  ;;  %v4119_v30 = vmul.f32 %v2607_v9, %v1112_v27  ;;  %v875_v9 = vmul.f32 0.020408163, %v4050_v8  ;;  %v1105_v27 = vld [vmem:[%s5503_s1 + $0x190] sm:$0xff]  ;;  %v1116_v8 = vld [vmem:[%s5503_s1 + $0x1e8] sm:$0xff] }
 0x1b3   :  { %v962_v44 = vadd.f32 1e-05, %v882_v18  ;;  %2624 = vrsqrt.f32 %v951_v24  ;;  %v4132_v46 = vmul.f32 %v2609_v35, %v1103_v26 }
 0x1b4   :  { %v784_v50 = vpop.xlane.xlu1 %783  ;;  %1677 = vperm.xlu1 %2501, %v4102_v1   ;;  %v4110_v45 = vpop.xlane.xlu0 %780  ;;  %5818 = vst [vmem:[#allocation96_spill] sm:$0xff] %v4119_v30 }
 0x1b5   :  { %1732 = vperm.xlu0 %2500, %v4104_v53   ;;  %v884_v29 = vmul.f32 0.020408163, %v784_v50  ;;  %v2611_v1 = vpop.eup %2610  ;;  %v953_v50 = vadd.f32 1e-05, %v873_v20  ;;  %5819 = vst [vmem:[#allocation97_spill] sm:$0xff] %v4132_v46  ;;  %2626 = vrsqrt.f32 %v962_v44 }
 0x1b6   :  { %v2613_v10 = vpop.eup %2612  ;;  %v4134_v21 = vmul.f32 %v2611_v1, %v1114_v36  ;;  %v877_v1 = vmul.f32 0.020408163, %v4065_v49  ;;  %v1107_v36 = vld [vmem:[%s5503_s1 + $0x1a0] sm:$0xff]  ;;  %v1118_v49 = vld [vmem:[%s5503_s1 + $0x1f8] sm:$0xff] }
 0x1b7   :  { %v964_v52 = vadd.f32 1e-05, %v884_v29  ;;  %2628 = vrsqrt.f32 %v953_v50  ;;  %v4147_v20 = vmul.f32 %v2613_v10, %v1105_v27 }
 0x1b8   :  { %v790_v16 = vpop.xlane.xlu1 %789  ;;  %1687 = vperm.xlu1 %2501, %v4117_v28   ;;  %v4125_v0 = vpop.xlane.xlu0 %786  ;;  %5820 = vst [vmem:[#allocation98_spill] sm:$0xff] %v4134_v21 }
 0x1b9   :  { %1742 = vperm.xlu0 %2500, %v4119_v30   ;;  %v886_v18 = vmul.f32 0.020408163, %v790_v16  ;;  %v2615_v28 = vpop.eup %2614  ;;  %v955_v16 = vadd.f32 1e-05, %v875_v9  ;;  %5821 = vst [vmem:[#allocation99_spill] sm:$0xff] %v4147_v20  ;;  %2630 = vrsqrt.f32 %v964_v52 }
 0x1ba   :  { %v2617_v35 = vpop.eup %2616  ;;  %v4149_v26 = vmul.f32 %v2615_v28, %v1116_v8  ;;  %v879_v28 = vmul.f32 0.020408163, %v4080_v17  ;;  %v1109_v8 = vld [vmem:[%s5503_s1 + $0x1b0] sm:$0xff]  ;;  %v1120_v17 = vld [vmem:[%s5503_s1 + $0x208] sm:$0xff] }
 0x1bb   :  { %v966_v44 = vadd.f32 1e-05, %v886_v18  ;;  %2632 = vrsqrt.f32 %v955_v16  ;;  %v4162_v9 = vmul.f32 %v2617_v35, %v1107_v36 }
 0x1bc   :  { %v796_v53 = vpop.xlane.xlu1 %795  ;;  %1697 = vperm.xlu1 %2501, %v4132_v46   ;;  %v4140_v24 = vpop.xlane.xlu0 %792  ;;  %5822 = vst [vmem:[#allocation100_spill] sm:$0xff] %v4149_v26  ;;  %v959_v16 = vadd.f32 1e-05, %v879_v28 }
 0x1bd   :  { %1752 = vperm.xlu0 %2500, %v4134_v21   ;;  %v888_v29 = vmul.f32 0.020408163, %v796_v53  ;;  %v2619_v46 = vpop.eup %2618  ;;  %v957_v53 = vadd.f32 1e-05, %v877_v1  ;;  %5823 = vst [vmem:[#allocation101_spill] sm:$0xff] %v4162_v9  ;;  %2634 = vrsqrt.f32 %v966_v44 }
 0x1be   :  { %v2621_v10 = vpop.eup %2620  ;;  %v4164_v27 = vmul.f32 %v2619_v46, %v1118_v49  ;;  %v1111_v49 = vld [vmem:[%s5503_s1 + $0x1c0] sm:$0xff] }
 0x1bf   :  { %v968_v52 = vadd.f32 1e-05, %v888_v29  ;;  %2636 = vrsqrt.f32 %v957_v53  ;;  %v4177_v1 = vmul.f32 %v2621_v10, %v1109_v8  ;;  %v1113_v8 = vld [vmem:[%s5503_s1 + $0x1d0] sm:$0xff] }
 0x1c0   :  { %v802_v30 = vpop.xlane.xlu1 %801  ;;  %1707 = vperm.xlu1 %2501, %v4147_v20   ;;  %v4155_v50 = vpop.xlane.xlu0 %798  ;;  %5824 = vst [vmem:[#allocation102_spill] sm:$0xff] %v4164_v27 }
 0x1c1   :  { %1762 = vperm.xlu0 %2500, %v4149_v26   ;;  %v890_v18 = vmul.f32 0.020408163, %v802_v30  ;;  %v2623_v20 = vpop.eup %2622  ;;  %v881_v30 = vmul.f32 0.020408163, %v4095_v33  ;;  %5825 = vst [vmem:[#allocation103_spill] sm:$0xff] %v4177_v1  ;;  %2638 = vrsqrt.f32 %v968_v52  ;;  %v1122_v33 = vld [vmem:[%s5503_s1 + $0x218] sm:$0xff] }
 0x1c2   :  { %v2625_v35 = vpop.eup %2624  ;;  %v4179_v36 = vmul.f32 %v2623_v20, %v1120_v17  ;;  %2640 = vrsqrt.f32 %v959_v16 }
 0x1c3   :  { %v970_v44 = vadd.f32 1e-05, %v890_v18  ;;  %v961_v53 = vadd.f32 1e-05, %v881_v30  ;;  %v4190_v20 = vmul.f32 %v2625_v35, %v1111_v49 }
 0x1c4   :  { %v808_v21 = vpop.xlane.xlu1 %807  ;;  %1717 = vperm.xlu1 %2501, %v4162_v9   ;;  %v4175_v46 = vpop.xlane.xlu0 %804 }
 0x1c5   :  { %1772 = vperm.xlu0 %2500, %v4164_v27   ;;  %v892_v29 = vmul.f32 0.020408163, %v808_v21  ;;  %v2627_v9 = vpop.eup %2626  ;;  %v883_v21 = vmul.f32 0.020408163, %v4110_v45  ;;  %2642 = vrsqrt.f32 %v970_v44  ;;  %v1124_v45 = vld [vmem:[%s5503_s1 + $0x228] sm:$0xff] }
 0x1c6   :  { %v2629_v28 = vpop.eup %2628  ;;  %v4192_v18 = vmul.f32 %v2627_v9, %v1122_v33  ;;  %2644 = vrsqrt.f32 %v961_v53  ;;  %v885_v9 = vmul.f32 0.020408163, %v4125_v0  ;;  %v1126_v0 = vld [vmem:[%s5503_s1 + $0x238] sm:$0xff] }
 0x1c7   :  { %v972_v10 = vadd.f32 1e-05, %v892_v29  ;;  %v2631_v17 = vpop.eup %2630  ;;  %v4205_v16 = vmul.f32 %v2629_v28, %v1113_v8  ;;  %v1115_v29 = vld [vmem:[%s5503_s1 + $0x1e0] sm:$0xff]  ;;  %v887_v28 = vmul.f32 0.020408163, %v4140_v24  ;;  %v1128_v24 = vld [vmem:[%s5503_s1 + $0x248] sm:$0xff] }
 0x1c8   :  { %v814_v27 = vpop.xlane.xlu1 %813  ;;  %1727 = vperm.xlu1 %2501, %v4177_v1   ;;  %v811_v1 = vpop.xlane.xlu0 %810  ;;  %v4207_v44 = vmul.f32 %v2631_v17, %v1124_v45  ;;  %v1117_v17 = vld [vmem:[%s5503_s1 + $0x1f0] sm:$0xff] }
 0x1c9   :  { %1782 = vperm.xlu0 %2500, %v4179_v36   ;;  %v894_v52 = vmul.f32 0.020408163, %v814_v27  ;;  %v963_v27 = vadd.f32 1e-05, %v883_v21  ;;  %v2633_v30 = vpop.eup %2632  ;;  %2646 = vrsqrt.f32 %v972_v10  ;;  %v965_v21 = vadd.f32 1e-05, %v885_v9 }
 0x1ca   :  { %v2635_v49 = vpop.eup %2634  ;;  %v4222_v10 = vmul.f32 %v2633_v30, %v1115_v29  ;;  %v889_v9 = vmul.f32 0.020408163, %v4155_v50  ;;  %v1130_v50 = vld [vmem:[%s5503_s1 + $0x258] sm:$0xff] }
 0x1cb   :  { %v974_v35 = vadd.f32 1e-05, %v894_v52  ;;  %2648 = vrsqrt.f32 %v963_v27  ;;  %v4224_v8 = vmul.f32 %v2635_v49, %v1126_v0  ;;  %v967_v27 = vadd.f32 1e-05, %v887_v28  ;;  %v1119_v49 = vld [vmem:[%s5503_s1 + $0x200] sm:$0xff] }
 0x1cc   :  { %v4197_v26 = vpop.permute.xlu1 %1462  ;;  %1737 = vperm.xlu1 %2501, %v4190_v20   ;;  %5828 = vst [vmem:[#allocation106_spill] sm:$0xff] %v4222_v10  ;;  %v2637_v52 = vpop.eup %2636  ;;  %v891_v28 = vmul.f32 0.020408163, %v4175_v46  ;;  %v1132_v46 = vld [vmem:[%s5503_s1 + $0x268] sm:$0xff] }
 0x1cd   :  { %1792 = vperm.xlu0 %2500, %v4192_v18   ;;  %2650 = vrsqrt.f32 %v974_v35  ;;  %v4239_v30 = vmul.f32 %v2637_v52, %v1117_v17 }
 0x1ce   :  { %v2639_v45 = vpop.eup %2638  ;;  %2652 = vrsqrt.f32 %v965_v21  ;;  %v969_v21 = vadd.f32 1e-05, %v889_v9  ;;  %v893_v9 = vmul.f32 0.020408163, %v811_v1  ;;  %v1134_v1 = vld [vmem:[%s5503_s1 + $0x278] sm:$0xff] }
 0x1cf   :  { %5830 = vst [vmem:[#allocation108_spill] sm:$0xff] %v4239_v30  ;;  %v2641_v35 = vpop.eup %2640  ;;  %v4241_v29 = vmul.f32 %v2639_v45, %v1128_v24  ;;  %2654 = vrsqrt.f32 %v967_v27  ;;  %v1121_v24 = vld [vmem:[%s5503_s1 + $0x210] sm:$0xff]  ;;  %v971_v27 = vadd.f32 1e-05, %v891_v28 }
 0x1d0   :  { %v4212_v33 = vpop.permute.xlu1 %1467  ;;  %1747 = vperm.xlu1 %2501, %v4205_v16   ;;  %v4215_v53 = vpop.permute.xlu0 %1457  ;;  %v4256_v52 = vmul.f32 %v2641_v35, %v1119_v49  ;;  %2656 = vrsqrt.f32 %v969_v21 }
 0x1d1   :  { %5826 = vst [vmem:[#allocation104_spill] sm:$0xff] %v4212_v33  ;;  %5827 = vst [vmem:[#allocation105_spill] sm:$0xff] %v4215_v53  ;;  %1802 = vperm.xlu0 %2500, %v4207_v44   ;;  %2658 = vrsqrt.f32 %v971_v27  ;;  %v1136_v27 = vld [vmem:[%s5504_s2 + $0x8] sm:$0xff] }
 0x1d2   :  { %5831 = vst [vmem:[#allocation109_spill] sm:$0xff] %v4241_v29  ;;  %v2643_v0 = vpop.eup %2642  ;;  %5834 = vst [vmem:[#allocation112_spill] sm:$0xff] %v4256_v52 }
 0x1d3   :  { %v2645_v17 = vpop.eup %2644  ;;  %v4258_v45 = vmul.f32 %v2643_v0, %v1130_v50  ;;  %v1123_v50 = vld [vmem:[%s5503_s1 + $0x220] sm:$0xff] }
 0x1d4   :  { %v4229_v33 = vpop.permute.xlu1 %1472  ;;  %1757 = vperm.xlu1 %2501, %v4222_v10   ;;  %v4232_v53 = vpop.permute.xlu0 %1502  ;;  %v4272_v35 = vmul.f32 %v2645_v17, %v1121_v24  ;;  %v1125_v24 = vld [vmem:[%s5503_s1 + $0x230] sm:$0xff] }
 0x1d5   :  { %5829 = vst [vmem:[#allocation107_spill] sm:$0xff] %v4232_v53  ;;  %1812 = vperm.xlu0 %2500, %v4224_v8  }
 0x1d6   :  { %5836 = vst [vmem:[#allocation114_spill] sm:$0xff] %v4272_v35 }
 0x1d8   :  { %v4246_v53 = vpop.permute.xlu1 %1477  ;;  %1767 = vperm.xlu1 %2501, %v4239_v30   ;;  %v4249_v10 = vpop.permute.xlu0 %1512 }
 0x1d9   :  { %5832 = vst [vmem:[#allocation110_spill] sm:$0xff] %v4246_v53  ;;  %5833 = vst [vmem:[#allocation111_spill] sm:$0xff] %v4249_v10  ;;  %1822 = vperm.xlu0 %2500, %v4241_v29   ;;  %v2647_v53 = vpop.eup %2646 }
 0x1da   :  { %v2649_v49 = vpop.eup %2648  ;;  %v4274_v0 = vmul.f32 %v2647_v53, %v1132_v46  ;;  %v973_v53 = vadd.f32 1e-05, %v893_v9  ;;  %v5839_v46 = vld [vmem:[#allocation35_spill] sm:$0xff] }
 0x1db   :  { %v4288_v21 = vmul.f32 %v2649_v49, %v1123_v50  ;;  %v1298_v50 = vmul.f32 %v3757_v41, %v3327_v55  ;;  %v1300_v55 = vmul.f32 %v3787_v34, %v3339_v51  ;;  %v1302_v51 = vmul.f32 %v3817_v48, %v3348_v54 }
 0x1dc   :  { %v4263_v10 = vpop.permute.xlu1 %1482  ;;  %1777 = vperm.xlu1 %2501, %v4256_v52   ;;  %v4266_v30 = vpop.permute.xlu0 %1522  ;;  %2660 = vrsqrt.f32 %v973_v53  ;;  %v1138_v53 = vld [vmem:[%s5504_s2 + $0x18] sm:$0xff]  ;;  %v1304_v54 = vmul.f32 %v3759_v62, %v3358_v31  ;;  %v1135_v31 = vld [vmem:[%s5504_s2] sm:$0xff]  ;;  %v1306_v62 = vmul.f32 %v3774_v7, %v3368_v63  ;;  %v1137_v63 = vld [vmem:[%s5504_s2 + $0x10] sm:$0xff]  ;;  %v1308_v7 = vmul.f32 %v3789_v3, %v3378_v38 }
 0x1dd   :  { %5835 = vst [vmem:[#allocation113_spill] sm:$0xff] %v4266_v30  ;;  %1832 = vperm.xlu0 %2500, %v4258_v45   ;;  %v2651_v52 = vpop.eup %2650  ;;  %v1310_v38 = vmul.f32 %v3804_v13, %v3388_v6  ;;  %v1312_v6 = vmul.f32 %v3819_v37, %v3398_v47  ;;  %v1314_v47 = vmul.f32 %v3834_v60, %v3408_v2 }
 0x1de   :  { %v2653_v28 = vpop.eup %2652  ;;  %v4290_v17 = vmul.f32 %v2651_v52, %v1134_v1  ;;  %v1316_v2 = vmul.f32 %v3849_v11, %v3420_v42  ;;  %v1318_v42 = vmul.f32 %v3864_v57, %v3430_v12  ;;  %v5846_v12 = vld [vmem:[#allocation46_spill] sm:$0xff]  ;;  %v5847_v57 = vld [vmem:[#allocation40_spill] sm:$0xff] }
 0x1df   :  { %v4306_v52 = vmul.f32 %v2653_v28, %v1125_v24  ;;  %v2655_v9 = vpop.eup %2654  ;;  %v1378_v24 = vsub.f32 %v1138_v53, %v1298_v50  ;;  %v1131_v53 = vld [vmem:[%s5503_s1 + $0x260] sm:$0xff] }
 0x1e0   :  { %v4279_v30 = vpop.permute.xlu1 %1487  ;;  %1787 = vperm.xlu1 %2501, %v4272_v35   ;;  %v4282_v29 = vpop.permute.xlu0 %1532 }
 0x1e1   :  { %5837 = vst [vmem:[#allocation115_spill] sm:$0xff] %v4279_v30  ;;  %5838 = vst [vmem:[#allocation116_spill] sm:$0xff] %v4282_v29  ;;  %1842 = vperm.xlu0 %2500, %v4274_v0   ;;  %v1296_v30 = vmul.f32 %v3732_v19, %v5839_v46  ;;  %v1127_v19 = vld [vmem:[%s5503_s1 + $0x240] sm:$0xff] }
 0x1e2   :  { %v4321_v28 = vmul.f32 %v2655_v9, %v1127_v19  ;;  %v1140_v9 = vld [vmem:[%s5504_s2 + $0x28] sm:$0xff] }
 0x1e3   :  { %v1376_v49 = vsub.f32 %v1136_v27, %v1296_v30  ;;  %v2657_v30 = vpop.eup %2656  ;;  %v1129_v27 = vld [vmem:[%s5503_s1 + $0x250] sm:$0xff]  ;;  %v1380_v50 = vsub.f32 %v1140_v9, %v1300_v55 }
 0x1e4   :  { %v4297_v29 = vpop.permute.xlu1 %1492  ;;  %1797 = vperm.xlu1 %2501, %v4288_v21   ;;  %v4300_v35 = vpop.permute.xlu0 %1542  ;;  %v1133_v9 = vld [vmem:[%s5503_s1 + $0x270] sm:$0xff] }
 0x1e5   :  { %1852 = vperm.xlu0 %2500, %v4290_v17   ;;  %v2659_v19 = vpop.eup %2658 }
 0x1e8   :  { %v4313_v1 = vpop.permute.xlu1 %1497  ;;  %1807 = vperm.xlu1 %2501, %v4306_v52   ;;  %v4316_v46 = vpop.permute.xlu0 %1552 }
 0x1e9   :  { %5840 = vst [vmem:[#allocation35_spill] sm:$0xff] %v4316_v46  ;;  %1942 = vperm.xlu0 %2500, %v1376_v49   ;;  %v4336_v49 = vmul.f32 %v2657_v30, %v1129_v27  ;;  %v1142_v30 = vld [vmem:[%s5504_s2 + $0x38] sm:$0xff]  ;;  %v2661_v27 = vpop.eup %2660 }
 0x1ea   :  { %v1382_v55 = vsub.f32 %v1142_v30, %v1302_v51 }
 0x1ec   :  { %v4328_v41 = vpop.permute.xlu1 %1507  ;;  %1817 = vperm.xlu1 %2501, %v4321_v28   ;;  %v4331_v46 = vpop.permute.xlu0 %1562 }
 0x1ed   :  { %5841 = vst [vmem:[#allocation117_spill] sm:$0xff] %v4331_v46  ;;  %1952 = vperm.xlu0 %2500, %v1378_v24   ;;  %v4351_v24 = vmul.f32 %v2659_v19, %v1131_v53  ;;  %v1144_v19 = vld [vmem:[%s5504_s2 + $0x48] sm:$0xff]  ;;  %v5845_v53 = vld [vmem:[#allocation38_spill] sm:$0xff] }
 0x1ee   :  { %v1295_v51 = vmul.f32 %v3745_v40, %v5845_v53  ;;  %v1384_v30 = vsub.f32 %v1144_v19, %v1304_v54  ;;  %v1148_v53 = vld [vmem:[%s5504_s2 + $0x68] sm:$0xff] }
 0x1f0   :  { %v4343_v34 = vpop.permute.xlu1 %1517  ;;  %1827 = vperm.xlu1 %2501, %v4336_v49   ;;  %v4346_v46 = vpop.permute.xlu0 %1572  ;;  %v1375_v40 = vsub.f32 %v1135_v31, %v1295_v51 }
 0x1f1   :  { %5842 = vst [vmem:[#allocation118_spill] sm:$0xff] %v4346_v46  ;;  %1962 = vperm.xlu0 %2500, %v1380_v50   ;;  %v4366_v50 = vmul.f32 %v2661_v27, %v1133_v9  ;;  %v1146_v27 = vld [vmem:[%s5504_s2 + $0x58] sm:$0xff] }
 0x1f2   :  { %v1386_v9 = vsub.f32 %v1146_v27, %v1306_v62  ;;  %v1150_v62 = vld [vmem:[%s5504_s2 + $0x78] sm:$0xff] }
 0x1f4   :  { %v4358_v48 = vpop.permute.xlu1 %1527  ;;  %1837 = vperm.xlu1 %2501, %v4351_v24   ;;  %v4361_v46 = vpop.permute.xlu0 %1582 }
 0x1f5   :  { %5843 = vst [vmem:[#allocation119_spill] sm:$0xff] %v4358_v48  ;;  %5844 = vst [vmem:[#allocation120_spill] sm:$0xff] %v4361_v46  ;;  %1972 = vperm.xlu0 %2500, %v1382_v55   ;;  %v1297_v55 = vmul.f32 %v3743_v61, %v3315_v58  ;;  %v1299_v58 = vmul.f32 %v3772_v4, %v3331_v5  ;;  %v1388_v61 = vsub.f32 %v1148_v53, %v1308_v7  ;;  %v1143_v7 = vld [vmem:[%s5504_s2 + $0x40] sm:$0xff] }
 0x1f6   :  { %v1301_v5 = vmul.f32 %v3802_v43, %v3343_v22  ;;  %v1390_v4 = vsub.f32 %v1150_v62, %v1310_v38  ;;  %v1303_v22 = vmul.f32 %v3832_v56, %v3353_v59  ;;  %v1305_v59 = vmul.f32 %v3847_v25, %v3363_v14  ;;  %v1156_v38 = vld [vmem:[%s5504_s2 + $0xa8] sm:$0xff] }
 0x1f7   :  { %v1377_v51 = vsub.f32 %v1137_v63, %v1297_v55  ;;  %v1307_v14 = vmul.f32 %v3862_v23, %v3373_v39  ;;  %v1396_v25 = vsub.f32 %v1156_v38, %v1316_v2  ;;  %v1309_v39 = vmul.f32 %v3877_v32, %v3383_v15  ;;  %v5848_v15 = vld [vmem:[#allocation41_spill] sm:$0xff]  ;;  %v5849_v32 = vld [vmem:[#allocation39_spill] sm:$0xff] }
 0x1f8   :  { %v4375_v48 = vpop.permute.xlu1 %1537  ;;  %1847 = vperm.xlu1 %2501, %v4366_v50   ;;  %v4378_v46 = vpop.permute.xlu0 %1592 }
 0x1f9   :  { %1982 = vperm.xlu0 %2500, %v1384_v30   ;;  %v1139_v30 = vld [vmem:[%s5504_s2 + $0x20] sm:$0xff] }
 0x1fa   :  { %v1379_v27 = vsub.f32 %v1139_v30, %v1299_v58  ;;  %v1383_v58 = vsub.f32 %v1143_v7, %v1303_v22 }
 0x1fc   :  { %v4390_v54 = vpop.permute.xlu1 %1547  ;;  %1937 = vperm.xlu1 %2501, %v1375_v40   ;;  %v4392_v19 = vpop.permute.xlu0 %1602  ;;  %v1141_v40 = vld [vmem:[%s5504_s2 + $0x30] sm:$0xff] }
 0x1fd   :  { %1992 = vperm.xlu0 %2500, %v1386_v9   ;;  %v1152_v9 = vld [vmem:[%s5504_s2 + $0x88] sm:$0xff]  ;;  %v1381_v63 = vsub.f32 %v1141_v40, %v1301_v5 }
 0x1fe   :  { %v1392_v43 = vsub.f32 %v1152_v9, %v1312_v6  ;;  %v1149_v6 = vld [vmem:[%s5504_s2 + $0x70] sm:$0xff]  ;;  %v1320_v9 = vmul.f32 %v5847_v57, %v5846_v12 }
 0x1ff   :  { %v1389_v7 = vsub.f32 %v1149_v6, %v1309_v39  ;;  %v5854_v39 = vld [vmem:[#allocation50_spill] sm:$0xff] }
 0x200   :  { %v4404_v3 = vpop.permute.xlu1 %1557  ;;  %1947 = vperm.xlu1 %2501, %v1377_v51   ;;  %v4406_v31 = vpop.permute.xlu0 %1612  ;;  %v1154_v51 = vld [vmem:[%s5504_s2 + $0x98] sm:$0xff] }
 0x201   :  { %2002 = vperm.xlu0 %2500, %v1388_v61   ;;  %v1394_v56 = vsub.f32 %v1154_v51, %v1314_v47  ;;  %v1145_v61 = vld [vmem:[%s5504_s2 + $0x50] sm:$0xff]  ;;  %v1311_v47 = vmul.f32 %v5849_v32, %v5848_v15  ;;  %v5857_v15 = vld [vmem:[#allocation69_spill] sm:$0xff] }
 0x202   :  { %v1385_v62 = vsub.f32 %v1145_v61, %v1305_v59  ;;  %v5850_v59 = vld [vmem:[#allocation48_spill] sm:$0xff] }
 0x204   :  { %v4418_v13 = vpop.permute.xlu1 %1567  ;;  %1957 = vperm.xlu1 %2501, %v1379_v27   ;;  %v4420_v55 = vpop.permute.xlu0 %1622  ;;  %v1147_v27 = vld [vmem:[%s5504_s2 + $0x60] sm:$0xff] }
 0x205   :  { %2012 = vperm.xlu0 %2500, %v1390_v4   ;;  %v1158_v4 = vld [vmem:[%s5504_s2 + $0xb8] sm:$0xff]  ;;  %v1387_v40 = vsub.f32 %v1147_v27, %v1307_v14  ;;  %v5853_v27 = vld [vmem:[#allocation67_spill] sm:$0xff] }
 0x206   :  { %v1398_v23 = vsub.f32 %v1158_v4, %v1318_v42 }
 0x208   :  { %v4432_v37 = vpop.permute.xlu1 %1577  ;;  %1967 = vperm.xlu1 %2501, %v1381_v63   ;;  %v4434_v53 = vpop.permute.xlu0 %1632 }
 0x209   :  { %2022 = vperm.xlu0 %2500, %v1392_v43   ;;  %v1160_v43 = vld [vmem:[%s5504_s2 + $0xc8] sm:$0xff] }
 0x20a   :  { %v1400_v51 = vsub.f32 %v1160_v43, %v1320_v9  ;;  %v1164_v9 = vld [vmem:[%s5504_s2 + $0xe8] sm:$0xff] }
 0x20c   :  { %v4446_v60 = vpop.permute.xlu1 %1587  ;;  %1977 = vperm.xlu1 %2501, %v1383_v58   ;;  %v4448_v30 = vpop.permute.xlu0 %1642  ;;  %v1151_v58 = vld [vmem:[%s5504_s2 + $0x80] sm:$0xff] }
 0x20d   :  { %2032 = vperm.xlu0 %2500, %v1394_v56   ;;  %v5851_v56 = vld [vmem:[#allocation66_spill] sm:$0xff]  ;;  %v1391_v14 = vsub.f32 %v1151_v58, %v1311_v47  ;;  %v5858_v58 = vld [vmem:[#allocation52_spill] sm:$0xff] }
 0x20e   :  { %v1322_v61 = vmul.f32 %v5851_v56, %v5850_v59  ;;  %v5859_v59 = vld [vmem:[#allocation70_spill] sm:$0xff] }
 0x20f   :  { %v1326_v56 = vmul.f32 %v5859_v59, %v5858_v58 }
 0x210   :  { %v4460_v11 = vpop.permute.xlu1 %1597  ;;  %1987 = vperm.xlu1 %2501, %v1385_v62   ;;  %v4462_v5 = vpop.permute.xlu0 %1652  ;;  %v1162_v62 = vld [vmem:[%s5504_s2 + $0xd8] sm:$0xff] }
 0x211   :  { %2042 = vperm.xlu0 %2500, %v1396_v25   ;;  %v5852_v25 = vld [vmem:[#allocation42_spill] sm:$0xff]  ;;  %v1402_v4 = vsub.f32 %v1162_v62, %v1322_v61 }
 0x212   :  { %v1313_v42 = vmul.f32 %v5853_v27, %v5852_v25  ;;  %v5860_v27 = vld [vmem:[#allocation44_spill] sm:$0xff] }
 0x214   :  { %v4474_v63 = vpop.permute.xlu1 %1607  ;;  %1997 = vperm.xlu1 %2501, %v1387_v40   ;;  %v4476_v22 = vpop.permute.xlu0 %1662  ;;  %v1153_v40 = vld [vmem:[%s5504_s2 + $0x90] sm:$0xff] }
 0x215   :  { %2052 = vperm.xlu0 %2500, %v1398_v23   ;;  %v5855_v23 = vld [vmem:[#allocation68_spill] sm:$0xff]  ;;  %v1393_v43 = vsub.f32 %v1153_v40, %v1313_v42  ;;  %v5861_v42 = vld [vmem:[#allocation71_spill] sm:$0xff] }
 0x216   :  { %v1324_v6 = vmul.f32 %v5855_v23, %v5854_v39  ;;  %v1157_v39 = vld [vmem:[%s5504_s2 + $0xb0] sm:$0xff]  ;;  %v5862_v23 = vld [vmem:[#allocation54_spill] sm:$0xff] }
 0x218   :  { %v4488_v2 = vpop.permute.xlu1 %1617  ;;  %2007 = vperm.xlu1 %2501, %v1389_v7   ;;  %v4490_v38 = vpop.permute.xlu0 %1672  ;;  %v5856_v7 = vld [vmem:[#allocation43_spill] sm:$0xff]  ;;  %v1404_v47 = vsub.f32 %v1164_v9, %v1324_v6  ;;  %v5863_v6 = vld [vmem:[#allocation72_spill] sm:$0xff] }
 0x219   :  { %2062 = vperm.xlu0 %2500, %v1400_v51   ;;  %v1315_v32 = vmul.f32 %v5857_v15, %v5856_v7  ;;  %v1155_v51 = vld [vmem:[%s5504_s2 + $0xa0] sm:$0xff]  ;;  %v1328_v9 = vmul.f32 %v5863_v6, %v5862_v23  ;;  %v1168_v15 = vld [vmem:[%s5504_s2 + $0x108] sm:$0xff] }
 0x21a   :  { %v5870_v6 = vld [vmem:[#allocation75_spill] sm:$0xff] }
 0x21b   :  { %v1395_v25 = vsub.f32 %v1155_v51, %v1315_v32  ;;  %v5865_v51 = vld [vmem:[#allocation73_spill] sm:$0xff]  ;;  %v1408_v59 = vsub.f32 %v1168_v15, %v1328_v9 }
 0x21c   :  { %v4502_v12 = vpop.permute.xlu1 %1627  ;;  %2017 = vperm.xlu1 %2501, %v1391_v14   ;;  %v4504_v57 = vpop.permute.xlu0 %1682  ;;  %v1166_v14 = vld [vmem:[%s5504_s2 + $0xf8] sm:$0xff] }
 0x21d   :  { %2072 = vperm.xlu0 %2500, %v1402_v4   ;;  %v1317_v4 = vmul.f32 %v5861_v42, %v5860_v27  ;;  %v1406_v40 = vsub.f32 %v1166_v14, %v1326_v56  ;;  %v1159_v56 = vld [vmem:[%s5504_s2 + $0xc0] sm:$0xff]  ;;  %v5866_v14 = vld [vmem:[#allocation56_spill] sm:$0xff] }
 0x21e   :  { %v5867_v27 = vld [vmem:[#allocation74_spill] sm:$0xff] }
 0x21f   :  { %v1397_v32 = vsub.f32 %v1157_v39, %v1317_v4  ;;  %v1330_v42 = vmul.f32 %v5867_v27, %v5866_v14  ;;  %v1170_v4 = vld [vmem:[%s5504_s2 + $0x118] sm:$0xff]  ;;  %v5869_v39 = vld [vmem:[#allocation47_spill] sm:$0xff]  ;;  %v5872_v14 = vld [vmem:[#allocation76_spill] sm:$0xff] }
 0x220   :  { %v4516_v61 = vpop.permute.xlu1 %1637  ;;  %2027 = vperm.xlu1 %2501, %v1393_v43   ;;  %v4518_v62 = vpop.permute.xlu0 %1692  ;;  %v1321_v9 = vmul.f32 %v5870_v6, %v5869_v39  ;;  %v1163_v6 = vld [vmem:[%s5504_s2 + $0xe0] sm:$0xff] }
 0x221   :  { %2082 = vperm.xlu0 %2500, %v1404_v47   ;;  %v5864_v47 = vld [vmem:[#allocation45_spill] sm:$0xff]  ;;  %v1410_v15 = vsub.f32 %v1170_v4, %v1330_v42 }
 0x222   :  { %v1319_v58 = vmul.f32 %v5865_v51, %v5864_v47  ;;  %v1161_v47 = vld [vmem:[%s5504_s2 + $0xd0] sm:$0xff]  ;;  %v5871_v51 = vld [vmem:[#allocation58_spill] sm:$0xff]  ;;  %v5876_v42 = vld [vmem:[#allocation77_spill] sm:$0xff] }
 0x223   :  { %v1332_v27 = vmul.f32 %v5872_v14, %v5871_v51  ;;  %v5877_v51 = vld [vmem:[#allocation60_spill] sm:$0xff]  ;;  %v5878_v14 = vld [vmem:[#allocation78_spill] sm:$0xff] }
 0x224   :  { %v4530_v43 = vpop.permute.xlu1 %1647  ;;  %2037 = vperm.xlu1 %2501, %v1395_v25   ;;  %v4532_v7 = vpop.permute.xlu0 %1702 }
 0x225   :  { %2092 = vperm.xlu0 %2500, %v1406_v40   ;;  %v1399_v40 = vsub.f32 %v1159_v56, %v1319_v58  ;;  %v1172_v58 = vld [vmem:[%s5504_s2 + $0x128] sm:$0xff]  ;;  %v5875_v56 = vld [vmem:[#allocation49_spill] sm:$0xff] }
 0x226   :  { %v1323_v4 = vmul.f32 %v5876_v42, %v5875_v56  ;;  %v1412_v39 = vsub.f32 %v1172_v58, %v1332_v27  ;;  %v5882_v27 = vld [vmem:[#allocation79_spill] sm:$0xff]  ;;  %v1165_v42 = vld [vmem:[%s5504_s2 + $0xf0] sm:$0xff] }
 0x228   :  { %v4544_v25 = vpop.permute.xlu1 %1657  ;;  %2047 = vperm.xlu1 %2501, %v1397_v32   ;;  %v4546_v23 = vpop.permute.xlu0 %1712 }
 0x229   :  { %5868 = vst [vmem:[#allocation38_spill] sm:$0xff] %v4546_v23  ;;  %2102 = vperm.xlu0 %2500, %v1408_v59   ;;  %v1401_v59 = vsub.f32 %v1161_v47, %v1321_v9  ;;  %v1174_v9 = vld [vmem:[%s5504_s2 + $0x138] sm:$0xff]  ;;  %v5881_v47 = vld [vmem:[#allocation51_spill] sm:$0xff] }
 0x22a   :  { %v1325_v58 = vmul.f32 %v5882_v27, %v5881_v47  ;;  %v1167_v27 = vld [vmem:[%s5504_s2 + $0x100] sm:$0xff] }
 0x22c   :  { %v4558_v32 = vpop.permute.xlu1 %1667  ;;  %2057 = vperm.xlu1 %2501, %v1399_v40   ;;  %v4560_v23 = vpop.permute.xlu0 %1722 }
 0x22d   :  { %5873 = vst [vmem:[#allocation46_spill] sm:$0xff] %v4558_v32  ;;  %5874 = vst [vmem:[#allocation40_spill] sm:$0xff] %v4560_v23  ;;  %2112 = vperm.xlu0 %2500, %v1410_v15   ;;  %v1334_v32 = vmul.f32 %v5878_v14, %v5877_v51  ;;  %v1403_v15 = vsub.f32 %v1163_v6, %v1323_v4  ;;  %v5883_v51 = vld [vmem:[#allocation62_spill] sm:$0xff]  ;;  %v5884_v14 = vld [vmem:[#allocation80_spill] sm:$0xff] }
 0x22e   :  { %v1176_v4 = vld [vmem:[%s5504_s2 + $0x148] sm:$0xff]  ;;  %v5887_v6 = vld [vmem:[#allocation53_spill] sm:$0xff] }
 0x22f   :  { %v1414_v56 = vsub.f32 %v1174_v9, %v1334_v32  ;;  %v5888_v32 = vld [vmem:[#allocation81_spill] sm:$0xff] }
 0x230   :  { %v4572_v40 = vpop.permute.xlu1 %1677  ;;  %2067 = vperm.xlu1 %2501, %v1401_v59   ;;  %v4574_v23 = vpop.permute.xlu0 %1732  ;;  %v1327_v9 = vmul.f32 %v5888_v32, %v5887_v6  ;;  %v1169_v32 = vld [vmem:[%s5504_s2 + $0x110] sm:$0xff] }
 0x231   :  { %5879 = vst [vmem:[#allocation41_spill] sm:$0xff] %v4572_v40  ;;  %5880 = vst [vmem:[#allocation39_spill] sm:$0xff] %v4574_v23  ;;  %2122 = vperm.xlu0 %2500, %v1412_v39   ;;  %v1336_v40 = vmul.f32 %v5884_v14, %v5883_v51  ;;  %v1405_v39 = vsub.f32 %v1165_v42, %v1325_v58  ;;  %v5889_v51 = vld [vmem:[#allocation64_spill] sm:$0xff]  ;;  %v5890_v14 = vld [vmem:[#allocation82_spill] sm:$0xff] }
 0x232   :  { %v1178_v58 = vld [vmem:[%s5504_s2 + $0x158] sm:$0xff]  ;;  %v5893_v42 = vld [vmem:[#allocation55_spill] sm:$0xff] }
 0x233   :  { %v1416_v47 = vsub.f32 %v1176_v4, %v1336_v40  ;;  %v5894_v40 = vld [vmem:[#allocation83_spill] sm:$0xff] }
 0x234   :  { %v4586_v59 = vpop.permute.xlu1 %1687  ;;  %2077 = vperm.xlu1 %2501, %v1403_v15   ;;  %v4588_v23 = vpop.permute.xlu0 %1742  ;;  %v1329_v4 = vmul.f32 %v5894_v40, %v5893_v42  ;;  %v1171_v40 = vld [vmem:[%s5504_s2 + $0x120] sm:$0xff] }
 0x235   :  { %5885 = vst [vmem:[#allocation48_spill] sm:$0xff] %v4586_v59  ;;  %5886 = vst [vmem:[#allocation66_spill] sm:$0xff] %v4588_v23  ;;  %2132 = vperm.xlu0 %2500, %v1414_v56   ;;  %v1338_v59 = vmul.f32 %v5890_v14, %v5889_v51  ;;  %v1407_v56 = vsub.f32 %v1167_v27, %v1327_v9  ;;  %v5895_v51 = vld [vmem:[#allocation2_spill] sm:$0xff]  ;;  %v5896_v14 = vld [vmem:[#allocation84_spill] sm:$0xff] }
 0x236   :  { %v1180_v9 = vld [vmem:[%s5504_s2 + $0x168] sm:$0xff]  ;;  %v5899_v27 = vld [vmem:[#allocation57_spill] sm:$0xff] }
 0x237   :  { %v1418_v6 = vsub.f32 %v1178_v58, %v1338_v59  ;;  %v5900_v59 = vld [vmem:[#allocation85_spill] sm:$0xff] }
 0x238   :  { %v4600_v15 = vpop.permute.xlu1 %1697  ;;  %2087 = vperm.xlu1 %2501, %v1405_v39   ;;  %v4602_v23 = vpop.permute.xlu0 %1752  ;;  %v1331_v58 = vmul.f32 %v5900_v59, %v5899_v27  ;;  %v1173_v59 = vld [vmem:[%s5504_s2 + $0x130] sm:$0xff] }
 0x239   :  { %5891 = vst [vmem:[#allocation42_spill] sm:$0xff] %v4600_v15  ;;  %5892 = vst [vmem:[#allocation67_spill] sm:$0xff] %v4602_v23  ;;  %2142 = vperm.xlu0 %2500, %v1416_v47   ;;  %v1340_v15 = vmul.f32 %v5896_v14, %v5895_v51  ;;  %v1409_v47 = vsub.f32 %v1169_v32, %v1329_v4  ;;  %v5901_v51 = vld [vmem:[#allocation3_spill] sm:$0xff]  ;;  %v5902_v14 = vld [vmem:[#allocation86_spill] sm:$0xff] }
 0x23a   :  { %v1182_v4 = vld [vmem:[%s5504_s2 + $0x178] sm:$0xff]  ;;  %v5905_v32 = vld [vmem:[#allocation59_spill] sm:$0xff] }
 0x23b   :  { %v1420_v42 = vsub.f32 %v1180_v9, %v1340_v15  ;;  %v5906_v15 = vld [vmem:[#allocation87_spill] sm:$0xff] }
 0x23c   :  { %v4614_v39 = vpop.permute.xlu1 %1707  ;;  %2097 = vperm.xlu1 %2501, %v1407_v56   ;;  %v4616_v23 = vpop.permute.xlu0 %1762  ;;  %v1333_v9 = vmul.f32 %v5906_v15, %v5905_v32  ;;  %v1175_v15 = vld [vmem:[%s5504_s2 + $0x140] sm:$0xff] }
 0x23d   :  { %5897 = vst [vmem:[#allocation50_spill] sm:$0xff] %v4614_v39  ;;  %5898 = vst [vmem:[#allocation68_spill] sm:$0xff] %v4616_v23  ;;  %2152 = vperm.xlu0 %2500, %v1418_v6   ;;  %v1342_v39 = vmul.f32 %v5902_v14, %v5901_v51  ;;  %v1411_v6 = vsub.f32 %v1171_v40, %v1331_v58  ;;  %v5907_v51 = vld [vmem:[#allocation5_spill] sm:$0xff]  ;;  %v5908_v14 = vld [vmem:[#allocation88_spill] sm:$0xff] }
 0x23e   :  { %v1184_v58 = vld [vmem:[%s5504_s2 + $0x188] sm:$0xff]  ;;  %v5911_v40 = vld [vmem:[#allocation61_spill] sm:$0xff] }
 0x23f   :  { %v1422_v27 = vsub.f32 %v1182_v4, %v1342_v39  ;;  %v5912_v39 = vld [vmem:[#allocation89_spill] sm:$0xff] }
 0x240   :  { %v4628_v56 = vpop.permute.xlu1 %1717  ;;  %2107 = vperm.xlu1 %2501, %v1409_v47   ;;  %v4630_v23 = vpop.permute.xlu0 %1772  ;;  %v1335_v4 = vmul.f32 %v5912_v39, %v5911_v40  ;;  %v1177_v39 = vld [vmem:[%s5504_s2 + $0x150] sm:$0xff] }
 0x241   :  { %5903 = vst [vmem:[#allocation43_spill] sm:$0xff] %v4628_v56  ;;  %5904 = vst [vmem:[#allocation69_spill] sm:$0xff] %v4630_v23  ;;  %2162 = vperm.xlu0 %2500, %v1420_v42   ;;  %v1344_v56 = vmul.f32 %v5908_v14, %v5907_v51  ;;  %v1413_v42 = vsub.f32 %v1173_v59, %v1333_v9  ;;  %v5913_v51 = vld [vmem:[#allocation7_spill] sm:$0xff]  ;;  %v5914_v14 = vld [vmem:[#allocation90_spill] sm:$0xff] }
 0x242   :  { %v1186_v9 = vld [vmem:[%s5504_s2 + $0x198] sm:$0xff]  ;;  %v5917_v59 = vld [vmem:[#allocation63_spill] sm:$0xff] }
 0x243   :  { %v1424_v32 = vsub.f32 %v1184_v58, %v1344_v56  ;;  %v5918_v56 = vld [vmem:[#allocation91_spill] sm:$0xff] }
 0x244   :  { %v4642_v47 = vpop.permute.xlu1 %1727  ;;  %2117 = vperm.xlu1 %2501, %v1411_v6   ;;  %v4644_v23 = vpop.permute.xlu0 %1782  ;;  %v1337_v58 = vmul.f32 %v5918_v56, %v5917_v59  ;;  %v1179_v56 = vld [vmem:[%s5504_s2 + $0x160] sm:$0xff] }
 0x245   :  { %5909 = vst [vmem:[#allocation52_spill] sm:$0xff] %v4642_v47  ;;  %5910 = vst [vmem:[#allocation70_spill] sm:$0xff] %v4644_v23  ;;  %2172 = vperm.xlu0 %2500, %v1422_v27   ;;  %v1346_v47 = vmul.f32 %v5914_v14, %v5913_v51  ;;  %v1415_v27 = vsub.f32 %v1175_v15, %v1335_v4  ;;  %v5919_v51 = vld [vmem:[#allocation9_spill] sm:$0xff]  ;;  %v5920_v14 = vld [vmem:[#allocation92_spill] sm:$0xff] }
 0x246   :  { %v1188_v4 = vld [vmem:[%s5504_s2 + $0x1a8] sm:$0xff]  ;;  %v5923_v15 = vld [vmem:[#allocation65_spill] sm:$0xff] }
 0x247   :  { %v1426_v40 = vsub.f32 %v1186_v9, %v1346_v47  ;;  %v5924_v47 = vld [vmem:[#allocation93_spill] sm:$0xff] }
 0x248   :  { %v4656_v6 = vpop.permute.xlu1 %1737  ;;  %2127 = vperm.xlu1 %2501, %v1413_v42   ;;  %v4658_v23 = vpop.permute.xlu0 %1792  ;;  %v1339_v9 = vmul.f32 %v5924_v47, %v5923_v15  ;;  %v1181_v47 = vld [vmem:[%s5504_s2 + $0x170] sm:$0xff] }
 0x249   :  { %5915 = vst [vmem:[#allocation44_spill] sm:$0xff] %v4656_v6  ;;  %5916 = vst [vmem:[#allocation71_spill] sm:$0xff] %v4658_v23  ;;  %2182 = vperm.xlu0 %2500, %v1424_v32   ;;  %v1348_v6 = vmul.f32 %v5920_v14, %v5919_v51  ;;  %v1417_v32 = vsub.f32 %v1177_v39, %v1337_v58  ;;  %v5925_v51 = vld [vmem:[#allocation11_spill] sm:$0xff]  ;;  %v5926_v14 = vld [vmem:[#allocation94_spill] sm:$0xff] }
 0x24a   :  { %v1190_v58 = vld [vmem:[%s5504_s2 + $0x1b8] sm:$0xff]  ;;  %v5929_v39 = vld [vmem:[#allocation4_spill] sm:$0xff] }
 0x24b   :  { %v1428_v59 = vsub.f32 %v1188_v4, %v1348_v6  ;;  %v5930_v6 = vld [vmem:[#allocation95_spill] sm:$0xff] }
 0x24c   :  { %v4670_v42 = vpop.permute.xlu1 %1747  ;;  %2137 = vperm.xlu1 %2501, %v1415_v27   ;;  %v4672_v23 = vpop.permute.xlu0 %1802  ;;  %v1341_v4 = vmul.f32 %v5930_v6, %v5929_v39  ;;  %v1183_v6 = vld [vmem:[%s5504_s2 + $0x180] sm:$0xff] }
 0x24d   :  { %5921 = vst [vmem:[#allocation54_spill] sm:$0xff] %v4670_v42  ;;  %5922 = vst [vmem:[#allocation72_spill] sm:$0xff] %v4672_v23  ;;  %2192 = vperm.xlu0 %2500, %v1426_v40   ;;  %v1350_v42 = vmul.f32 %v5926_v14, %v5925_v51  ;;  %v1419_v40 = vsub.f32 %v1179_v56, %v1339_v9  ;;  %v5931_v51 = vld [vmem:[#allocation13_spill] sm:$0xff]  ;;  %v5932_v14 = vld [vmem:[#allocation96_spill] sm:$0xff] }
 0x24e   :  { %v1192_v9 = vld [vmem:[%s5504_s2 + $0x1c8] sm:$0xff]  ;;  %v5935_v56 = vld [vmem:[#allocation6_spill] sm:$0xff] }
 0x24f   :  { %v1430_v15 = vsub.f32 %v1190_v58, %v1350_v42  ;;  %v5936_v42 = vld [vmem:[#allocation97_spill] sm:$0xff] }
 0x250   :  { %v4684_v27 = vpop.permute.xlu1 %1757  ;;  %2147 = vperm.xlu1 %2501, %v1417_v32   ;;  %v4686_v23 = vpop.permute.xlu0 %1812  ;;  %v1343_v58 = vmul.f32 %v5936_v42, %v5935_v56  ;;  %v1185_v42 = vld [vmem:[%s5504_s2 + $0x190] sm:$0xff] }
 0x251   :  { %5927 = vst [vmem:[#allocation45_spill] sm:$0xff] %v4684_v27  ;;  %5928 = vst [vmem:[#allocation73_spill] sm:$0xff] %v4686_v23  ;;  %2202 = vperm.xlu0 %2500, %v1428_v59   ;;  %v1352_v27 = vmul.f32 %v5932_v14, %v5931_v51  ;;  %v1421_v59 = vsub.f32 %v1181_v47, %v1341_v4  ;;  %v5937_v51 = vld [vmem:[#allocation15_spill] sm:$0xff]  ;;  %v5938_v14 = vld [vmem:[#allocation98_spill] sm:$0xff] }
 0x252   :  { %v1194_v4 = vld [vmem:[%s5504_s2 + $0x1d8] sm:$0xff]  ;;  %v5941_v47 = vld [vmem:[#allocation8_spill] sm:$0xff] }
 0x253   :  { %v1432_v39 = vsub.f32 %v1192_v9, %v1352_v27  ;;  %v5942_v27 = vld [vmem:[#allocation99_spill] sm:$0xff] }
 0x254   :  { %v4698_v32 = vpop.permute.xlu1 %1767  ;;  %2157 = vperm.xlu1 %2501, %v1419_v40   ;;  %v4700_v23 = vpop.permute.xlu0 %1822  ;;  %v1345_v9 = vmul.f32 %v5942_v27, %v5941_v47  ;;  %v1187_v27 = vld [vmem:[%s5504_s2 + $0x1a0] sm:$0xff] }
 0x255   :  { %5933 = vst [vmem:[#allocation56_spill] sm:$0xff] %v4698_v32  ;;  %5934 = vst [vmem:[#allocation74_spill] sm:$0xff] %v4700_v23  ;;  %2212 = vperm.xlu0 %2500, %v1430_v15   ;;  %v1354_v32 = vmul.f32 %v5938_v14, %v5937_v51  ;;  %v1423_v15 = vsub.f32 %v1183_v6, %v1343_v58  ;;  %v5943_v51 = vld [vmem:[#allocation17_spill] sm:$0xff]  ;;  %v5944_v14 = vld [vmem:[#allocation100_spill] sm:$0xff] }
 0x256   :  { %v1196_v58 = vld [vmem:[%s5504_s2 + $0x1e8] sm:$0xff]  ;;  %v5947_v6 = vld [vmem:[#allocation10_spill] sm:$0xff] }
 0x257   :  { %v1434_v56 = vsub.f32 %v1194_v4, %v1354_v32  ;;  %v5948_v32 = vld [vmem:[#allocation101_spill] sm:$0xff] }
 0x258   :  { %v4712_v40 = vpop.permute.xlu1 %1777  ;;  %2167 = vperm.xlu1 %2501, %v1421_v59   ;;  %v4714_v23 = vpop.permute.xlu0 %1832  ;;  %v1347_v4 = vmul.f32 %v5948_v32, %v5947_v6  ;;  %v2662_v6 = vld [vmem:[%s5502_s0 + $0x8] sm:$0xff] }
 0x259   :  { %5939 = vst [vmem:[#allocation47_spill] sm:$0xff] %v4712_v40  ;;  %5940 = vst [vmem:[#allocation75_spill] sm:$0xff] %v4714_v23  ;;  %2222 = vperm.xlu0 %2500, %v1432_v39   ;;  %v1356_v40 = vmul.f32 %v5944_v14, %v5943_v51  ;;  %v1425_v39 = vsub.f32 %v1185_v42, %v1345_v9  ;;  %v5949_v51 = vld [vmem:[#allocation19_spill] sm:$0xff]  ;;  %v5950_v14 = vld [vmem:[#allocation102_spill] sm:$0xff]  ;;  %v1856_v32 = vmul.f32 %v2662_v6, %v4197_v26 }
 0x25a   :  { %v1198_v9 = vld [vmem:[%s5504_s2 + $0x1f8] sm:$0xff]  ;;  %v5953_v42 = vld [vmem:[#allocation12_spill] sm:$0xff]  ;;  %v5956_v26 = vld [vmem:[#allocation14_spill] sm:$0xff] }
 0x25b   :  { %v1436_v47 = vsub.f32 %v1196_v58, %v1356_v40  ;;  %v5954_v40 = vld [vmem:[#allocation103_spill] sm:$0xff] }
 0x25c   :  { %v4726_v59 = vpop.permute.xlu1 %1787  ;;  %2177 = vperm.xlu1 %2501, %v1423_v15   ;;  %v4728_v23 = vpop.permute.xlu0 %1842  ;;  %v1349_v58 = vmul.f32 %v5954_v40, %v5953_v42  ;;  %v1191_v40 = vld [vmem:[%s5504_s2 + $0x1c0] sm:$0xff] }
 0x25d   :  { %5945 = vst [vmem:[#allocation58_spill] sm:$0xff] %v4726_v59  ;;  %5946 = vst [vmem:[#allocation76_spill] sm:$0xff] %v4728_v23  ;;  %2232 = vperm.xlu0 %2500, %v1434_v56   ;;  %v1358_v59 = vmul.f32 %v5950_v14, %v5949_v51  ;;  %v1427_v56 = vsub.f32 %v1187_v27, %v1347_v4  ;;  %v5955_v14 = vld [vmem:[#allocation21_spill] sm:$0xff] }
 0x25f   :  { %v1438_v51 = vsub.f32 %v1198_v9, %v1358_v59  ;;  %v1351_v59 = vmul.f32 %v4190_v20, %v5956_v26  ;;  %v2663_v9 = vld [vmem:[%s5502_s0 + $0x18] sm:$0xff] }
 0x260   :  { %v4740_v15 = vpop.permute.xlu1 %1797  ;;  %2187 = vperm.xlu1 %2501, %v1425_v39   ;;  %v4742_v23 = vpop.permute.xlu0 %1852  ;;  %v1189_v39 = vld [vmem:[%s5504_s2 + $0x1b0] sm:$0xff] }
 0x261   :  { %5951 = vst [vmem:[#allocation49_spill] sm:$0xff] %v4740_v15  ;;  %5952 = vst [vmem:[#allocation77_spill] sm:$0xff] %v4742_v23  ;;  %2242 = vperm.xlu0 %2500, %v1436_v47   ;;  %v1360_v23 = vmul.f32 %v4179_v36, %v5955_v14  ;;  %v1200_v47 = vld [vmem:[%s5504_s2 + $0x208] sm:$0xff]  ;;  %v1429_v42 = vsub.f32 %v1189_v39, %v1349_v58  ;;  %v1858_v36 = vmul.f32 %v2663_v9, %v4229_v33  ;;  %v1202_v33 = vld [vmem:[%s5504_s2 + $0x218] sm:$0xff] }
 0x262   :  { %v5957_v58 = vld [vmem:[#allocation23_spill] sm:$0xff]  ;;  %v1431_v39 = vsub.f32 %v1191_v40, %v1351_v59  ;;  %v5958_v14 = vld [vmem:[#allocation16_spill] sm:$0xff]  ;;  %v5961_v40 = vld [vmem:[#allocation106_spill] sm:$0xff] }
 0x263   :  { %v1362_v6 = vmul.f32 %v4192_v18, %v5957_v58 }
 0x264   :  { %v4758_v15 = vpop.permute.xlu1 %1807  ;;  %2197 = vperm.xlu1 %2501, %v1427_v56   ;;  %v1943_v4 = vpop.permute.xlu0 %1942  ;;  %v1440_v56 = vsub.f32 %v1200_v47, %v1360_v23  ;;  %v1353_v23 = vmul.f32 %v4205_v16, %v5958_v14 }
 0x265   :  { %v2336_v27 = vadd.f32 %v1943_v4, %v1856_v32  ;;  %2252 = vperm.xlu0 %2500, %v1438_v51   ;;  %v2664_v4 = vld [vmem:[%s5502_s0 + $0x28] sm:$0xff]  ;;  %v1442_v47 = vsub.f32 %v1202_v33, %v1362_v6  ;;  %v2665_v6 = vld [vmem:[%s5502_s0 + $0x38] sm:$0xff]  ;;  %v1195_v33 = vld [vmem:[%s5504_s2 + $0x1e0] sm:$0xff] }
 0x266   :  { %v1860_v18 = vmul.f32 %v2664_v4, %v4263_v10  ;;  %v1204_v10 = vld [vmem:[%s5504_s2 + $0x228] sm:$0xff] }
 0x267   :  { %2416 = vst.msk [vmem:[%s5505_s3 + $0x8] sm:$0xff] %vm94_vm0, %v2336_v27  ;;  %v1193_v27 = vld [vmem:[%s5504_s2 + $0x1d0] sm:$0xff] }
 0x268   :  { %v4778_v20 = vpop.permute.xlu1 %1817  ;;  %2207 = vperm.xlu1 %2501, %v1429_v42   ;;  %v1953_v32 = vpop.permute.xlu0 %1952  ;;  %v5959_v42 = vld [vmem:[#allocation25_spill] sm:$0xff] }
 0x269   :  { %v2338_v51 = vadd.f32 %v1953_v32, %v1858_v36  ;;  %2262 = vperm.xlu0 %2500, %v1440_v56   ;;  %v1364_v26 = vmul.f32 %v4207_v44, %v5959_v42  ;;  %v1433_v36 = vsub.f32 %v1193_v27, %v1353_v23  ;;  %v5960_v56 = vld [vmem:[#allocation18_spill] sm:$0xff]  ;;  %v1862_v44 = vmul.f32 %v2665_v6, %v4297_v29  ;;  %v1206_v29 = vld [vmem:[%s5504_s2 + $0x238] sm:$0xff]  ;;  %v5964_v27 = vld [vmem:[#allocation108_spill] sm:$0xff] }
 0x26a   :  { %v1355_v58 = vmul.f32 %v5961_v40, %v5960_v56  ;;  %v5967_v56 = vld [vmem:[#allocation109_spill] sm:$0xff] }
 0x26b   :  { %2418 = vst.msk [vmem:[%s5505_s3 + $0x18] sm:$0xff] %vm94_vm0, %v2338_v51  ;;  %v1444_v32 = vsub.f32 %v1204_v10, %v1364_v26  ;;  %v5962_v51 = vld [vmem:[#allocation27_spill] sm:$0xff] }
 0x26c   :  { %v4798_v16 = vpop.permute.xlu1 %1827  ;;  %2217 = vperm.xlu1 %2501, %v1431_v39   ;;  %v1963_v59 = vpop.permute.xlu0 %1962  ;;  %v1366_v39 = vmul.f32 %v4224_v8, %v5962_v51  ;;  %v2666_v26 = vld [vmem:[%s5502_s0 + $0x48] sm:$0xff]  ;;  %v5968_v51 = vld [vmem:[#allocation22_spill] sm:$0xff] }
 0x26d   :  { %v2340_v9 = vadd.f32 %v1963_v59, %v1860_v18  ;;  %2272 = vperm.xlu0 %2500, %v1442_v47   ;;  %v1435_v18 = vsub.f32 %v1195_v33, %v1355_v58  ;;  %v5963_v47 = vld [vmem:[#allocation20_spill] sm:$0xff]  ;;  %v5965_v59 = vld [vmem:[#allocation107_spill] sm:$0xff] }
 0x26e   :  { %v1357_v42 = vmul.f32 %v5964_v27, %v5963_v47  ;;  %v1864_v8 = vmul.f32 %v2666_v26, %v5965_v59  ;;  %v1446_v10 = vsub.f32 %v1206_v29, %v1366_v39  ;;  %v5969_v39 = vld [vmem:[#allocation112_spill] sm:$0xff]  ;;  %v2667_v29 = vld [vmem:[%s5502_s0] sm:$0xff]  ;;  %v5971_v27 = vld [vmem:[#allocation111_spill] sm:$0xff] }
 0x26f   :  { %2420 = vst.msk [vmem:[%s5505_s3 + $0x28] sm:$0xff] %vm94_vm0, %v2340_v9  ;;  %v1197_v9 = vld [vmem:[%s5504_s2 + $0x1f0] sm:$0xff]  ;;  %v1199_v59 = vld [vmem:[%s5504_s2 + $0x200] sm:$0xff] }
 0x270   :  { %v4818_v14 = vpop.permute.xlu1 %1837  ;;  %2227 = vperm.xlu1 %2501, %v1433_v36   ;;  %v1973_v23 = vpop.permute.xlu0 %1972  ;;  %v5966_v36 = vld [vmem:[#allocation29_spill] sm:$0xff]  ;;  %v1437_v33 = vsub.f32 %v1197_v9, %v1357_v42 }
 0x271   :  { %v2342_v4 = vadd.f32 %v1973_v23, %v1862_v44  ;;  %2282 = vperm.xlu0 %2500, %v1444_v32   ;;  %v1368_v40 = vmul.f32 %v5967_v56, %v5966_v36  ;;  %v1208_v44 = vld [vmem:[%s5504_s2 + $0x248] sm:$0xff]  ;;  %v1359_v23 = vmul.f32 %v5969_v39, %v5968_v51  ;;  %v1210_v56 = vld [vmem:[%s5504_s2 + $0x258] sm:$0xff] }
 0x273   :  { %2422 = vst.msk [vmem:[%s5505_s3 + $0x38] sm:$0xff] %vm94_vm0, %v2342_v4  ;;  %v5970_v4 = vld [vmem:[#allocation105_spill] sm:$0xff]  ;;  %v1448_v42 = vsub.f32 %v1208_v44, %v1368_v40  ;;  %v1439_v39 = vsub.f32 %v1199_v59, %v1359_v23  ;;  %v5974_v40 = vld [vmem:[#allocation114_spill] sm:$0xff] }
 0x274   :  { %2237 = vperm.xlu1 %2501, %v1435_v18   ;;  %v4838_v58 = vpop.permute.xlu1 %1847  ;;  %v1983_v6 = vpop.permute.xlu0 %1982  ;;  %v1855_v47 = vmul.f32 %v2667_v29, %v5970_v4  ;;  %v2668_v18 = vld [vmem:[%s5502_s0 + $0x58] sm:$0xff]  ;;  %v2669_v29 = vld [vmem:[%s5502_s0 + $0x10] sm:$0xff] }
 0x275   :  { %v2344_v32 = vadd.f32 %v1983_v6, %v1864_v8  ;;  %2292 = vperm.xlu0 %2500, %v1446_v10   ;;  %v1866_v26 = vmul.f32 %v2668_v18, %v5971_v27  ;;  %v5972_v8 = vld [vmem:[#allocation31_spill] sm:$0xff]  ;;  %v5975_v4 = vld [vmem:[#allocation104_spill] sm:$0xff]  ;;  %v5976_v18 = vld [vmem:[#allocation113_spill] sm:$0xff] }
 0x276   :  { %v1370_v10 = vmul.f32 %v4258_v45, %v5972_v8  ;;  %v1857_v45 = vmul.f32 %v2669_v29, %v5975_v4  ;;  %v5980_v29 = vld [vmem:[#allocation116_spill] sm:$0xff] }
 0x277   :  { %2424 = vst.msk [vmem:[%s5505_s3 + $0x48] sm:$0xff] %vm94_vm0, %v2344_v32  ;;  %v5973_v32 = vld [vmem:[#allocation24_spill] sm:$0xff] }
 0x278   :  { %2247 = vperm.xlu1 %2501, %v1437_v33   ;;  %v1938_v9 = vpop.permute.xlu1 %1937  ;;  %v1993_v36 = vpop.permute.xlu0 %1992  ;;  %v1361_v44 = vmul.f32 %v5974_v40, %v5973_v32  ;;  %v2670_v33 = vld [vmem:[%s5502_s0 + $0x68] sm:$0xff]  ;;  %v1450_v23 = vsub.f32 %v1210_v56, %v1370_v10  ;;  %v2671_v56 = vld [vmem:[%s5502_s0 + $0x20] sm:$0xff] }
 0x279   :  { %v2335_v6 = vadd.f32 %v1938_v9, %v1855_v47  ;;  %v2346_v51 = vadd.f32 %v1993_v36, %v1866_v26  ;;  %2302 = vperm.xlu0 %2500, %v1448_v42   ;;  %v1868_v27 = vmul.f32 %v2670_v33, %v5976_v18  ;;  %v1201_v47 = vld [vmem:[%s5504_s2 + $0x210] sm:$0xff]  ;;  %v5977_v26 = vld [vmem:[#allocation33_spill] sm:$0xff]  ;;  %v1212_v9 = vld [vmem:[%s5504_s2 + $0x268] sm:$0xff] }
 0x27a   :  { %v1372_v42 = vmul.f32 %v4274_v0, %v5977_v26  ;;  %v1441_v32 = vsub.f32 %v1201_v47, %v1361_v44  ;;  %v5979_v40 = vld [vmem:[#allocation110_spill] sm:$0xff] }
 0x27b   :  { %2415 = vst.msk [vmem:[%s5505_s3] sm:$0xff] %vm94_vm0, %v2335_v6  ;;  %2426 = vst.msk [vmem:[%s5505_s3 + $0x58] sm:$0xff] %vm94_vm0, %v2346_v51  ;;  %v5978_v51 = vld [vmem:[#allocation26_spill] sm:$0xff]  ;;  %v1859_v0 = vmul.f32 %v2671_v56, %v5979_v40 }
 0x27c   :  { %2257 = vperm.xlu1 %2501, %v1439_v39   ;;  %v1948_v59 = vpop.permute.xlu1 %1947  ;;  %v2003_v8 = vpop.permute.xlu0 %2002  ;;  %v1363_v10 = vmul.f32 %v4288_v21, %v5978_v51  ;;  %v2672_v39 = vld [vmem:[%s5502_s0 + $0x78] sm:$0xff]  ;;  %v1452_v21 = vsub.f32 %v1212_v9, %v1372_v42  ;;  %v1203_v44 = vld [vmem:[%s5504_s2 + $0x220] sm:$0xff]  ;;  %v2673_v9 = vld [vmem:[%s5502_s0 + $0x30] sm:$0xff] }
 0x27d   :  { %v2337_v36 = vadd.f32 %v1948_v59, %v1857_v45  ;;  %v2348_v6 = vadd.f32 %v2003_v8, %v1868_v27  ;;  %2312 = vperm.xlu0 %2500, %v1450_v23   ;;  %v1870_v4 = vmul.f32 %v2672_v39, %v5980_v29  ;;  %v5981_v45 = vld [vmem:[#allocation36_spill] sm:$0xff]  ;;  %v1214_v23 = vld [vmem:[%s5504_s2 + $0x278] sm:$0xff]  ;;  %v5984_v39 = vld [vmem:[#allocation30_spill] sm:$0xff] }
 0x27e   :  { %v1374_v33 = vmul.f32 %v4290_v17, %v5981_v45  ;;  %v1443_v59 = vsub.f32 %v1203_v44, %v1363_v10  ;;  %v5982_v8 = vld [vmem:[#allocation28_spill] sm:$0xff]  ;;  %v1367_v29 = vmul.f32 %v4321_v28, %v5984_v39  ;;  %v2676_v44 = vld [vmem:[%s5502_s0 + $0x98] sm:$0xff]  ;;  %v5985_v45 = vld [vmem:[#allocation35_spill] sm:$0xff] }
 0x27f   :  { %2417 = vst.msk [vmem:[%s5505_s3 + $0x10] sm:$0xff] %vm94_vm0, %v2337_v36  ;;  %2428 = vst.msk [vmem:[%s5505_s3 + $0x68] sm:$0xff] %vm94_vm0, %v2348_v6  ;;  %v1365_v42 = vmul.f32 %v4306_v52, %v5982_v8  ;;  %v5983_v36 = vld [vmem:[#allocation115_spill] sm:$0xff]  ;;  %v1205_v51 = vld [vmem:[%s5504_s2 + $0x230] sm:$0xff] }
 0x280   :  { %2267 = vperm.xlu1 %2501, %v1441_v32   ;;  %v1958_v18 = vpop.permute.xlu1 %1957  ;;  %v2013_v27 = vpop.permute.xlu0 %2012  ;;  %v1861_v17 = vmul.f32 %v2673_v9, %v5983_v36  ;;  %v2674_v6 = vld [vmem:[%s5502_s0 + $0x88] sm:$0xff]  ;;  %v1454_v52 = vsub.f32 %v1214_v23, %v1374_v33  ;;  %v1874_v33 = vmul.f32 %v2676_v44, %v5985_v45  ;;  %v2677_v8 = vld [vmem:[%s5502_s0 + $0x50] sm:$0xff]  ;;  %v5987_v36 = vld [vmem:[#allocation117_spill] sm:$0xff] }
 0x281   :  { %v2339_v47 = vadd.f32 %v1958_v18, %v1859_v0  ;;  %v2350_v26 = vadd.f32 %v2013_v27, %v1870_v4  ;;  %2322 = vperm.xlu0 %2500, %v1452_v21   ;;  %v1872_v32 = vmul.f32 %v2674_v6, %v4300_v35  ;;  %v1445_v0 = vsub.f32 %v1205_v51, %v1365_v42  ;;  %v2675_v4 = vld [vmem:[%s5502_s0 + $0x40] sm:$0xff]  ;;  %v2678_v9 = vld [vmem:[%s5502_s0 + $0xa8] sm:$0xff] }
 0x282   :  { %v1863_v21 = vmul.f32 %v2675_v4, %v4313_v1  ;;  %v1207_v1 = vld [vmem:[%s5504_s2 + $0x240] sm:$0xff]  ;;  %v1865_v42 = vmul.f32 %v2677_v8, %v4328_v41  ;;  %v1209_v41 = vld [vmem:[%s5504_s2 + $0x250] sm:$0xff] }
 0x283   :  { %2419 = vst.msk [vmem:[%s5505_s3 + $0x20] sm:$0xff] %vm94_vm0, %v2339_v47  ;;  %2430 = vst.msk [vmem:[%s5505_s3 + $0x78] sm:$0xff] %vm94_vm0, %v2350_v26  ;;  %v1447_v47 = vsub.f32 %v1207_v1, %v1367_v29  ;;  %v5986_v26 = vld [vmem:[#allocation32_spill] sm:$0xff]  ;;  %v5989_v39 = vld [vmem:[#allocation118_spill] sm:$0xff] }
 0x284   :  { %2277 = vperm.xlu1 %2501, %v1443_v59   ;;  %v1968_v10 = vpop.permute.xlu1 %1967  ;;  %v2023_v56 = vpop.permute.xlu0 %2022  ;;  %v1369_v59 = vmul.f32 %v4336_v49, %v5986_v26 }
 0x285   :  { %v2341_v40 = vadd.f32 %v1968_v10, %v1861_v17  ;;  %v2352_v35 = vadd.f32 %v2023_v56, %v1872_v32  ;;  %2332 = vperm.xlu0 %2500, %v1454_v52   ;;  %v1876_v17 = vmul.f32 %v2678_v9, %v5987_v36  ;;  %v5988_v10 = vld [vmem:[#allocation34_spill] sm:$0xff] }
 0x286   :  { %v1449_v51 = vsub.f32 %v1209_v41, %v1369_v59  ;;  %v1371_v56 = vmul.f32 %v4351_v24, %v5988_v10  ;;  %v2685_v10 = vld [vmem:[%s5502_s0 + $0x90] sm:$0xff] }
 0x287   :  { %2421 = vst.msk [vmem:[%s5505_s3 + $0x30] sm:$0xff] %vm94_vm0, %v2341_v40  ;;  %2432 = vst.msk [vmem:[%s5505_s3 + $0x88] sm:$0xff] %vm94_vm0, %v2352_v35  ;;  %v2679_v40 = vld [vmem:[%s5502_s0 + $0x60] sm:$0xff] }
 0x288   :  { %2287 = vperm.xlu1 %2501, %v1445_v0   ;;  %v1978_v28 = vpop.permute.xlu1 %1977  ;;  %v2033_v18 = vpop.permute.xlu0 %2032  ;;  %v1867_v35 = vmul.f32 %v2679_v40, %v4343_v34  ;;  %v2680_v0 = vld [vmem:[%s5502_s0 + $0xb8] sm:$0xff]  ;;  %v1211_v34 = vld [vmem:[%s5504_s2 + $0x260] sm:$0xff] }
 0x289   :  { %v2343_v27 = vadd.f32 %v1978_v28, %v1863_v21  ;;  %v2354_v23 = vadd.f32 %v2033_v18, %v1874_v33  ;;  %v1878_v29 = vmul.f32 %v2680_v0, %v5989_v39  ;;  %v1451_v45 = vsub.f32 %v1211_v34, %v1371_v56  ;;  %v5990_v33 = vld [vmem:[#allocation37_spill] sm:$0xff]  ;;  %v2681_v28 = vld [vmem:[%s5502_s0 + $0x70] sm:$0xff]  ;;  %v5991_v18 = vld [vmem:[#allocation119_spill] sm:$0xff] }
 0x28a   :  { %v1373_v1 = vmul.f32 %v4366_v50, %v5990_v33  ;;  %v1213_v50 = vld [vmem:[%s5504_s2 + $0x270] sm:$0xff]  ;;  %v2686_v56 = vld [vmem:[%s5502_s0 + $0xe8] sm:$0xff]  ;;  %v2688_v34 = vld [vmem:[%s5502_s0 + $0xf8] sm:$0xff] }
 0x28b   :  { %2423 = vst.msk [vmem:[%s5505_s3 + $0x40] sm:$0xff] %vm94_vm0, %v2343_v27  ;;  %2434 = vst.msk [vmem:[%s5505_s3 + $0x98] sm:$0xff] %vm94_vm0, %v2354_v23  ;;  %v1869_v27 = vmul.f32 %v2681_v28, %v5991_v18  ;;  %v2682_v23 = vld [vmem:[%s5502_s0 + $0xc8] sm:$0xff]  ;;  %v1884_v40 = vmul.f32 %v2686_v56, %v4392_v19 }
 0x28c   :  { %2297 = vperm.xlu1 %2501, %v1447_v47   ;;  %v1988_v49 = vpop.permute.xlu1 %1987  ;;  %v2043_v6 = vpop.permute.xlu0 %2042  ;;  %v5992_v47 = vld [vmem:[#allocation120_spill] sm:$0xff]  ;;  %v1453_v36 = vsub.f32 %v1213_v50, %v1373_v1  ;;  %v2690_v33 = vld [vmem:[%s5502_s0 + $0x108] sm:$0xff] }
 0x28d   :  { %v2345_v32 = vadd.f32 %v1988_v49, %v1865_v42  ;;  %v2356_v52 = vadd.f32 %v2043_v6, %v1876_v17  ;;  %v1880_v26 = vmul.f32 %v2682_v23, %v5992_v47  ;;  %v2683_v17 = vld [vmem:[%s5502_s0 + $0x80] sm:$0xff]  ;;  %v2684_v49 = vld [vmem:[%s5502_s0 + $0xd8] sm:$0xff]  ;;  %v1888_v1 = vmul.f32 %v2690_v33, %v4420_v55  ;;  %v2698_v56 = vld [vmem:[%s5502_s0 + $0x148] sm:$0xff] }
 0x28e   :  { %v1871_v41 = vmul.f32 %v2683_v17, %v4375_v48  ;;  %v1882_v6 = vmul.f32 %v2684_v49, %v4378_v46  ;;  %v1873_v46 = vmul.f32 %v2685_v10, %v4390_v54  ;;  %v2691_v23 = vld [vmem:[%s5502_s0 + $0xc0] sm:$0xff]  ;;  %v2692_v47 = vld [vmem:[%s5502_s0 + $0x118] sm:$0xff] }
 0x28f   :  { %2425 = vst.msk [vmem:[%s5505_s3 + $0x50] sm:$0xff] %vm94_vm0, %v2345_v32  ;;  %2436 = vst.msk [vmem:[%s5505_s3 + $0xa8] sm:$0xff] %vm94_vm0, %v2356_v52  ;;  %v1879_v55 = vmul.f32 %v2691_v23, %v4432_v37 }
 0x290   :  { %2307 = vperm.xlu1 %2501, %v1449_v51   ;;  %v1998_v24 = vpop.permute.xlu1 %1997  ;;  %v2053_v4 = vpop.permute.xlu0 %2052 }
 0x291   :  { %v2347_v21 = vadd.f32 %v1998_v24, %v1867_v35  ;;  %v2358_v44 = vadd.f32 %v2053_v4, %v1878_v29  ;;  %v2687_v29 = vld [vmem:[%s5502_s0 + $0xa0] sm:$0xff]  ;;  %v1886_v24 = vmul.f32 %v2688_v34, %v4406_v31 }
 0x292   :  { %v1875_v19 = vmul.f32 %v2687_v29, %v4404_v3  ;;  %v2700_v29 = vld [vmem:[%s5502_s0 + $0x158] sm:$0xff] }
 0x293   :  { %2427 = vst.msk [vmem:[%s5505_s3 + $0x60] sm:$0xff] %vm94_vm0, %v2347_v21  ;;  %2438 = vst.msk [vmem:[%s5505_s3 + $0xb8] sm:$0xff] %vm94_vm0, %v2358_v44 }
 0x294   :  { %2317 = vperm.xlu1 %2501, %v1451_v45   ;;  %v2008_v59 = vpop.permute.xlu1 %2007  ;;  %v2063_v8 = vpop.permute.xlu0 %2062  ;;  %v2689_v45 = vld [vmem:[%s5502_s0 + $0xb0] sm:$0xff] }
 0x295   :  { %v2349_v42 = vadd.f32 %v2008_v59, %v1869_v27  ;;  %v2360_v9 = vadd.f32 %v2063_v8, %v1880_v26  ;;  %v1877_v31 = vmul.f32 %v2689_v45, %v4418_v13  ;;  %v1890_v26 = vmul.f32 %v2692_v47, %v4434_v53  ;;  %v2706_v47 = vld [vmem:[%s5502_s0 + $0x188] sm:$0xff] }
 0x297   :  { %2429 = vst.msk [vmem:[%s5505_s3 + $0x70] sm:$0xff] %vm94_vm0, %v2349_v42  ;;  %2440 = vst.msk [vmem:[%s5505_s3 + $0xc8] sm:$0xff] %vm94_vm0, %v2360_v9  ;;  %v2693_v42 = vld [vmem:[%s5502_s0 + $0xd0] sm:$0xff]  ;;  %v2694_v9 = vld [vmem:[%s5502_s0 + $0x128] sm:$0xff] }
 0x298   :  { %v2018_v32 = vpop.permute.xlu1 %2017  ;;  %2327 = vperm.xlu1 %2501, %v1453_v36   ;;  %v2073_v52 = vpop.permute.xlu0 %2072  ;;  %v1881_v53 = vmul.f32 %v2693_v42, %v4446_v60  ;;  %v1892_v36 = vmul.f32 %v2694_v9, %v4448_v30  ;;  %v2708_v42 = vld [vmem:[%s5502_s0 + $0x198] sm:$0xff] }
 0x299   :  { %v2351_v48 = vadd.f32 %v2018_v32, %v1871_v41  ;;  %v2362_v51 = vadd.f32 %v2073_v52, %v1882_v6  ;;  %v2695_v6 = vld [vmem:[%s5502_s0 + $0xe0] sm:$0xff]  ;;  %v2696_v32 = vld [vmem:[%s5502_s0 + $0x138] sm:$0xff] }
 0x29a   :  { %v1883_v30 = vmul.f32 %v2695_v6, %v4460_v11  ;;  %v1894_v52 = vmul.f32 %v2696_v32, %v4462_v5  ;;  %v5995_v32 = vld [vmem:[#allocation40_spill] sm:$0xff] }
 0x29b   :  { %2431 = vst.msk [vmem:[%s5505_s3 + $0x80] sm:$0xff] %vm94_vm0, %v2351_v48  ;;  %2442 = vst.msk [vmem:[%s5505_s3 + $0xd8] sm:$0xff] %vm94_vm0, %v2362_v51 }
 0x29c   :  { %v2028_v35 = vpop.permute.xlu1 %2027  ;;  %v2083_v0 = vpop.permute.xlu0 %2082 }
 0x29d   :  { %v2353_v39 = vadd.f32 %v2028_v35, %v1873_v46  ;;  %v2364_v54 = vadd.f32 %v2083_v0, %v1884_v40  ;;  %v2697_v46 = vld [vmem:[%s5502_s0 + $0xf0] sm:$0xff]  ;;  %v1896_v40 = vmul.f32 %v2698_v56, %v4476_v22 }
 0x29e   :  { %v1885_v5 = vmul.f32 %v2697_v46, %v4474_v63  ;;  %v2711_v46 = vld [vmem:[%s5502_s0 + $0x160] sm:$0xff] }
 0x29f   :  { %2433 = vst.msk [vmem:[%s5505_s3 + $0x90] sm:$0xff] %vm94_vm0, %v2353_v39  ;;  %2444 = vst.msk [vmem:[%s5505_s3 + $0xe8] sm:$0xff] %vm94_vm0, %v2364_v54  ;;  %v2699_v54 = vld [vmem:[%s5502_s0 + $0x100] sm:$0xff] }
 0x2a0   :  { %v2038_v4 = vpop.permute.xlu1 %2037  ;;  %v2093_v21 = vpop.permute.xlu0 %2092  ;;  %v1887_v22 = vmul.f32 %v2699_v54, %v4488_v2 }
 0x2a1   :  { %v2355_v44 = vadd.f32 %v2038_v4, %v1875_v19  ;;  %v2366_v3 = vadd.f32 %v2093_v21, %v1886_v24  ;;  %v1898_v19 = vmul.f32 %v2700_v29, %v4490_v38  ;;  %v2701_v21 = vld [vmem:[%s5502_s0 + $0x110] sm:$0xff] }
 0x2a2   :  { %v1889_v38 = vmul.f32 %v2701_v21, %v4502_v12  ;;  %v2713_v29 = vld [vmem:[%s5502_s0 + $0x170] sm:$0xff] }
 0x2a3   :  { %2435 = vst.msk [vmem:[%s5505_s3 + $0xa0] sm:$0xff] %vm94_vm0, %v2355_v44  ;;  %2446 = vst.msk [vmem:[%s5505_s3 + $0xf8] sm:$0xff] %vm94_vm0, %v2366_v3  ;;  %v2702_v44 = vld [vmem:[%s5502_s0 + $0x168] sm:$0xff] }
 0x2a4   :  { %v2048_v28 = vpop.permute.xlu1 %2047  ;;  %v2103_v18 = vpop.permute.xlu0 %2102  ;;  %v1900_v3 = vmul.f32 %v2702_v44, %v4504_v57 }
 0x2a5   :  { %v2357_v27 = vadd.f32 %v2048_v28, %v1877_v31  ;;  %v2368_v13 = vadd.f32 %v2103_v18, %v1888_v1  ;;  %v2703_v1 = vld [vmem:[%s5502_s0 + $0x120] sm:$0xff]  ;;  %v2704_v28 = vld [vmem:[%s5502_s0 + $0x178] sm:$0xff] }
 0x2a6   :  { %v1891_v57 = vmul.f32 %v2703_v1, %v4516_v61  ;;  %v1902_v18 = vmul.f32 %v2704_v28, %v4518_v62  ;;  %v6001_v1 = vld [vmem:[#allocation67_spill] sm:$0xff] }
 0x2a7   :  { %2437 = vst.msk [vmem:[%s5505_s3 + $0xb0] sm:$0xff] %vm94_vm0, %v2357_v27  ;;  %2448 = vst.msk [vmem:[%s5505_s3 + $0x108] sm:$0xff] %vm94_vm0, %v2368_v13 }
 0x2a8   :  { %v2058_v50 = vpop.permute.xlu1 %2057  ;;  %v2113_v59 = vpop.permute.xlu0 %2112 }
 0x2a9   :  { %v2359_v8 = vadd.f32 %v2058_v50, %v1879_v55  ;;  %v2370_v37 = vadd.f32 %v2113_v59, %v1890_v26  ;;  %v2705_v55 = vld [vmem:[%s5502_s0 + $0x130] sm:$0xff]  ;;  %v1904_v26 = vmul.f32 %v2706_v47, %v4532_v7 }
 0x2aa   :  { %v1893_v62 = vmul.f32 %v2705_v55, %v4530_v43  ;;  %v6003_v47 = vld [vmem:[#allocation68_spill] sm:$0xff] }
 0x2ab   :  { %2439 = vst.msk [vmem:[%s5505_s3 + $0xc0] sm:$0xff] %vm94_vm0, %v2359_v8  ;;  %2450 = vst.msk [vmem:[%s5505_s3 + $0x118] sm:$0xff] %vm94_vm0, %v2370_v37  ;;  %v2707_v37 = vld [vmem:[%s5502_s0 + $0x140] sm:$0xff] }
 0x2ac   :  { %v2068_v17 = vpop.permute.xlu1 %2067  ;;  %v2123_v41 = vpop.permute.xlu0 %2122  ;;  %v1895_v7 = vmul.f32 %v2707_v37, %v4544_v25  ;;  %v2719_v37 = vld [vmem:[%s5502_s0 + $0x1a0] sm:$0xff] }
 0x2ad   :  { %v2361_v49 = vadd.f32 %v2068_v17, %v1881_v53  ;;  %v2372_v60 = vadd.f32 %v2123_v41, %v1892_v36  ;;  %v5993_v53 = vld [vmem:[#allocation38_spill] sm:$0xff] }
 0x2ae   :  { %v1906_v9 = vmul.f32 %v2708_v42, %v5993_v53  ;;  %v2720_v53 = vld [vmem:[%s5502_s0 + $0x1f8] sm:$0xff] }
 0x2af   :  { %2441 = vst.msk [vmem:[%s5505_s3 + $0xd0] sm:$0xff] %vm94_vm0, %v2361_v49  ;;  %2452 = vst.msk [vmem:[%s5505_s3 + $0x128] sm:$0xff] %vm94_vm0, %v2372_v60  ;;  %v2709_v49 = vld [vmem:[%s5502_s0 + $0x150] sm:$0xff]  ;;  %v5994_v60 = vld [vmem:[#allocation46_spill] sm:$0xff] }
 0x2b0   :  { %v2078_v48 = vpop.permute.xlu1 %2077  ;;  %v2133_v51 = vpop.permute.xlu0 %2132  ;;  %v1897_v6 = vmul.f32 %v2709_v49, %v5994_v60  ;;  %v2721_v60 = vld [vmem:[%s5502_s0 + $0x1b0] sm:$0xff] }
 0x2b1   :  { %v2363_v10 = vadd.f32 %v2078_v48, %v1883_v30  ;;  %v2374_v11 = vadd.f32 %v2133_v51, %v1894_v52  ;;  %v2710_v30 = vld [vmem:[%s5502_s0 + $0x1a8] sm:$0xff] }
 0x2b2   :  { %v1908_v52 = vmul.f32 %v2710_v30, %v5995_v32  ;;  %v2722_v32 = vld [vmem:[%s5502_s0 + $0x208] sm:$0xff] }
 0x2b3   :  { %2443 = vst.msk [vmem:[%s5505_s3 + $0xe0] sm:$0xff] %vm94_vm0, %v2363_v10  ;;  %2454 = vst.msk [vmem:[%s5505_s3 + $0x138] sm:$0xff] %vm94_vm0, %v2374_v11 }
 0x2b4   :  { %v2088_v35 = vpop.permute.xlu1 %2087  ;;  %v2143_v0 = vpop.permute.xlu0 %2142 }
 0x2b5   :  { %v2365_v39 = vadd.f32 %v2088_v35, %v1885_v5  ;;  %v2376_v63 = vadd.f32 %v2143_v0, %v1896_v40  ;;  %v5996_v5 = vld [vmem:[#allocation41_spill] sm:$0xff]  ;;  %v5997_v35 = vld [vmem:[#allocation39_spill] sm:$0xff] }
 0x2b6   :  { %v1899_v56 = vmul.f32 %v2711_v46, %v5996_v5  ;;  %v2712_v40 = vld [vmem:[%s5502_s0 + $0x1b8] sm:$0xff]  ;;  %v2723_v5 = vld [vmem:[%s5502_s0 + $0x1c0] sm:$0xff] }
 0x2b7   :  { %2445 = vst.msk [vmem:[%s5505_s3 + $0xf0] sm:$0xff] %vm94_vm0, %v2365_v39  ;;  %2456 = vst.msk [vmem:[%s5505_s3 + $0x148] sm:$0xff] %vm94_vm0, %v2376_v63  ;;  %v1910_v0 = vmul.f32 %v2712_v40, %v5997_v35  ;;  %v2724_v35 = vld [vmem:[%s5502_s0 + $0x218] sm:$0xff] }
 0x2b8   :  { %v2098_v34 = vpop.permute.xlu1 %2097  ;;  %v2153_v24 = vpop.permute.xlu0 %2152 }
 0x2b9   :  { %v2367_v4 = vadd.f32 %v2098_v34, %v1887_v22  ;;  %v2378_v2 = vadd.f32 %v2153_v24, %v1898_v19  ;;  %v5998_v19 = vld [vmem:[#allocation48_spill] sm:$0xff]  ;;  %v2714_v24 = vld [vmem:[%s5502_s0 + $0x1c8] sm:$0xff] }
 0x2ba   :  { %v1901_v34 = vmul.f32 %v2713_v29, %v5998_v19  ;;  %v2725_v19 = vld [vmem:[%s5502_s0 + $0x1d0] sm:$0xff] }
 0x2bb   :  { %2447 = vst.msk [vmem:[%s5505_s3 + $0x100] sm:$0xff] %vm94_vm0, %v2367_v4  ;;  %2458 = vst.msk [vmem:[%s5505_s3 + $0x158] sm:$0xff] %vm94_vm0, %v2378_v2  ;;  %v5999_v4 = vld [vmem:[#allocation66_spill] sm:$0xff] }
 0x2bc   :  { %v2108_v45 = vpop.permute.xlu1 %2107  ;;  %v2163_v31 = vpop.permute.xlu0 %2162  ;;  %v1912_v2 = vmul.f32 %v2714_v24, %v5999_v4  ;;  %v2726_v4 = vld [vmem:[%s5502_s0 + $0x228] sm:$0xff] }
 0x2bd   :  { %v2369_v33 = vadd.f32 %v2108_v45, %v1889_v38  ;;  %v2380_v12 = vadd.f32 %v2163_v31, %v1900_v3  ;;  %v2715_v45 = vld [vmem:[%s5502_s0 + $0x180] sm:$0xff] }
 0x2be   :  { %v6000_v31 = vld [vmem:[#allocation42_spill] sm:$0xff] }
 0x2bf   :  { %2449 = vst.msk [vmem:[%s5505_s3 + $0x110] sm:$0xff] %vm94_vm0, %v2369_v33  ;;  %2460 = vst.msk [vmem:[%s5505_s3 + $0x168] sm:$0xff] %vm94_vm0, %v2380_v12  ;;  %v1903_v33 = vmul.f32 %v2715_v45, %v6000_v31  ;;  %v2716_v12 = vld [vmem:[%s5502_s0 + $0x1d8] sm:$0xff]  ;;  %v2727_v31 = vld [vmem:[%s5502_s0 + $0x1e0] sm:$0xff] }
 0x2c0   :  { %v2118_v27 = vpop.permute.xlu1 %2117  ;;  %v2173_v13 = vpop.permute.xlu0 %2172 }
 0x2c1   :  { %v2371_v23 = vadd.f32 %v2118_v27, %v1891_v57  ;;  %v2382_v61 = vadd.f32 %v2173_v13, %v1902_v18  ;;  %v1914_v57 = vmul.f32 %v2716_v12, %v6001_v1  ;;  %v2728_v1 = vld [vmem:[%s5502_s0 + $0x238] sm:$0xff] }
 0x2c3   :  { %2451 = vst.msk [vmem:[%s5505_s3 + $0x120] sm:$0xff] %vm94_vm0, %v2371_v23  ;;  %2462 = vst.msk [vmem:[%s5505_s3 + $0x178] sm:$0xff] %vm94_vm0, %v2382_v61  ;;  %v2717_v23 = vld [vmem:[%s5502_s0 + $0x190] sm:$0xff]  ;;  %v6002_v61 = vld [vmem:[#allocation50_spill] sm:$0xff] }
 0x2c4   :  { %v2128_v50 = vpop.permute.xlu1 %2127  ;;  %v2183_v59 = vpop.permute.xlu0 %2182  ;;  %v1905_v55 = vmul.f32 %v2717_v23, %v6002_v61  ;;  %v2729_v61 = vld [vmem:[%s5502_s0 + $0x1f0] sm:$0xff] }
 0x2c5   :  { %v2373_v8 = vadd.f32 %v2128_v50, %v1893_v62  ;;  %v2384_v43 = vadd.f32 %v2183_v59, %v1904_v26  ;;  %v2718_v62 = vld [vmem:[%s5502_s0 + $0x1e8] sm:$0xff] }
 0x2c6   :  { %v1916_v26 = vmul.f32 %v2718_v62, %v6003_v47  ;;  %v2730_v47 = vld [vmem:[%s5502_s0 + $0x248] sm:$0xff] }
 0x2c7   :  { %2453 = vst.msk [vmem:[%s5505_s3 + $0x130] sm:$0xff] %vm94_vm0, %v2373_v8  ;;  %2464 = vst.msk [vmem:[%s5505_s3 + $0x188] sm:$0xff] %vm94_vm0, %v2384_v43 }
 0x2c8   :  { %v2138_v36 = vpop.permute.xlu1 %2137  ;;  %v2193_v17 = vpop.permute.xlu0 %2192 }
 0x2c9   :  { %v2375_v41 = vadd.f32 %v2138_v36, %v1895_v7  ;;  %v2386_v25 = vadd.f32 %v2193_v17, %v1906_v9  ;;  %v6004_v7 = vld [vmem:[#allocation43_spill] sm:$0xff]  ;;  %v6005_v9 = vld [vmem:[#allocation69_spill] sm:$0xff] }
 0x2ca   :  { %v1907_v42 = vmul.f32 %v2719_v37, %v6004_v7  ;;  %v1918_v36 = vmul.f32 %v2720_v53, %v6005_v9  ;;  %v2731_v7 = vld [vmem:[%s5502_s0 + $0x200] sm:$0xff]  ;;  %v2732_v9 = vld [vmem:[%s5502_s0 + $0x258] sm:$0xff] }
 0x2cb   :  { %2455 = vst.msk [vmem:[%s5505_s3 + $0x140] sm:$0xff] %vm94_vm0, %v2375_v41  ;;  %2466 = vst.msk [vmem:[%s5505_s3 + $0x198] sm:$0xff] %vm94_vm0, %v2386_v25 }
 0x2cc   :  { %v2148_v48 = vpop.permute.xlu1 %2147  ;;  %v2203_v51 = vpop.permute.xlu0 %2202 }
 0x2cd   :  { %v2377_v10 = vadd.f32 %v2148_v48, %v1897_v6  ;;  %v2388_v11 = vadd.f32 %v2203_v51, %v1908_v52  ;;  %v6006_v6 = vld [vmem:[#allocation52_spill] sm:$0xff]  ;;  %v6007_v52 = vld [vmem:[#allocation70_spill] sm:$0xff] }
 0x2ce   :  { %v1909_v30 = vmul.f32 %v2721_v60, %v6006_v6  ;;  %v1920_v48 = vmul.f32 %v2722_v32, %v6007_v52  ;;  %v2733_v6 = vld [vmem:[%s5502_s0 + $0x210] sm:$0xff]  ;;  %v2734_v52 = vld [vmem:[%s5502_s0 + $0x268] sm:$0xff] }
 0x2cf   :  { %2457 = vst.msk [vmem:[%s5505_s3 + $0x150] sm:$0xff] %vm94_vm0, %v2377_v10  ;;  %2468 = vst.msk [vmem:[%s5505_s3 + $0x1a8] sm:$0xff] %vm94_vm0, %v2388_v11 }
 0x2d0   :  { %v2158_v39 = vpop.permute.xlu1 %2157  ;;  %v2213_v63 = vpop.permute.xlu0 %2212 }
 0x2d1   :  { %v2379_v54 = vadd.f32 %v2158_v39, %v1899_v56  ;;  %v2390_v22 = vadd.f32 %v2213_v63, %v1910_v0  ;;  %v6008_v56 = vld [vmem:[#allocation44_spill] sm:$0xff]  ;;  %v6009_v0 = vld [vmem:[#allocation71_spill] sm:$0xff] }
 0x2d2   :  { %v1911_v40 = vmul.f32 %v2723_v5, %v6008_v56  ;;  %v1922_v39 = vmul.f32 %v2724_v35, %v6009_v0  ;;  %v2735_v56 = vld [vmem:[%s5502_s0 + $0x220] sm:$0xff]  ;;  %v2736_v0 = vld [vmem:[%s5502_s0 + $0x278] sm:$0xff] }
 0x2d3   :  { %2459 = vst.msk [vmem:[%s5505_s3 + $0x160] sm:$0xff] %vm94_vm0, %v2379_v54  ;;  %2470 = vst.msk [vmem:[%s5505_s3 + $0x1b8] sm:$0xff] %vm94_vm0, %v2390_v22 }
 0x2d4   :  { %v2168_v21 = vpop.permute.xlu1 %2167  ;;  %v2223_v38 = vpop.permute.xlu0 %2222 }
 0x2d5   :  { %v2381_v44 = vadd.f32 %v2168_v21, %v1901_v34  ;;  %v2392_v3 = vadd.f32 %v2223_v38, %v1912_v2  ;;  %v6010_v34 = vld [vmem:[#allocation54_spill] sm:$0xff]  ;;  %v6011_v2 = vld [vmem:[#allocation72_spill] sm:$0xff] }
 0x2d6   :  { %v1913_v24 = vmul.f32 %v2725_v19, %v6010_v34  ;;  %v1924_v21 = vmul.f32 %v2726_v4, %v6011_v2  ;;  %v2737_v34 = vld [vmem:[%s5502_s0 + $0x230] sm:$0xff] }
 0x2d7   :  { %2461 = vst.msk [vmem:[%s5505_s3 + $0x170] sm:$0xff] %vm94_vm0, %v2381_v44  ;;  %2472 = vst.msk [vmem:[%s5505_s3 + $0x1c8] sm:$0xff] %vm94_vm0, %v2392_v3 }
 0x2d8   :  { %v2178_v28 = vpop.permute.xlu1 %2177  ;;  %v2233_v18 = vpop.permute.xlu0 %2232 }
 0x2d9   :  { %v2383_v27 = vadd.f32 %v2178_v28, %v1903_v33  ;;  %v2394_v13 = vadd.f32 %v2233_v18, %v1914_v57  ;;  %v6012_v33 = vld [vmem:[#allocation45_spill] sm:$0xff] }
 0x2da   :  { %v1915_v12 = vmul.f32 %v2727_v31, %v6012_v33  ;;  %v6013_v57 = vld [vmem:[#allocation73_spill] sm:$0xff]  ;;  %v2740_v33 = vld [vmem:[%s5502_s0 + $0x260] sm:$0xff] }
 0x2db   :  { %2463 = vst.msk [vmem:[%s5505_s3 + $0x180] sm:$0xff] %vm94_vm0, %v2383_v27  ;;  %2474 = vst.msk [vmem:[%s5505_s3 + $0x1d8] sm:$0xff] %vm94_vm0, %v2394_v13  ;;  %v1926_v28 = vmul.f32 %v2728_v1, %v6013_v57  ;;  %v2741_v57 = vld [vmem:[%s5502_s0 + $0x270] sm:$0xff] }
 0x2dc   :  { %v2188_v50 = vpop.permute.xlu1 %2187  ;;  %v2243_v59 = vpop.permute.xlu0 %2242 }
 0x2dd   :  { %v2385_v8 = vadd.f32 %v2188_v50, %v1905_v55  ;;  %v2396_v43 = vadd.f32 %v2243_v59, %v1916_v26  ;;  %v6014_v55 = vld [vmem:[#allocation56_spill] sm:$0xff]  ;;  %v6015_v26 = vld [vmem:[#allocation74_spill] sm:$0xff] }
 0x2de   :  { %v1917_v62 = vmul.f32 %v2729_v61, %v6014_v55  ;;  %v1928_v50 = vmul.f32 %v2730_v47, %v6015_v26 }
 0x2df   :  { %2465 = vst.msk [vmem:[%s5505_s3 + $0x190] sm:$0xff] %vm94_vm0, %v2385_v8  ;;  %2476 = vst.msk [vmem:[%s5505_s3 + $0x1e8] sm:$0xff] %vm94_vm0, %v2396_v43 }
 0x2e0   :  { %v2198_v17 = vpop.permute.xlu1 %2197  ;;  %v2253_v41 = vpop.permute.xlu0 %2252 }
 0x2e1   :  { %v2387_v25 = vadd.f32 %v2198_v17, %v1907_v42  ;;  %v2398_v49 = vadd.f32 %v2253_v41, %v1918_v36  ;;  %v6016_v42 = vld [vmem:[#allocation47_spill] sm:$0xff] }
 0x2e2   :  { %v1919_v53 = vmul.f32 %v2731_v7, %v6016_v42  ;;  %v6017_v36 = vld [vmem:[#allocation75_spill] sm:$0xff] }
 0x2e3   :  { %2467 = vst.msk [vmem:[%s5505_s3 + $0x1a0] sm:$0xff] %vm94_vm0, %v2387_v25  ;;  %2478 = vst.msk [vmem:[%s5505_s3 + $0x1f8] sm:$0xff] %vm94_vm0, %v2398_v49  ;;  %v1930_v17 = vmul.f32 %v2732_v9, %v6017_v36 }
 0x2e4   :  { %v2208_v51 = vpop.permute.xlu1 %2207  ;;  %v2263_v10 = vpop.permute.xlu0 %2262 }
 0x2e5   :  { %v2389_v11 = vadd.f32 %v2208_v51, %v1909_v30  ;;  %v2400_v46 = vadd.f32 %v2263_v10, %v1920_v48  ;;  %v6018_v30 = vld [vmem:[#allocation58_spill] sm:$0xff]  ;;  %v6019_v48 = vld [vmem:[#allocation76_spill] sm:$0xff] }
 0x2e6   :  { %v1921_v32 = vmul.f32 %v2733_v6, %v6018_v30  ;;  %v1932_v51 = vmul.f32 %v2734_v52, %v6019_v48 }
 0x2e7   :  { %2469 = vst.msk [vmem:[%s5505_s3 + $0x1b0] sm:$0xff] %vm94_vm0, %v2389_v11  ;;  %2480 = vst.msk [vmem:[%s5505_s3 + $0x208] sm:$0xff] %vm94_vm0, %v2400_v46 }
 0x2e8   :  { %v2218_v63 = vpop.permute.xlu1 %2217  ;;  %v2273_v54 = vpop.permute.xlu0 %2272 }
 0x2e9   :  { %v2391_v22 = vadd.f32 %v2218_v63, %v1911_v40  ;;  %v2402_v29 = vadd.f32 %v2273_v54, %v1922_v39  ;;  %v6020_v40 = vld [vmem:[#allocation49_spill] sm:$0xff] }
 0x2ea   :  { %v1923_v35 = vmul.f32 %v2735_v56, %v6020_v40  ;;  %v6021_v39 = vld [vmem:[#allocation77_spill] sm:$0xff] }
 0x2eb   :  { %2471 = vst.msk [vmem:[%s5505_s3 + $0x1c0] sm:$0xff] %vm94_vm0, %v2391_v22  ;;  %2482 = vst.msk [vmem:[%s5505_s3 + $0x218] sm:$0xff] %vm94_vm0, %v2402_v29  ;;  %v1934_v63 = vmul.f32 %v2736_v0, %v6021_v39 }
 0x2ec   :  { %v2228_v38 = vpop.permute.xlu1 %2227  ;;  %v2283_v44 = vpop.permute.xlu0 %2282 }
 0x2ed   :  { %v2393_v3 = vadd.f32 %v2228_v38, %v1913_v24  ;;  %v2404_v45 = vadd.f32 %v2283_v44, %v1924_v21  ;;  %v1925_v24 = vmul.f32 %v2737_v34, %v4758_v15  ;;  %v2738_v21 = vld [vmem:[%s5502_s0 + $0x240] sm:$0xff] }
 0x2ee   :  { %v1927_v38 = vmul.f32 %v2738_v21, %v4778_v20 }
 0x2ef   :  { %2473 = vst.msk [vmem:[%s5505_s3 + $0x1d0] sm:$0xff] %vm94_vm0, %v2393_v3  ;;  %2484 = vst.msk [vmem:[%s5505_s3 + $0x228] sm:$0xff] %vm94_vm0, %v2404_v45  ;;  %v2739_v3 = vld [vmem:[%s5502_s0 + $0x250] sm:$0xff] }
 0x2f0   :  { %v2238_v18 = vpop.permute.xlu1 %2237  ;;  %v2293_v27 = vpop.permute.xlu0 %2292  ;;  %v1929_v45 = vmul.f32 %v2739_v3, %v4798_v16 }
 0x2f1   :  { %v2395_v13 = vadd.f32 %v2238_v18, %v1915_v12  ;;  %v2406_v23 = vadd.f32 %v2293_v27, %v1926_v28  ;;  %v1931_v12 = vmul.f32 %v2740_v33, %v4818_v14  ;;  %v1933_v28 = vmul.f32 %v2741_v57, %v4838_v58 }
 0x2f3   :  { %2475 = vst.msk [vmem:[%s5505_s3 + $0x1e0] sm:$0xff] %vm94_vm0, %v2395_v13  ;;  %2486 = vst.msk [vmem:[%s5505_s3 + $0x238] sm:$0xff] %vm94_vm0, %v2406_v23 }
 0x2f4   :  { %v2248_v59 = vpop.permute.xlu1 %2247  ;;  %v2303_v8 = vpop.permute.xlu0 %2302 }
 0x2f5   :  { %v2397_v43 = vadd.f32 %v2248_v59, %v1917_v62  ;;  %v2408_v37 = vadd.f32 %v2303_v8, %v1928_v50 }
 0x2f7   :  { %2477 = vst.msk [vmem:[%s5505_s3 + $0x1f0] sm:$0xff] %vm94_vm0, %v2397_v43  ;;  %2488 = vst.msk [vmem:[%s5505_s3 + $0x248] sm:$0xff] %vm94_vm0, %v2408_v37 }
 0x2f8   :  { %v2258_v41 = vpop.permute.xlu1 %2257  ;;  %v2313_v25 = vpop.permute.xlu0 %2312 }
 0x2f9   :  { %v2399_v49 = vadd.f32 %v2258_v41, %v1919_v53  ;;  %v2410_v60 = vadd.f32 %v2313_v25, %v1930_v17 }
 0x2fb   :  { %2479 = vst.msk [vmem:[%s5505_s3 + $0x200] sm:$0xff] %vm94_vm0, %v2399_v49  ;;  %2490 = vst.msk [vmem:[%s5505_s3 + $0x258] sm:$0xff] %vm94_vm0, %v2410_v60 }
 0x2fc   :  { %v2268_v10 = vpop.permute.xlu1 %2267  ;;  %v2323_v11 = vpop.permute.xlu0 %2322 }
 0x2fd   :  { %v2401_v46 = vadd.f32 %v2268_v10, %v1921_v32  ;;  %v2412_v5 = vadd.f32 %v2323_v11, %v1932_v51 }
 0x2ff   :  { %2481 = vst.msk [vmem:[%s5505_s3 + $0x210] sm:$0xff] %vm94_vm0, %v2401_v46  ;;  %2492 = vst.msk [vmem:[%s5505_s3 + $0x268] sm:$0xff] %vm94_vm0, %v2412_v5 }
 0x300   :  { %v2278_v54 = vpop.permute.xlu1 %2277  ;;  %v2333_v22 = vpop.permute.xlu0 %2332 }
 0x301   :  { %v2403_v29 = vadd.f32 %v2278_v54, %v1923_v35  ;;  %v2414_v19 = vadd.f32 %v2333_v22, %v1934_v63 }
 0x303   :  { %2483 = vst.msk [vmem:[%s5505_s3 + $0x220] sm:$0xff] %vm94_vm0, %v2403_v29  ;;  %2494 = vst.msk [vmem:[%s5505_s3 + $0x278] sm:$0xff] %vm94_vm0, %v2414_v19 }
 0x304   :  { %v2288_v4 = vpop.permute.xlu1 %2287 }
 0x305   :  { %v2405_v2 = vadd.f32 %v2288_v4, %v1925_v24 }
 0x307   :  { %2485 = vst.msk [vmem:[%s5505_s3 + $0x230] sm:$0xff] %vm94_vm0, %v2405_v2 }
 0x308   :  { %v2298_v15 = vpop.permute.xlu1 %2297 }
 0x309   :  { %v2407_v44 = vadd.f32 %v2298_v15, %v1927_v38 }
 0x30b   :  { %2487 = vst.msk [vmem:[%s5505_s3 + $0x240] sm:$0xff] %vm94_vm0, %v2407_v44 }
 0x30c   :  { %v2308_v31 = vpop.permute.xlu1 %2307 }
 0x30d   :  { %v2409_v20 = vadd.f32 %v2308_v31, %v1929_v45 }
 0x30f   :  { %2489 = vst.msk [vmem:[%s5505_s3 + $0x250] sm:$0xff] %vm94_vm0, %v2409_v20 }
 0x310   :  { %v2318_v1 = vpop.permute.xlu1 %2317 }
 0x311   :  { %v2411_v16 = vadd.f32 %v2318_v1, %v1931_v12 }
 0x313   :  { %2491 = vst.msk [vmem:[%s5505_s3 + $0x260] sm:$0xff] %vm94_vm0, %v2411_v16 }
 0x314   :  { %v2328_v18 = vpop.permute.xlu1 %2327 }
 0x315   :  { %v2413_v14 = vadd.f32 %v2328_v18, %v1933_v28 }
 0x317   :  { %2493 = vst.msk [vmem:[%s5505_s3 + $0x270] sm:$0xff] %vm94_vm0, %v2413_v14 }

</bundles_post_ra>
